<compile_context>
chip_gen: v7x
topology: tpu7x:2x2x1
jax: 0.10.0
libtpu: 0.0.40
codegen_flags: <defaults>
</compile_context>

<pallas_src>
import jax
import jax.numpy as jnp
from jax import lax
from jax.experimental import pallas as pl
from jax.experimental.pallas import tpu as pltpu

_SELU_SCALE = 1.0507009873554805
_SELU_ALPHA = 1.6732632423543772


def _selu(x):
    # exp(min(x,0)) avoids inf in the unselected branch.
    return _SELU_SCALE * jnp.where(
        x > 0, x, _SELU_ALPHA * (jnp.exp(jnp.minimum(x, 0.0)) - 1.0))


# ----------------------------------------------------------------------------
# Pallas kernel: one grid step per batch element. Working layout is (C, L)
# where L = H * Wp (Wp = W + 4, W zero-padded) sits on the lane axis.
# Vertical (H) zero-padding is provided by zeroed halo margins of the VMEM
# scratch buffers; each conv tap is one (Cout, Cin) x (Cin, L) MXU matmul on a
# flat-shifted window of the scratch.
# ----------------------------------------------------------------------------
def _fta_kernel(x_ref, valid_ref, pw_ref, ph_ref, pwt_ref, pht_ref,
                sw_ref, sh_ref,
                bns_ref, bnb_ref, wr_ref, br_ref,
                w3_ref, b3_ref, w5_ref, b5_ref,
                wt1_ref, bt1_ref, wt2_ref, bt2_ref,
                wf1_ref, bf1_ref, wf2_ref, bf2_ref,
                xr_ref, out_ref,
                sA, sB):
    Cin, L = x_ref.shape
    W = pw_ref.shape[0]
    H = ph_ref.shape[0]
    Wp = L // H
    C2 = w3_ref.shape[2]          # 2 * Cout (t- and f-branch fused)
    Cout = C2 // 2
    kt = sw_ref.shape[0]
    kf = sh_ref.shape[0]
    TW = sA.shape[1]
    M = (TW - L) // 2             # halo margin (>= 2*Wp + 2)

    valid = valid_ref[...]                                          # (1, L)

    # ---------------- BatchNorm2d (eval affine) + zero the W-pad columns ----
    xn = (x_ref[...] * bns_ref[...] + bnb_ref[...]) * valid         # (Cin, L)

    # Fill scratch A (normalized input) with zero halos; halos supply the
    # vertical zero padding for both 3x3 and 5x5 convolutions.
    zA = jnp.zeros((Cin, M), jnp.float32)
    sA[:, pl.ds(0, M)] = zA
    sA[:, pl.ds(M + L, M)] = zA
    sA[:, pl.ds(M, L)] = xn
    zB = jnp.zeros((C2, M), jnp.float32)
    sB[:, pl.ds(0, M)] = zB
    sB[:, pl.ds(M + L, M)] = zB

    # ---------------- x_r = ReLU(Conv2d 1x1) ---------------------------------
    xr = jnp.dot(wr_ref[...], xn, preferred_element_type=jnp.float32) + br_ref[...]
    xr_ref[...] = jnp.maximum(xr, 0.0)                              # (Cout, L)

    # ---------------- a_t : mean over H -> Conv1d(kt) x2 -> softmax over W ---
    at0 = jnp.dot(xn, pwt_ref[...],
                  preferred_element_type=jnp.float32) * (1.0 / H)   # (Cin, W)
    acc = jnp.zeros((Cout, W), jnp.float32)
    for k in range(kt):
        shifted = jnp.dot(at0, sw_ref[k], preferred_element_type=jnp.float32)
        acc = acc + jnp.dot(wt1_ref[k], shifted, preferred_element_type=jnp.float32)
    at1 = _selu(acc + bt1_ref[...])
    acc = jnp.zeros((Cout, W), jnp.float32)
    for k in range(kt):
        shifted = jnp.dot(at1, sw_ref[k], preferred_element_type=jnp.float32)
        acc = acc + jnp.dot(wt2_ref[k], shifted, preferred_element_type=jnp.float32)
    at2 = _selu(acc + bt2_ref[...])
    mt = jnp.max(at2, axis=1, keepdims=True)
    et = jnp.exp(at2 - mt)
    a_t = et / jnp.sum(et, axis=1, keepdims=True)                   # (Cout, W)

    # ---------------- a_f : mean over W -> Conv1d(kf) x2 -> softmax over H ---
    af0 = jnp.dot(xn, pht_ref[...],
                  preferred_element_type=jnp.float32) * (1.0 / W)   # (Cin, H)
    acc = jnp.zeros((Cout, H), jnp.float32)
    for k in range(kf):
        shifted = jnp.dot(af0, sh_ref[k], preferred_element_type=jnp.float32)
        acc = acc + jnp.dot(wf1_ref[k], shifted, preferred_element_type=jnp.float32)
    af1 = _selu(acc + bf1_ref[...])
    acc = jnp.zeros((Cout, H), jnp.float32)
    for k in range(kf):
        shifted = jnp.dot(af1, sh_ref[k], preferred_element_type=jnp.float32)
        acc = acc + jnp.dot(wf2_ref[k], shifted, preferred_element_type=jnp.float32)
    af2 = _selu(acc + bf2_ref[...])
    mf = jnp.max(af2, axis=1, keepdims=True)
    ef = jnp.exp(af2 - mf)
    a_f = ef / jnp.sum(ef, axis=1, keepdims=True)                   # (Cout, H)

    # broadcast attention weights over the flat spatial layout (tiny matmuls)
    a_t_b = jnp.dot(a_t, pw_ref[...], preferred_element_type=jnp.float32)  # (Cout, L)
    a_f_b = jnp.dot(a_f, ph_ref[...], preferred_element_type=jnp.float32)  # (Cout, L)

    # ---------------- fused 3x3 convs (t & f share the same input) -----------
    acc3 = jnp.zeros((C2, L), jnp.float32)
    for dy in range(3):
        for dx in range(3):
            s = (dy - 1) * Wp + (dx - 1)
            slab = sA[:, pl.ds(M + s, L)]                           # (Cin, L)
            acc3 = acc3 + jnp.dot(w3_ref[dy, dx], slab,
                                  preferred_element_type=jnp.float32)
    h3 = _selu(acc3 + b3_ref[...]) * valid                          # zero pad cols
    sB[:, pl.ds(M, L)] = h3

    # ---------------- fused 5x5 convs (block-diagonal weights) ---------------
    acc5 = jnp.zeros((C2, L), jnp.float32)
    for dy in range(5):
        for dx in range(5):
            s = (dy - 2) * Wp + (dx - 2)
            slab = sB[:, pl.ds(M + s, L)]                           # (C2, L)
            acc5 = acc5 + jnp.dot(w5_ref[dy, dx], slab,
                                  preferred_element_type=jnp.float32)
    h5 = _selu(acc5 + b5_ref[...])                                  # (C2, L)
    out_ref[...] = h5[:Cout, :] * a_t_b + h5[Cout:, :] * a_f_b


# ----------------------------------------------------------------------------
# Wrapper: layout prep (pad W, flatten), constant pooling/shift matrices,
# weight re-layout (transpose / concat / block-diag), BlockSpecs, grid=(N,).
# ----------------------------------------------------------------------------
def fta_module_forward(x_nchw, p):
    N, Cin, H, W = x_nchw.shape
    Cout = p["wr"].shape[1]
    kt = p["wt1"].shape[0]
    kf = p["wf1"].shape[0]
    C2 = 2 * Cout
    f32 = jnp.float32

    PADW = 2                         # max horizontal pad (5x5 conv)
    Wp = W + 2 * PADW
    L = H * Wp
    M = -((-(2 * Wp + 2)) // 8) * 8  # halo margin, >= 2*Wp+2, rounded to 8
    TW = L + 2 * M

    x = x_nchw.astype(f32)
    x_flat = jnp.pad(x, ((0, 0), (0, 0), (0, 0), (PADW, PADW))).reshape(N, Cin, L)

    # ---- constant index / pooling / shift matrices (folded by XLA) ---------
    idx = jnp.arange(L)
    col = idx % Wp - PADW
    row = idx // Wp
    valid = (col >= 0) & (col < W)
    valid_mask = valid.astype(f32).reshape(1, L)
    P_w = (col[None, :] == jnp.arange(W)[:, None]).astype(f32)                      # (W, L)
    P_h = ((row[None, :] == jnp.arange(H)[:, None]) & valid[None, :]).astype(f32)   # (H, L)
    pt = (kt - 1) // 2
    pf = (kf - 1) // 2
    S_w = jnp.stack([(jnp.arange(W)[:, None] == jnp.arange(W)[None, :] + (k - pt)).astype(f32)
                     for k in range(kt)])                                           # (kt, W, W)
    S_h = jnp.stack([(jnp.arange(H)[:, None] == jnp.arange(H)[None, :] + (k - pf)).astype(f32)
                     for k in range(kf)])                                           # (kf, H, H)

    # ---- re-layout module params for the kernel ----------------------------
    wt3 = p["wt3"].transpose(0, 1, 3, 2).astype(f32)     # (3,3,Cout,Cin)
    wf3 = p["wf3"].transpose(0, 1, 3, 2).astype(f32)
    w3c = jnp.concatenate([wt3, wf3], axis=2)            # (3,3,2Cout,Cin)
    b3c = jnp.concatenate([p["bt3"][0], p["bf3"][0]]).reshape(C2, 1).astype(f32)
    wt4 = p["wt4"].transpose(0, 1, 3, 2).astype(f32)     # (5,5,Cout,Cout)
    wf4 = p["wf4"].transpose(0, 1, 3, 2).astype(f32)
    zb = jnp.zeros_like(wt4)
    w5c = jnp.concatenate([jnp.concatenate([wt4, zb], axis=3),
                           jnp.concatenate([zb, wf4], axis=3)], axis=2)   # (5,5,2Cout,2Cout)
    b5c = jnp.concatenate([p["bt4"][0], p["bf4"][0]]).reshape(C2, 1).astype(f32)

    inputs = [
        x_flat, valid_mask, P_w, P_h, P_w.T, P_h.T, S_w, S_h,
        p["bn_scale"].reshape(Cin, 1).astype(f32),
        p["bn_shift"].reshape(Cin, 1).astype(f32),
        p["wr"].T.astype(f32), p["br"].reshape(Cout, 1).astype(f32),
        w3c, b3c, w5c, b5c,
        p["wt1"].transpose(0, 2, 1).astype(f32), p["bt1"].reshape(Cout, 1).astype(f32),
        p["wt2"].transpose(0, 2, 1).astype(f32), p["bt2"].reshape(Cout, 1).astype(f32),
        p["wf1"].transpose(0, 2, 1).astype(f32), p["bf1"].reshape(Cout, 1).astype(f32),
        p["wf2"].transpose(0, 2, 1).astype(f32), p["bf2"].reshape(Cout, 1).astype(f32),
    ]

    def const_spec(a):
        nd = a.ndim
        return pl.BlockSpec(a.shape, lambda b, _nd=nd: (0,) * _nd)

    in_specs = ([pl.BlockSpec((None, Cin, L), lambda b: (b, 0, 0))]
                + [const_spec(a) for a in inputs[1:]])
    out_specs = [pl.BlockSpec((None, Cout, L), lambda b: (b, 0, 0))] * 2
    out_shape = [jax.ShapeDtypeStruct((N, Cout, L), f32)] * 2

    grid_spec = pltpu.PrefetchScalarGridSpec(
        num_scalar_prefetch=0,
        grid=(N,),
        in_specs=in_specs,
        out_specs=out_specs,
        scratch_shapes=[pltpu.VMEM((Cin, TW), f32),    # sA: halo-padded BN(x)
                        pltpu.VMEM((C2, TW), f32)],    # sB: halo-padded fused 3x3 out
    )

    xr_p, out_p = pl.pallas_call(
        _fta_kernel,
        out_shape=out_shape,
        grid_spec=grid_spec,
        compiler_params=pltpu.CompilerParams(dimension_semantics=("parallel",)),
    )(*inputs)

    # strip the W padding; outputs are already NCHW-ordered
    xr = xr_p.reshape(N, Cout, H, Wp)[:, :, :, PADW:PADW + W]
    out = out_p.reshape(N, Cout, H, Wp)[:, :, :, PADW:PADW + W]
    return xr, out


# ----------------------------------------------------------------------------
# Deterministic synthetic parameters (shapes from FTA_Module.__init__).
# ----------------------------------------------------------------------------
def init_params(key, Cin, Cout, kt, kf):
    ks = jax.random.split(key, 22)

    def nrm(k, shape, s):
        return jax.random.normal(k, shape, jnp.float32) * s

    gamma = jax.random.uniform(ks[0], (Cin,), jnp.float32, 0.5, 1.5)
    beta = nrm(ks[1], (Cin,), 0.1)
    rmean = nrm(ks[2], (Cin,), 0.1)
    rvar = jax.random.uniform(ks[3], (Cin,), jnp.float32, 0.5, 1.5)
    eps = 1e-5
    scale = gamma / jnp.sqrt(rvar + eps)
    shift = beta - rmean * scale

    return dict(
        bn_scale=scale.reshape(1, Cin),
        bn_shift=shift.reshape(1, Cin),
        wr=nrm(ks[4], (Cin, Cout), 0.3), br=nrm(ks[5], (1, Cout), 0.1),
        wt3=nrm(ks[6], (3, 3, Cin, Cout), 0.2), bt3=nrm(ks[7], (1, Cout), 0.1),
        wt4=nrm(ks[8], (5, 5, Cout, Cout), 0.1), bt4=nrm(ks[9], (1, Cout), 0.1),
        wf3=nrm(ks[10], (3, 3, Cin, Cout), 0.2), bf3=nrm(ks[11], (1, Cout), 0.1),
        wf4=nrm(ks[12], (5, 5, Cout, Cout), 0.1), bf4=nrm(ks[13], (1, Cout), 0.1),
        wt1=nrm(ks[14], (kt, Cin, Cout), 0.3), bt1=nrm(ks[15], (1, Cout), 0.1),
        wt2=nrm(ks[16], (kt, Cout, Cout), 0.2), bt2=nrm(ks[17], (1, Cout), 0.1),
        wf1=nrm(ks[18], (kf, Cin, Cout), 0.3), bf1=nrm(ks[19], (1, Cout), 0.1),
        wf2=nrm(ks[20], (kf, Cout, Cout), 0.2), bf2=nrm(ks[21], (1, Cout), 0.1),
    )


# ----------------------------------------------------------------------------
# Pure-JAX reference (mirrors the PyTorch forward, NCHW) for validation.
# ----------------------------------------------------------------------------
def _conv2d_ref(x, w, b):  # x: NCHW, w: (kh, kw, Cin, Cout), b: (Cout,)
    pad = (w.shape[0] - 1) // 2
    y = lax.conv_general_dilated(x, w, (1, 1), [(pad, pad), (pad, pad)],
                                 dimension_numbers=("NCHW", "HWIO", "NCHW"),
                                 precision=lax.Precision.HIGHEST)
    return y + b[None, :, None, None]


def _conv1d_ref(x, w, b):  # x: (N, C, L), w: (k, Cin, Cout), b: (Cout,)
    pad = (w.shape[0] - 1) // 2
    y = lax.conv_general_dilated(x[:, :, None, :], w[None], (1, 1),
                                 [(0, 0), (pad, pad)],
                                 dimension_numbers=("NCHW", "HWIO", "NCHW"),
                                 precision=lax.Precision.HIGHEST)
    return y[:, :, 0, :] + b[None, :, None]


def reference(x, p):
    scale = p["bn_scale"][0]
    shift = p["bn_shift"][0]
    xn = x * scale[None, :, None, None] + shift[None, :, None, None]

    x_r = jnp.einsum("nchw,cd->ndhw", xn, p["wr"],
                     precision=lax.Precision.HIGHEST) + p["br"][0][None, :, None, None]
    x_r = jnp.maximum(x_r, 0.0)

    a_t = jnp.mean(xn, axis=2)                               # (N, Cin, W)
    a_t = _selu(_conv1d_ref(a_t, p["wt1"], p["bt1"][0]))
    a_t = _selu(_conv1d_ref(a_t, p["wt2"], p["bt2"][0]))
    a_t = jax.nn.softmax(a_t, axis=-1)
    x_t = _selu(_conv2d_ref(xn, p["wt3"], p["bt3"][0]))
    x_t = _selu(_conv2d_ref(x_t, p["wt4"], p["bt4"][0]))
    x_t = x_t * a_t[:, :, None, :]

    a_f = jnp.mean(xn, axis=3)                               # (N, Cin, H)
    a_f = _selu(_conv1d_ref(a_f, p["wf1"], p["bf1"][0]))
    a_f = _selu(_conv1d_ref(a_f, p["wf2"], p["bf2"][0]))
    a_f = jax.nn.softmax(a_f, axis=-1)
    x_f = _selu(_conv2d_ref(xn, p["wf3"], p["bf3"][0]))
    x_f = _selu(_conv2d_ref(x_f, p["wf4"], p["bf4"][0]))
    x_f = x_f * a_f[:, :, :, None]

    return x_r, x_t + x_f


if __name__ == "__main__":
    # shape = (f_token=H, t_token=W, Cin, Cout) = (16, 16, 4, 8), kt=3, kf=5
    N, Cin, H, W, Cout = 2, 4, 16, 16, 8
    kt, kf = 3, 5

    key = jax.random.PRNGKey(0)
    kx, kp = jax.random.split(key)
    x = jax.random.normal(kx, (N, Cin, H, W), jnp.float32)
    params = init_params(kp, Cin, Cout, kt, kf)

    fwd = jax.jit(fta_module_forward)
    x_r, out = fwd(x, params)
    jax.block_until_ready((x_r, out))

    ref_r, ref_o = reference(x, params)
    err_r = float(jnp.max(jnp.abs(x_r - ref_r)))
    err_o = float(jnp.max(jnp.abs(out - ref_o)))
    assert err_r < 2e-3, f"x_r mismatch: {err_r}"
    assert err_o < 2e-3, f"x_t + x_f mismatch: {err_o}"

    print("KERNEL_OK")
</pallas_src>

<mosaic_0001>
module attributes {stable_mosaic.version = 11 : i64} {
  func.func @_fta_kernel(%arg0: i32, %arg1: memref<1x4x320xf32, #tpu.memory_space<vmem>>, %arg2: memref<1x320xf32, #tpu.memory_space<vmem>>, %arg3: memref<16x320xf32, #tpu.memory_space<vmem>>, %arg4: memref<16x320xf32, #tpu.memory_space<vmem>>, %arg5: memref<320x16xf32, #tpu.memory_space<vmem>>, %arg6: memref<320x16xf32, #tpu.memory_space<vmem>>, %arg7: memref<3x16x16xf32, #tpu.memory_space<vmem>>, %arg8: memref<5x16x16xf32, #tpu.memory_space<vmem>>, %arg9: memref<4x1xf32, #tpu.memory_space<vmem>>, %arg10: memref<4x1xf32, #tpu.memory_space<vmem>>, %arg11: memref<8x4xf32, #tpu.memory_space<vmem>>, %arg12: memref<8x1xf32, #tpu.memory_space<vmem>>, %arg13: memref<3x3x16x4xf32, #tpu.memory_space<vmem>>, %arg14: memref<16x1xf32, #tpu.memory_space<vmem>>, %arg15: memref<5x5x16x16xf32, #tpu.memory_space<vmem>>, %arg16: memref<16x1xf32, #tpu.memory_space<vmem>>, %arg17: memref<3x8x4xf32, #tpu.memory_space<vmem>>, %arg18: memref<8x1xf32, #tpu.memory_space<vmem>>, %arg19: memref<3x8x8xf32, #tpu.memory_space<vmem>>, %arg20: memref<8x1xf32, #tpu.memory_space<vmem>>, %arg21: memref<5x8x4xf32, #tpu.memory_space<vmem>>, %arg22: memref<8x1xf32, #tpu.memory_space<vmem>>, %arg23: memref<5x8x8xf32, #tpu.memory_space<vmem>>, %arg24: memref<8x1xf32, #tpu.memory_space<vmem>>, %arg25: memref<1x8x320xf32, #tpu.memory_space<vmem>>, %arg26: memref<1x8x320xf32, #tpu.memory_space<vmem>>, %arg27: memref<4x416xf32, #tpu.memory_space<vmem>>, %arg28: memref<16x416xf32, #tpu.memory_space<vmem>>) attributes {dimension_semantics = [#tpu.dimension_semantics<parallel>], iteration_bounds = array<i64: 2>, scalar_prefetch = 0 : i64, scratch_operands = 2 : i64, tpu.core_type = #tpu.core_type<tc>, window_params = [{transform_indices = @transform_0, window_bounds = array<i64: 1, 4, 320>}, {pipeline_mode = #tpu.pipeline_mode<synchronous>, transform_indices = @transform_1, window_bounds = array<i64: 1, 320>}, {pipeline_mode = #tpu.pipeline_mode<synchronous>, transform_indices = @transform_2, window_bounds = array<i64: 16, 320>}, {pipeline_mode = #tpu.pipeline_mode<synchronous>, transform_indices = @transform_3, window_bounds = array<i64: 16, 320>}, {pipeline_mode = #tpu.pipeline_mode<synchronous>, transform_indices = @transform_4, window_bounds = array<i64: 320, 16>}, {pipeline_mode = #tpu.pipeline_mode<synchronous>, transform_indices = @transform_5, window_bounds = array<i64: 320, 16>}, {pipeline_mode = #tpu.pipeline_mode<synchronous>, transform_indices = @transform_6, window_bounds = array<i64: 3, 16, 16>}, {pipeline_mode = #tpu.pipeline_mode<synchronous>, transform_indices = @transform_7, window_bounds = array<i64: 5, 16, 16>}, {pipeline_mode = #tpu.pipeline_mode<synchronous>, transform_indices = @transform_8, window_bounds = array<i64: 4, 1>}, {pipeline_mode = #tpu.pipeline_mode<synchronous>, transform_indices = @transform_9, window_bounds = array<i64: 4, 1>}, {pipeline_mode = #tpu.pipeline_mode<synchronous>, transform_indices = @transform_10, window_bounds = array<i64: 8, 4>}, {pipeline_mode = #tpu.pipeline_mode<synchronous>, transform_indices = @transform_11, window_bounds = array<i64: 8, 1>}, {pipeline_mode = #tpu.pipeline_mode<synchronous>, transform_indices = @transform_12, window_bounds = array<i64: 3, 3, 16, 4>}, {pipeline_mode = #tpu.pipeline_mode<synchronous>, transform_indices = @transform_13, window_bounds = array<i64: 16, 1>}, {pipeline_mode = #tpu.pipeline_mode<synchronous>, transform_indices = @transform_14, window_bounds = array<i64: 5, 5, 16, 16>}, {pipeline_mode = #tpu.pipeline_mode<synchronous>, transform_indices = @transform_15, window_bounds = array<i64: 16, 1>}, {pipeline_mode = #tpu.pipeline_mode<synchronous>, transform_indices = @transform_16, window_bounds = array<i64: 3, 8, 4>}, {pipeline_mode = #tpu.pipeline_mode<synchronous>, transform_indices = @transform_17, window_bounds = array<i64: 8, 1>}, {pipeline_mode = #tpu.pipeline_mode<synchronous>, transform_indices = @transform_18, window_bounds = array<i64: 3, 8, 8>}, {pipeline_mode = #tpu.pipeline_mode<synchronous>, transform_indices = @transform_19, window_bounds = array<i64: 8, 1>}, {pipeline_mode = #tpu.pipeline_mode<synchronous>, transform_indices = @transform_20, window_bounds = array<i64: 5, 8, 4>}, {pipeline_mode = #tpu.pipeline_mode<synchronous>, transform_indices = @transform_21, window_bounds = array<i64: 8, 1>}, {pipeline_mode = #tpu.pipeline_mode<synchronous>, transform_indices = @transform_22, window_bounds = array<i64: 5, 8, 8>}, {pipeline_mode = #tpu.pipeline_mode<synchronous>, transform_indices = @transform_23, window_bounds = array<i64: 8, 1>}, {transform_indices = @transform_24, window_bounds = array<i64: 1, 8, 320>}, {transform_indices = @transform_25, window_bounds = array<i64: 1, 8, 320>}]} {
    %c0 = arith.constant 0 : index
    %c0_0 = arith.constant 0 : index
    %0 = vector.load %arg2[%c0, %c0_0] : memref<1x320xf32, #tpu.memory_space<vmem>>, vector<1x320xf32>
    %c0_1 = arith.constant 0 : index
    %c0_2 = arith.constant 0 : index
    %c0_3 = arith.constant 0 : index
    %1 = vector.load %arg1[%c0_1, %c0_2, %c0_3] : memref<1x4x320xf32, #tpu.memory_space<vmem>>, vector<1x4x320xf32>
    %2 = vector.shape_cast %1 : vector<1x4x320xf32> to vector<4x320xf32>
    %c0_4 = arith.constant 0 : index
    %c0_5 = arith.constant 0 : index
    %3 = vector.load %arg9[%c0_4, %c0_5] : memref<4x1xf32, #tpu.memory_space<vmem>>, vector<4x1xf32>
    %4 = vector.broadcast %3 : vector<4x1xf32> to vector<4x320xf32>
    %5 = arith.mulf %2, %4 : vector<4x320xf32>
    %c0_6 = arith.constant 0 : index
    %c0_7 = arith.constant 0 : index
    %6 = vector.load %arg10[%c0_6, %c0_7] : memref<4x1xf32, #tpu.memory_space<vmem>>, vector<4x1xf32>
    %7 = vector.broadcast %6 : vector<4x1xf32> to vector<4x320xf32>
    %8 = arith.addf %5, %7 : vector<4x320xf32>
    %9 = vector.broadcast %0 : vector<1x320xf32> to vector<4x320xf32>
    %10 = arith.mulf %8, %9 : vector<4x320xf32>
    %cst = arith.constant 0.000000e+00 : f32
    %11 = vector.broadcast %cst : f32 to vector<4x48xf32>
    %c0_8 = arith.constant 0 : index
    %c0_9 = arith.constant 0 : index
    %12 = vector.load %arg27[%c0_8, %c0_9] : memref<4x416xf32, #tpu.memory_space<vmem>>, vector<4x48xf32>
    tpu.vector_store %arg27[%c0_8, %c0_9], %11 {strides = array<i32>} : memref<4x416xf32, #tpu.memory_space<vmem>>, vector<4x48xf32>,
    %c0_10 = arith.constant 0 : index
    %c368 = arith.constant 368 : index
    %13 = vector.load %arg27[%c0_10, %c368] : memref<4x416xf32, #tpu.memory_space<vmem>>, vector<4x48xf32>
    tpu.vector_store %arg27[%c0_10, %c368], %11 {strides = array<i32>} : memref<4x416xf32, #tpu.memory_space<vmem>>, vector<4x48xf32>,
    %c0_11 = arith.constant 0 : index
    %c48 = arith.constant 48 : index
    %14 = vector.load %arg27[%c0_11, %c48] : memref<4x416xf32, #tpu.memory_space<vmem>>, vector<4x320xf32>
    tpu.vector_store %arg27[%c0_11, %c48], %10 {strides = array<i32>} : memref<4x416xf32, #tpu.memory_space<vmem>>, vector<4x320xf32>,
    %cst_12 = arith.constant 0.000000e+00 : f32
    %15 = vector.broadcast %cst_12 : f32 to vector<16x48xf32>
    %c0_13 = arith.constant 0 : index
    %c0_14 = arith.constant 0 : index
    %16 = vector.load %arg28[%c0_13, %c0_14] : memref<16x416xf32, #tpu.memory_space<vmem>>, vector<16x48xf32>
    tpu.vector_store %arg28[%c0_13, %c0_14], %15 {strides = array<i32>} : memref<16x416xf32, #tpu.memory_space<vmem>>, vector<16x48xf32>,
    %c0_15 = arith.constant 0 : index
    %c368_16 = arith.constant 368 : index
    %17 = vector.load %arg28[%c0_15, %c368_16] : memref<16x416xf32, #tpu.memory_space<vmem>>, vector<16x48xf32>
    tpu.vector_store %arg28[%c0_15, %c368_16], %15 {strides = array<i32>} : memref<16x416xf32, #tpu.memory_space<vmem>>, vector<16x48xf32>,
    %c0_17 = arith.constant 0 : index
    %c0_18 = arith.constant 0 : index
    %18 = vector.load %arg11[%c0_17, %c0_18] : memref<8x4xf32, #tpu.memory_space<vmem>>, vector<8x4xf32>
    %cst_19 = arith.constant dense<0.000000e+00> : vector<8x320xf32>
    %19 = tpu.matmul %18, %10, %cst_19 {dimension_numbers = #tpu.dot_dimension_numbers<[1], [0], [0], [1], [0, 0, 1, 1], [], []>} : vector<8x4xf32>, vector<4x320xf32>, vector<8x320xf32> -> vector<8x320xf32>
    %c0_20 = arith.constant 0 : index
    %c0_21 = arith.constant 0 : index
    %20 = vector.load %arg12[%c0_20, %c0_21] : memref<8x1xf32, #tpu.memory_space<vmem>>, vector<8x1xf32>
    %21 = vector.broadcast %20 : vector<8x1xf32> to vector<8x320xf32>
    %22 = arith.addf %19, %21 : vector<8x320xf32>
    %cst_22 = arith.constant 0.000000e+00 : f32
    %23 = vector.broadcast %cst_22 : f32 to vector<8x320xf32>
    %24 = arith.maximumf %22, %23 : vector<8x320xf32>
    %c0_23 = arith.constant 0 : index
    %c0_24 = arith.constant 0 : index
    %c0_25 = arith.constant 0 : index
    %25 = vector.load %arg25[%c0_23, %c0_24, %c0_25] : memref<1x8x320xf32, #tpu.memory_space<vmem>>, vector<1x8x320xf32>
    %26 = vector.shape_cast %25 : vector<1x8x320xf32> to vector<8x320xf32>
    %27 = vector.shape_cast %24 : vector<8x320xf32> to vector<1x8x320xf32>
    tpu.vector_store %arg25[%c0_23, %c0_24, %c0_25], %27 {strides = array<i32>} : memref<1x8x320xf32, #tpu.memory_space<vmem>>, vector<1x8x320xf32>,
    %c0_26 = arith.constant 0 : index
    %c0_27 = arith.constant 0 : index
    %28 = vector.load %arg5[%c0_26, %c0_27] : memref<320x16xf32, #tpu.memory_space<vmem>>, vector<320x16xf32>
    %cst_28 = arith.constant dense<0.000000e+00> : vector<4x16xf32>
    %29 = tpu.matmul %10, %28, %cst_28 {dimension_numbers = #tpu.dot_dimension_numbers<[1], [0], [0], [1], [0, 0, 1, 1], [], []>} : vector<4x320xf32>, vector<320x16xf32>, vector<4x16xf32> -> vector<4x16xf32>
    %cst_29 = arith.constant 6.250000e-02 : f32
    %30 = vector.broadcast %cst_29 : f32 to vector<4x16xf32>
    %31 = arith.mulf %29, %30 : vector<4x16xf32>
    %cst_30 = arith.constant 0.000000e+00 : f32
    %32 = vector.broadcast %cst_30 : f32 to vector<8x16xf32>
    %c0_31 = arith.constant 0 : index
    %c0_32 = arith.constant 0 : index
    %c0_33 = arith.constant 0 : index
    %33 = vector.load %arg7[%c0_31, %c0_32, %c0_33] : memref<3x16x16xf32, #tpu.memory_space<vmem>>, vector<1x16x16xf32>
    %34 = vector.shape_cast %33 : vector<1x16x16xf32> to vector<16x16xf32>
    %cst_34 = arith.constant dense<0.000000e+00> : vector<4x16xf32>
    %35 = tpu.matmul %31, %34, %cst_34 {dimension_numbers = #tpu.dot_dimension_numbers<[1], [0], [0], [1], [0, 0, 1, 1], [], []>} : vector<4x16xf32>, vector<16x16xf32>, vector<4x16xf32> -> vector<4x16xf32>
    %c0_35 = arith.constant 0 : index
    %c0_36 = arith.constant 0 : index
    %c0_37 = arith.constant 0 : index
    %36 = vector.load %arg17[%c0_35, %c0_36, %c0_37] : memref<3x8x4xf32, #tpu.memory_space<vmem>>, vector<1x8x4xf32>
    %37 = vector.shape_cast %36 : vector<1x8x4xf32> to vector<8x4xf32>
    %cst_38 = arith.constant dense<0.000000e+00> : vector<8x16xf32>
    %38 = tpu.matmul %37, %35, %cst_38 {dimension_numbers = #tpu.dot_dimension_numbers<[1], [0], [0], [1], [0, 0, 1, 1], [], []>} : vector<8x4xf32>, vector<4x16xf32>, vector<8x16xf32> -> vector<8x16xf32>
    %39 = arith.addf %32, %38 : vector<8x16xf32>
    %c1 = arith.constant 1 : index
    %c0_39 = arith.constant 0 : index
    %c0_40 = arith.constant 0 : index
    %40 = vector.load %arg7[%c1, %c0_39, %c0_40] : memref<3x16x16xf32, #tpu.memory_space<vmem>>, vector<1x16x16xf32>
    %41 = vector.shape_cast %40 : vector<1x16x16xf32> to vector<16x16xf32>
    %cst_41 = arith.constant dense<0.000000e+00> : vector<4x16xf32>
    %42 = tpu.matmul %31, %41, %cst_41 {dimension_numbers = #tpu.dot_dimension_numbers<[1], [0], [0], [1], [0, 0, 1, 1], [], []>} : vector<4x16xf32>, vector<16x16xf32>, vector<4x16xf32> -> vector<4x16xf32>
    %c1_42 = arith.constant 1 : index
    %c0_43 = arith.constant 0 : index
    %c0_44 = arith.constant 0 : index
    %43 = vector.load %arg17[%c1_42, %c0_43, %c0_44] : memref<3x8x4xf32, #tpu.memory_space<vmem>>, vector<1x8x4xf32>
    %44 = vector.shape_cast %43 : vector<1x8x4xf32> to vector<8x4xf32>
    %cst_45 = arith.constant dense<0.000000e+00> : vector<8x16xf32>
    %45 = tpu.matmul %44, %42, %cst_45 {dimension_numbers = #tpu.dot_dimension_numbers<[1], [0], [0], [1], [0, 0, 1, 1], [], []>} : vector<8x4xf32>, vector<4x16xf32>, vector<8x16xf32> -> vector<8x16xf32>
    %46 = arith.addf %39, %45 : vector<8x16xf32>
    %c2 = arith.constant 2 : index
    %c0_46 = arith.constant 0 : index
    %c0_47 = arith.constant 0 : index
    %47 = vector.load %arg7[%c2, %c0_46, %c0_47] : memref<3x16x16xf32, #tpu.memory_space<vmem>>, vector<1x16x16xf32>
    %48 = vector.shape_cast %47 : vector<1x16x16xf32> to vector<16x16xf32>
    %cst_48 = arith.constant dense<0.000000e+00> : vector<4x16xf32>
    %49 = tpu.matmul %31, %48, %cst_48 {dimension_numbers = #tpu.dot_dimension_numbers<[1], [0], [0], [1], [0, 0, 1, 1], [], []>} : vector<4x16xf32>, vector<16x16xf32>, vector<4x16xf32> -> vector<4x16xf32>
    %c2_49 = arith.constant 2 : index
    %c0_50 = arith.constant 0 : index
    %c0_51 = arith.constant 0 : index
    %50 = vector.load %arg17[%c2_49, %c0_50, %c0_51] : memref<3x8x4xf32, #tpu.memory_space<vmem>>, vector<1x8x4xf32>
    %51 = vector.shape_cast %50 : vector<1x8x4xf32> to vector<8x4xf32>
    %cst_52 = arith.constant dense<0.000000e+00> : vector<8x16xf32>
    %52 = tpu.matmul %51, %49, %cst_52 {dimension_numbers = #tpu.dot_dimension_numbers<[1], [0], [0], [1], [0, 0, 1, 1], [], []>} : vector<8x4xf32>, vector<4x16xf32>, vector<8x16xf32> -> vector<8x16xf32>
    %53 = arith.addf %46, %52 : vector<8x16xf32>
    %c0_53 = arith.constant 0 : index
    %c0_54 = arith.constant 0 : index
    %54 = vector.load %arg18[%c0_53, %c0_54] : memref<8x1xf32, #tpu.memory_space<vmem>>, vector<8x1xf32>
    %55 = vector.broadcast %54 : vector<8x1xf32> to vector<8x16xf32>
    %56 = arith.addf %53, %55 : vector<8x16xf32>
    %cst_55 = arith.constant 0.000000e+00 : f32
    %57 = vector.broadcast %cst_55 : f32 to vector<8x16xf32>
    %58 = arith.cmpf ogt, %56, %57 : vector<8x16xf32>
    %cst_56 = arith.constant 0.000000e+00 : f32
    %59 = vector.broadcast %cst_56 : f32 to vector<8x16xf32>
    %60 = arith.minimumf %56, %59 : vector<8x16xf32>
    %61 = math.exp %60 : vector<8x16xf32>
    %cst_57 = arith.constant 1.000000e+00 : f32
    %62 = vector.broadcast %cst_57 : f32 to vector<8x16xf32>
    %63 = arith.subf %61, %62 : vector<8x16xf32>
    %cst_58 = arith.constant 1.67326319 : f32
    %64 = vector.broadcast %cst_58 : f32 to vector<8x16xf32>
    %65 = arith.mulf %64, %63 : vector<8x16xf32>
    %66 = arith.select %58, %56, %65 : vector<8x16xi1>, vector<8x16xf32>
    %cst_59 = arith.constant 1.05070102 : f32
    %67 = vector.broadcast %cst_59 : f32 to vector<8x16xf32>
    %68 = arith.mulf %67, %66 : vector<8x16xf32>
    %cst_60 = arith.constant 0.000000e+00 : f32
    %69 = vector.broadcast %cst_60 : f32 to vector<8x16xf32>
    %c0_61 = arith.constant 0 : index
    %c0_62 = arith.constant 0 : index
    %c0_63 = arith.constant 0 : index
    %70 = vector.load %arg7[%c0_61, %c0_62, %c0_63] : memref<3x16x16xf32, #tpu.memory_space<vmem>>, vector<1x16x16xf32>
    %71 = vector.shape_cast %70 : vector<1x16x16xf32> to vector<16x16xf32>
    %cst_64 = arith.constant dense<0.000000e+00> : vector<8x16xf32>
    %72 = tpu.matmul %68, %71, %cst_64 {dimension_numbers = #tpu.dot_dimension_numbers<[1], [0], [0], [1], [0, 0, 1, 1], [], []>} : vector<8x16xf32>, vector<16x16xf32>, vector<8x16xf32> -> vector<8x16xf32>
    %c0_65 = arith.constant 0 : index
    %c0_66 = arith.constant 0 : index
    %c0_67 = arith.constant 0 : index
    %73 = vector.load %arg19[%c0_65, %c0_66, %c0_67] : memref<3x8x8xf32, #tpu.memory_space<vmem>>, vector<1x8x8xf32>
    %74 = vector.shape_cast %73 : vector<1x8x8xf32> to vector<8x8xf32>
    %cst_68 = arith.constant dense<0.000000e+00> : vector<8x16xf32>
    %75 = tpu.matmul %74, %72, %cst_68 {dimension_numbers = #tpu.dot_dimension_numbers<[1], [0], [0], [1], [0, 0, 1, 1], [], []>} : vector<8x8xf32>, vector<8x16xf32>, vector<8x16xf32> -> vector<8x16xf32>
    %76 = arith.addf %69, %75 : vector<8x16xf32>
    %c1_69 = arith.constant 1 : index
    %c0_70 = arith.constant 0 : index
    %c0_71 = arith.constant 0 : index
    %77 = vector.load %arg7[%c1_69, %c0_70, %c0_71] : memref<3x16x16xf32, #tpu.memory_space<vmem>>, vector<1x16x16xf32>
    %78 = vector.shape_cast %77 : vector<1x16x16xf32> to vector<16x16xf32>
    %cst_72 = arith.constant dense<0.000000e+00> : vector<8x16xf32>
    %79 = tpu.matmul %68, %78, %cst_72 {dimension_numbers = #tpu.dot_dimension_numbers<[1], [0], [0], [1], [0, 0, 1, 1], [], []>} : vector<8x16xf32>, vector<16x16xf32>, vector<8x16xf32> -> vector<8x16xf32>
    %c1_73 = arith.constant 1 : index
    %c0_74 = arith.constant 0 : index
    %c0_75 = arith.constant 0 : index
    %80 = vector.load %arg19[%c1_73, %c0_74, %c0_75] : memref<3x8x8xf32, #tpu.memory_space<vmem>>, vector<1x8x8xf32>
    %81 = vector.shape_cast %80 : vector<1x8x8xf32> to vector<8x8xf32>
    %cst_76 = arith.constant dense<0.000000e+00> : vector<8x16xf32>
    %82 = tpu.matmul %81, %79, %cst_76 {dimension_numbers = #tpu.dot_dimension_numbers<[1], [0], [0], [1], [0, 0, 1, 1], [], []>} : vector<8x8xf32>, vector<8x16xf32>, vector<8x16xf32> -> vector<8x16xf32>
    %83 = arith.addf %76, %82 : vector<8x16xf32>
    %c2_77 = arith.constant 2 : index
    %c0_78 = arith.constant 0 : index
    %c0_79 = arith.constant 0 : index
    %84 = vector.load %arg7[%c2_77, %c0_78, %c0_79] : memref<3x16x16xf32, #tpu.memory_space<vmem>>, vector<1x16x16xf32>
    %85 = vector.shape_cast %84 : vector<1x16x16xf32> to vector<16x16xf32>
    %cst_80 = arith.constant dense<0.000000e+00> : vector<8x16xf32>
    %86 = tpu.matmul %68, %85, %cst_80 {dimension_numbers = #tpu.dot_dimension_numbers<[1], [0], [0], [1], [0, 0, 1, 1], [], []>} : vector<8x16xf32>, vector<16x16xf32>, vector<8x16xf32> -> vector<8x16xf32>
    %c2_81 = arith.constant 2 : index
    %c0_82 = arith.constant 0 : index
    %c0_83 = arith.constant 0 : index
    %87 = vector.load %arg19[%c2_81, %c0_82, %c0_83] : memref<3x8x8xf32, #tpu.memory_space<vmem>>, vector<1x8x8xf32>
    %88 = vector.shape_cast %87 : vector<1x8x8xf32> to vector<8x8xf32>
    %cst_84 = arith.constant dense<0.000000e+00> : vector<8x16xf32>
    %89 = tpu.matmul %88, %86, %cst_84 {dimension_numbers = #tpu.dot_dimension_numbers<[1], [0], [0], [1], [0, 0, 1, 1], [], []>} : vector<8x8xf32>, vector<8x16xf32>, vector<8x16xf32> -> vector<8x16xf32>
    %90 = arith.addf %83, %89 : vector<8x16xf32>
    %c0_85 = arith.constant 0 : index
    %c0_86 = arith.constant 0 : index
    %91 = vector.load %arg20[%c0_85, %c0_86] : memref<8x1xf32, #tpu.memory_space<vmem>>, vector<8x1xf32>
    %92 = vector.broadcast %91 : vector<8x1xf32> to vector<8x16xf32>
    %93 = arith.addf %90, %92 : vector<8x16xf32>
    %cst_87 = arith.constant 0.000000e+00 : f32
    %94 = vector.broadcast %cst_87 : f32 to vector<8x16xf32>
    %95 = arith.cmpf ogt, %93, %94 : vector<8x16xf32>
    %cst_88 = arith.constant 0.000000e+00 : f32
    %96 = vector.broadcast %cst_88 : f32 to vector<8x16xf32>
    %97 = arith.minimumf %93, %96 : vector<8x16xf32>
    %98 = math.exp %97 : vector<8x16xf32>
    %cst_89 = arith.constant 1.000000e+00 : f32
    %99 = vector.broadcast %cst_89 : f32 to vector<8x16xf32>
    %100 = arith.subf %98, %99 : vector<8x16xf32>
    %cst_90 = arith.constant 1.67326319 : f32
    %101 = vector.broadcast %cst_90 : f32 to vector<8x16xf32>
    %102 = arith.mulf %101, %100 : vector<8x16xf32>
    %103 = arith.select %95, %93, %102 : vector<8x16xi1>, vector<8x16xf32>
    %cst_91 = arith.constant 1.05070102 : f32
    %104 = vector.broadcast %cst_91 : f32 to vector<8x16xf32>
    %105 = arith.mulf %104, %103 : vector<8x16xf32>
    %cst_92 = arith.constant dense<0xFF800000> : vector<8xf32>
    %106 = vector.multi_reduction <maximumf>, %105, %cst_92 [1] : vector<8x16xf32> to vector<8xf32>
    %107 = vector.shape_cast %106 : vector<8xf32> to vector<8x1xf32>
    %108 = vector.broadcast %107 : vector<8x1xf32> to vector<8x16xf32>
    %109 = arith.subf %105, %108 : vector<8x16xf32>
    %110 = math.exp %109 : vector<8x16xf32>
    %cst_93 = arith.constant dense<0.000000e+00> : vector<8xf32>
    %111 = vector.multi_reduction <add>, %110, %cst_93 [1] : vector<8x16xf32> to vector<8xf32>
    %112 = vector.shape_cast %111 : vector<8xf32> to vector<8x1xf32>
    %113 = vector.broadcast %112 : vector<8x1xf32> to vector<8x16xf32>
    %114 = arith.divf %110, %113 : vector<8x16xf32>
    %c0_94 = arith.constant 0 : index
    %c0_95 = arith.constant 0 : index
    %115 = vector.load %arg6[%c0_94, %c0_95] : memref<320x16xf32, #tpu.memory_space<vmem>>, vector<320x16xf32>
    %cst_96 = arith.constant dense<0.000000e+00> : vector<4x16xf32>
    %116 = tpu.matmul %10, %115, %cst_96 {dimension_numbers = #tpu.dot_dimension_numbers<[1], [0], [0], [1], [0, 0, 1, 1], [], []>} : vector<4x320xf32>, vector<320x16xf32>, vector<4x16xf32> -> vector<4x16xf32>
    %cst_97 = arith.constant 6.250000e-02 : f32
    %117 = vector.broadcast %cst_97 : f32 to vector<4x16xf32>
    %118 = arith.mulf %116, %117 : vector<4x16xf32>
    %cst_98 = arith.constant 0.000000e+00 : f32
    %119 = vector.broadcast %cst_98 : f32 to vector<8x16xf32>
    %c0_99 = arith.constant 0 : index
    %c0_100 = arith.constant 0 : index
    %c0_101 = arith.constant 0 : index
    %120 = vector.load %arg8[%c0_99, %c0_100, %c0_101] : memref<5x16x16xf32, #tpu.memory_space<vmem>>, vector<1x16x16xf32>
    %121 = vector.shape_cast %120 : vector<1x16x16xf32> to vector<16x16xf32>
    %cst_102 = arith.constant dense<0.000000e+00> : vector<4x16xf32>
    %122 = tpu.matmul %118, %121, %cst_102 {dimension_numbers = #tpu.dot_dimension_numbers<[1], [0], [0], [1], [0, 0, 1, 1], [], []>} : vector<4x16xf32>, vector<16x16xf32>, vector<4x16xf32> -> vector<4x16xf32>
    %c0_103 = arith.constant 0 : index
    %c0_104 = arith.constant 0 : index
    %c0_105 = arith.constant 0 : index
    %123 = vector.load %arg21[%c0_103, %c0_104, %c0_105] : memref<5x8x4xf32, #tpu.memory_space<vmem>>, vector<1x8x4xf32>
    %124 = vector.shape_cast %123 : vector<1x8x4xf32> to vector<8x4xf32>
    %cst_106 = arith.constant dense<0.000000e+00> : vector<8x16xf32>
    %125 = tpu.matmul %124, %122, %cst_106 {dimension_numbers = #tpu.dot_dimension_numbers<[1], [0], [0], [1], [0, 0, 1, 1], [], []>} : vector<8x4xf32>, vector<4x16xf32>, vector<8x16xf32> -> vector<8x16xf32>
    %126 = arith.addf %119, %125 : vector<8x16xf32>
    %c1_107 = arith.constant 1 : index
    %c0_108 = arith.constant 0 : index
    %c0_109 = arith.constant 0 : index
    %127 = vector.load %arg8[%c1_107, %c0_108, %c0_109] : memref<5x16x16xf32, #tpu.memory_space<vmem>>, vector<1x16x16xf32>
    %128 = vector.shape_cast %127 : vector<1x16x16xf32> to vector<16x16xf32>
    %cst_110 = arith.constant dense<0.000000e+00> : vector<4x16xf32>
    %129 = tpu.matmul %118, %128, %cst_110 {dimension_numbers = #tpu.dot_dimension_numbers<[1], [0], [0], [1], [0, 0, 1, 1], [], []>} : vector<4x16xf32>, vector<16x16xf32>, vector<4x16xf32> -> vector<4x16xf32>
    %c1_111 = arith.constant 1 : index
    %c0_112 = arith.constant 0 : index
    %c0_113 = arith.constant 0 : index
    %130 = vector.load %arg21[%c1_111, %c0_112, %c0_113] : memref<5x8x4xf32, #tpu.memory_space<vmem>>, vector<1x8x4xf32>
    %131 = vector.shape_cast %130 : vector<1x8x4xf32> to vector<8x4xf32>
    %cst_114 = arith.constant dense<0.000000e+00> : vector<8x16xf32>
    %132 = tpu.matmul %131, %129, %cst_114 {dimension_numbers = #tpu.dot_dimension_numbers<[1], [0], [0], [1], [0, 0, 1, 1], [], []>} : vector<8x4xf32>, vector<4x16xf32>, vector<8x16xf32> -> vector<8x16xf32>
    %133 = arith.addf %126, %132 : vector<8x16xf32>
    %c2_115 = arith.constant 2 : index
    %c0_116 = arith.constant 0 : index
    %c0_117 = arith.constant 0 : index
    %134 = vector.load %arg8[%c2_115, %c0_116, %c0_117] : memref<5x16x16xf32, #tpu.memory_space<vmem>>, vector<1x16x16xf32>
    %135 = vector.shape_cast %134 : vector<1x16x16xf32> to vector<16x16xf32>
    %cst_118 = arith.constant dense<0.000000e+00> : vector<4x16xf32>
    %136 = tpu.matmul %118, %135, %cst_118 {dimension_numbers = #tpu.dot_dimension_numbers<[1], [0], [0], [1], [0, 0, 1, 1], [], []>} : vector<4x16xf32>, vector<16x16xf32>, vector<4x16xf32> -> vector<4x16xf32>
    %c2_119 = arith.constant 2 : index
    %c0_120 = arith.constant 0 : index
    %c0_121 = arith.constant 0 : index
    %137 = vector.load %arg21[%c2_119, %c0_120, %c0_121] : memref<5x8x4xf32, #tpu.memory_space<vmem>>, vector<1x8x4xf32>
    %138 = vector.shape_cast %137 : vector<1x8x4xf32> to vector<8x4xf32>
    %cst_122 = arith.constant dense<0.000000e+00> : vector<8x16xf32>
    %139 = tpu.matmul %138, %136, %cst_122 {dimension_numbers = #tpu.dot_dimension_numbers<[1], [0], [0], [1], [0, 0, 1, 1], [], []>} : vector<8x4xf32>, vector<4x16xf32>, vector<8x16xf32> -> vector<8x16xf32>
    %140 = arith.addf %133, %139 : vector<8x16xf32>
    %c3 = arith.constant 3 : index
    %c0_123 = arith.constant 0 : index
    %c0_124 = arith.constant 0 : index
    %141 = vector.load %arg8[%c3, %c0_123, %c0_124] : memref<5x16x16xf32, #tpu.memory_space<vmem>>, vector<1x16x16xf32>
    %142 = vector.shape_cast %141 : vector<1x16x16xf32> to vector<16x16xf32>
    %cst_125 = arith.constant dense<0.000000e+00> : vector<4x16xf32>
    %143 = tpu.matmul %118, %142, %cst_125 {dimension_numbers = #tpu.dot_dimension_numbers<[1], [0], [0], [1], [0, 0, 1, 1], [], []>} : vector<4x16xf32>, vector<16x16xf32>, vector<4x16xf32> -> vector<4x16xf32>
    %c3_126 = arith.constant 3 : index
    %c0_127 = arith.constant 0 : index
    %c0_128 = arith.constant 0 : index
    %144 = vector.load %arg21[%c3_126, %c0_127, %c0_128] : memref<5x8x4xf32, #tpu.memory_space<vmem>>, vector<1x8x4xf32>
    %145 = vector.shape_cast %144 : vector<1x8x4xf32> to vector<8x4xf32>
    %cst_129 = arith.constant dense<0.000000e+00> : vector<8x16xf32>
    %146 = tpu.matmul %145, %143, %cst_129 {dimension_numbers = #tpu.dot_dimension_numbers<[1], [0], [0], [1], [0, 0, 1, 1], [], []>} : vector<8x4xf32>, vector<4x16xf32>, vector<8x16xf32> -> vector<8x16xf32>
    %147 = arith.addf %140, %146 : vector<8x16xf32>
    %c4 = arith.constant 4 : index
    %c0_130 = arith.constant 0 : index
    %c0_131 = arith.constant 0 : index
    %148 = vector.load %arg8[%c4, %c0_130, %c0_131] : memref<5x16x16xf32, #tpu.memory_space<vmem>>, vector<1x16x16xf32>
    %149 = vector.shape_cast %148 : vector<1x16x16xf32> to vector<16x16xf32>
    %cst_132 = arith.constant dense<0.000000e+00> : vector<4x16xf32>
    %150 = tpu.matmul %118, %149, %cst_132 {dimension_numbers = #tpu.dot_dimension_numbers<[1], [0], [0], [1], [0, 0, 1, 1], [], []>} : vector<4x16xf32>, vector<16x16xf32>, vector<4x16xf32> -> vector<4x16xf32>
    %c4_133 = arith.constant 4 : index
    %c0_134 = arith.constant 0 : index
    %c0_135 = arith.constant 0 : index
    %151 = vector.load %arg21[%c4_133, %c0_134, %c0_135] : memref<5x8x4xf32, #tpu.memory_space<vmem>>, vector<1x8x4xf32>
    %152 = vector.shape_cast %151 : vector<1x8x4xf32> to vector<8x4xf32>
    %cst_136 = arith.constant dense<0.000000e+00> : vector<8x16xf32>
    %153 = tpu.matmul %152, %150, %cst_136 {dimension_numbers = #tpu.dot_dimension_numbers<[1], [0], [0], [1], [0, 0, 1, 1], [], []>} : vector<8x4xf32>, vector<4x16xf32>, vector<8x16xf32> -> vector<8x16xf32>
    %154 = arith.addf %147, %153 : vector<8x16xf32>
    %c0_137 = arith.constant 0 : index
    %c0_138 = arith.constant 0 : index
    %155 = vector.load %arg22[%c0_137, %c0_138] : memref<8x1xf32, #tpu.memory_space<vmem>>, vector<8x1xf32>
    %156 = vector.broadcast %155 : vector<8x1xf32> to vector<8x16xf32>
    %157 = arith.addf %154, %156 : vector<8x16xf32>
    %cst_139 = arith.constant 0.000000e+00 : f32
    %158 = vector.broadcast %cst_139 : f32 to vector<8x16xf32>
    %159 = arith.cmpf ogt, %157, %158 : vector<8x16xf32>
    %cst_140 = arith.constant 0.000000e+00 : f32
    %160 = vector.broadcast %cst_140 : f32 to vector<8x16xf32>
    %161 = arith.minimumf %157, %160 : vector<8x16xf32>
    %162 = math.exp %161 : vector<8x16xf32>
    %cst_141 = arith.constant 1.000000e+00 : f32
    %163 = vector.broadcast %cst_141 : f32 to vector<8x16xf32>
    %164 = arith.subf %162, %163 : vector<8x16xf32>
    %cst_142 = arith.constant 1.67326319 : f32
    %165 = vector.broadcast %cst_142 : f32 to vector<8x16xf32>
    %166 = arith.mulf %165, %164 : vector<8x16xf32>
    %167 = arith.select %159, %157, %166 : vector<8x16xi1>, vector<8x16xf32>
    %cst_143 = arith.constant 1.05070102 : f32
    %168 = vector.broadcast %cst_143 : f32 to vector<8x16xf32>
    %169 = arith.mulf %168, %167 : vector<8x16xf32>
    %cst_144 = arith.constant 0.000000e+00 : f32
    %170 = vector.broadcast %cst_144 : f32 to vector<8x16xf32>
    %c0_145 = arith.constant 0 : index
    %c0_146 = arith.constant 0 : index
    %c0_147 = arith.constant 0 : index
    %171 = vector.load %arg8[%c0_145, %c0_146, %c0_147] : memref<5x16x16xf32, #tpu.memory_space<vmem>>, vector<1x16x16xf32>
    %172 = vector.shape_cast %171 : vector<1x16x16xf32> to vector<16x16xf32>
    %cst_148 = arith.constant dense<0.000000e+00> : vector<8x16xf32>
    %173 = tpu.matmul %169, %172, %cst_148 {dimension_numbers = #tpu.dot_dimension_numbers<[1], [0], [0], [1], [0, 0, 1, 1], [], []>} : vector<8x16xf32>, vector<16x16xf32>, vector<8x16xf32> -> vector<8x16xf32>
    %c0_149 = arith.constant 0 : index
    %c0_150 = arith.constant 0 : index
    %c0_151 = arith.constant 0 : index
    %174 = vector.load %arg23[%c0_149, %c0_150, %c0_151] : memref<5x8x8xf32, #tpu.memory_space<vmem>>, vector<1x8x8xf32>
    %175 = vector.shape_cast %174 : vector<1x8x8xf32> to vector<8x8xf32>
    %cst_152 = arith.constant dense<0.000000e+00> : vector<8x16xf32>
    %176 = tpu.matmul %175, %173, %cst_152 {dimension_numbers = #tpu.dot_dimension_numbers<[1], [0], [0], [1], [0, 0, 1, 1], [], []>} : vector<8x8xf32>, vector<8x16xf32>, vector<8x16xf32> -> vector<8x16xf32>
    %177 = arith.addf %170, %176 : vector<8x16xf32>
    %c1_153 = arith.constant 1 : index
    %c0_154 = arith.constant 0 : index
    %c0_155 = arith.constant 0 : index
    %178 = vector.load %arg8[%c1_153, %c0_154, %c0_155] : memref<5x16x16xf32, #tpu.memory_space<vmem>>, vector<1x16x16xf32>
    %179 = vector.shape_cast %178 : vector<1x16x16xf32> to vector<16x16xf32>
    %cst_156 = arith.constant dense<0.000000e+00> : vector<8x16xf32>
    %180 = tpu.matmul %169, %179, %cst_156 {dimension_numbers = #tpu.dot_dimension_numbers<[1], [0], [0], [1], [0, 0, 1, 1], [], []>} : vector<8x16xf32>, vector<16x16xf32>, vector<8x16xf32> -> vector<8x16xf32>
    %c1_157 = arith.constant 1 : index
    %c0_158 = arith.constant 0 : index
    %c0_159 = arith.constant 0 : index
    %181 = vector.load %arg23[%c1_157, %c0_158, %c0_159] : memref<5x8x8xf32, #tpu.memory_space<vmem>>, vector<1x8x8xf32>
    %182 = vector.shape_cast %181 : vector<1x8x8xf32> to vector<8x8xf32>
    %cst_160 = arith.constant dense<0.000000e+00> : vector<8x16xf32>
    %183 = tpu.matmul %182, %180, %cst_160 {dimension_numbers = #tpu.dot_dimension_numbers<[1], [0], [0], [1], [0, 0, 1, 1], [], []>} : vector<8x8xf32>, vector<8x16xf32>, vector<8x16xf32> -> vector<8x16xf32>
    %184 = arith.addf %177, %183 : vector<8x16xf32>
    %c2_161 = arith.constant 2 : index
    %c0_162 = arith.constant 0 : index
    %c0_163 = arith.constant 0 : index
    %185 = vector.load %arg8[%c2_161, %c0_162, %c0_163] : memref<5x16x16xf32, #tpu.memory_space<vmem>>, vector<1x16x16xf32>
    %186 = vector.shape_cast %185 : vector<1x16x16xf32> to vector<16x16xf32>
    %cst_164 = arith.constant dense<0.000000e+00> : vector<8x16xf32>
    %187 = tpu.matmul %169, %186, %cst_164 {dimension_numbers = #tpu.dot_dimension_numbers<[1], [0], [0], [1], [0, 0, 1, 1], [], []>} : vector<8x16xf32>, vector<16x16xf32>, vector<8x16xf32> -> vector<8x16xf32>
    %c2_165 = arith.constant 2 : index
    %c0_166 = arith.constant 0 : index
    %c0_167 = arith.constant 0 : index
    %188 = vector.load %arg23[%c2_165, %c0_166, %c0_167] : memref<5x8x8xf32, #tpu.memory_space<vmem>>, vector<1x8x8xf32>
    %189 = vector.shape_cast %188 : vector<1x8x8xf32> to vector<8x8xf32>
    %cst_168 = arith.constant dense<0.000000e+00> : vector<8x16xf32>
    %190 = tpu.matmul %189, %187, %cst_168 {dimension_numbers = #tpu.dot_dimension_numbers<[1], [0], [0], [1], [0, 0, 1, 1], [], []>} : vector<8x8xf32>, vector<8x16xf32>, vector<8x16xf32> -> vector<8x16xf32>
    %191 = arith.addf %184, %190 : vector<8x16xf32>
    %c3_169 = arith.constant 3 : index
    %c0_170 = arith.constant 0 : index
    %c0_171 = arith.constant 0 : index
    %192 = vector.load %arg8[%c3_169, %c0_170, %c0_171] : memref<5x16x16xf32, #tpu.memory_space<vmem>>, vector<1x16x16xf32>
    %193 = vector.shape_cast %192 : vector<1x16x16xf32> to vector<16x16xf32>
    %cst_172 = arith.constant dense<0.000000e+00> : vector<8x16xf32>
    %194 = tpu.matmul %169, %193, %cst_172 {dimension_numbers = #tpu.dot_dimension_numbers<[1], [0], [0], [1], [0, 0, 1, 1], [], []>} : vector<8x16xf32>, vector<16x16xf32>, vector<8x16xf32> -> vector<8x16xf32>
    %c3_173 = arith.constant 3 : index
    %c0_174 = arith.constant 0 : index
    %c0_175 = arith.constant 0 : index
    %195 = vector.load %arg23[%c3_173, %c0_174, %c0_175] : memref<5x8x8xf32, #tpu.memory_space<vmem>>, vector<1x8x8xf32>
    %196 = vector.shape_cast %195 : vector<1x8x8xf32> to vector<8x8xf32>
    %cst_176 = arith.constant dense<0.000000e+00> : vector<8x16xf32>
    %197 = tpu.matmul %196, %194, %cst_176 {dimension_numbers = #tpu.dot_dimension_numbers<[1], [0], [0], [1], [0, 0, 1, 1], [], []>} : vector<8x8xf32>, vector<8x16xf32>, vector<8x16xf32> -> vector<8x16xf32>
    %198 = arith.addf %191, %197 : vector<8x16xf32>
    %c4_177 = arith.constant 4 : index
    %c0_178 = arith.constant 0 : index
    %c0_179 = arith.constant 0 : index
    %199 = vector.load %arg8[%c4_177, %c0_178, %c0_179] : memref<5x16x16xf32, #tpu.memory_space<vmem>>, vector<1x16x16xf32>
    %200 = vector.shape_cast %199 : vector<1x16x16xf32> to vector<16x16xf32>
    %cst_180 = arith.constant dense<0.000000e+00> : vector<8x16xf32>
    %201 = tpu.matmul %169, %200, %cst_180 {dimension_numbers = #tpu.dot_dimension_numbers<[1], [0], [0], [1], [0, 0, 1, 1], [], []>} : vector<8x16xf32>, vector<16x16xf32>, vector<8x16xf32> -> vector<8x16xf32>
    %c4_181 = arith.constant 4 : index
    %c0_182 = arith.constant 0 : index
    %c0_183 = arith.constant 0 : index
    %202 = vector.load %arg23[%c4_181, %c0_182, %c0_183] : memref<5x8x8xf32, #tpu.memory_space<vmem>>, vector<1x8x8xf32>
    %203 = vector.shape_cast %202 : vector<1x8x8xf32> to vector<8x8xf32>
    %cst_184 = arith.constant dense<0.000000e+00> : vector<8x16xf32>
    %204 = tpu.matmul %203, %201, %cst_184 {dimension_numbers = #tpu.dot_dimension_numbers<[1], [0], [0], [1], [0, 0, 1, 1], [], []>} : vector<8x8xf32>, vector<8x16xf32>, vector<8x16xf32> -> vector<8x16xf32>
    %205 = arith.addf %198, %204 : vector<8x16xf32>
    %c0_185 = arith.constant 0 : index
    %c0_186 = arith.constant 0 : index
    %206 = vector.load %arg24[%c0_185, %c0_186] : memref<8x1xf32, #tpu.memory_space<vmem>>, vector<8x1xf32>
    %207 = vector.broadcast %206 : vector<8x1xf32> to vector<8x16xf32>
    %208 = arith.addf %205, %207 : vector<8x16xf32>
    %cst_187 = arith.constant 0.000000e+00 : f32
    %209 = vector.broadcast %cst_187 : f32 to vector<8x16xf32>
    %210 = arith.cmpf ogt, %208, %209 : vector<8x16xf32>
    %cst_188 = arith.constant 0.000000e+00 : f32
    %211 = vector.broadcast %cst_188 : f32 to vector<8x16xf32>
    %212 = arith.minimumf %208, %211 : vector<8x16xf32>
    %213 = math.exp %212 : vector<8x16xf32>
    %cst_189 = arith.constant 1.000000e+00 : f32
    %214 = vector.broadcast %cst_189 : f32 to vector<8x16xf32>
    %215 = arith.subf %213, %214 : vector<8x16xf32>
    %cst_190 = arith.constant 1.67326319 : f32
    %216 = vector.broadcast %cst_190 : f32 to vector<8x16xf32>
    %217 = arith.mulf %216, %215 : vector<8x16xf32>
    %218 = arith.select %210, %208, %217 : vector<8x16xi1>, vector<8x16xf32>
    %cst_191 = arith.constant 1.05070102 : f32
    %219 = vector.broadcast %cst_191 : f32 to vector<8x16xf32>
    %220 = arith.mulf %219, %218 : vector<8x16xf32>
    %cst_192 = arith.constant dense<0xFF800000> : vector<8xf32>
    %221 = vector.multi_reduction <maximumf>, %220, %cst_192 [1] : vector<8x16xf32> to vector<8xf32>
    %222 = vector.shape_cast %221 : vector<8xf32> to vector<8x1xf32>
    %223 = vector.broadcast %222 : vector<8x1xf32> to vector<8x16xf32>
    %224 = arith.subf %220, %223 : vector<8x16xf32>
    %225 = math.exp %224 : vector<8x16xf32>
    %cst_193 = arith.constant dense<0.000000e+00> : vector<8xf32>
    %226 = vector.multi_reduction <add>, %225, %cst_193 [1] : vector<8x16xf32> to vector<8xf32>
    %227 = vector.shape_cast %226 : vector<8xf32> to vector<8x1xf32>
    %228 = vector.broadcast %227 : vector<8x1xf32> to vector<8x16xf32>
    %229 = arith.divf %225, %228 : vector<8x16xf32>
    %c0_194 = arith.constant 0 : index
    %c0_195 = arith.constant 0 : index
    %230 = vector.load %arg3[%c0_194, %c0_195] : memref<16x320xf32, #tpu.memory_space<vmem>>, vector<16x320xf32>
    %cst_196 = arith.constant dense<0.000000e+00> : vector<8x320xf32>
    %231 = tpu.matmul %114, %230, %cst_196 {dimension_numbers = #tpu.dot_dimension_numbers<[1], [0], [0], [1], [0, 0, 1, 1], [], []>} : vector<8x16xf32>, vector<16x320xf32>, vector<8x320xf32> -> vector<8x320xf32>
    %c0_197 = arith.constant 0 : index
    %c0_198 = arith.constant 0 : index
    %232 = vector.load %arg4[%c0_197, %c0_198] : memref<16x320xf32, #tpu.memory_space<vmem>>, vector<16x320xf32>
    %cst_199 = arith.constant dense<0.000000e+00> : vector<8x320xf32>
    %233 = tpu.matmul %229, %232, %cst_199 {dimension_numbers = #tpu.dot_dimension_numbers<[1], [0], [0], [1], [0, 0, 1, 1], [], []>} : vector<8x16xf32>, vector<16x320xf32>, vector<8x320xf32> -> vector<8x320xf32>
    %cst_200 = arith.constant 0.000000e+00 : f32
    %234 = vector.broadcast %cst_200 : f32 to vector<16x320xf32>
    %c0_201 = arith.constant 0 : index
    %c27 = arith.constant 27 : index
    %235 = vector.load %arg27[%c0_201, %c27] : memref<4x416xf32, #tpu.memory_space<vmem>>, vector<4x320xf32>
    %c0_202 = arith.constant 0 : index
    %c0_203 = arith.constant 0 : index
    %c0_204 = arith.constant 0 : index
    %c0_205 = arith.constant 0 : index
    %236 = vector.load %arg13[%c0_202, %c0_203, %c0_204, %c0_205] : memref<3x3x16x4xf32, #tpu.memory_space<vmem>>, vector<1x1x16x4xf32>
    %237 = vector.shape_cast %236 : vector<1x1x16x4xf32> to vector<16x4xf32>
    %cst_206 = arith.constant dense<0.000000e+00> : vector<16x320xf32>
    %238 = tpu.matmul %237, %235, %cst_206 {dimension_numbers = #tpu.dot_dimension_numbers<[1], [0], [0], [1], [0, 0, 1, 1], [], []>} : vector<16x4xf32>, vector<4x320xf32>, vector<16x320xf32> -> vector<16x320xf32>
    %239 = arith.addf %234, %238 : vector<16x320xf32>
    %c0_207 = arith.constant 0 : index
    %c28 = arith.constant 28 : index
    %240 = vector.load %arg27[%c0_207, %c28] : memref<4x416xf32, #tpu.memory_space<vmem>>, vector<4x320xf32>
    %c0_208 = arith.constant 0 : index
    %c1_209 = arith.constant 1 : index
    %c0_210 = arith.constant 0 : index
    %c0_211 = arith.constant 0 : index
    %241 = vector.load %arg13[%c0_208, %c1_209, %c0_210, %c0_211] : memref<3x3x16x4xf32, #tpu.memory_space<vmem>>, vector<1x1x16x4xf32>
    %242 = vector.shape_cast %241 : vector<1x1x16x4xf32> to vector<16x4xf32>
    %cst_212 = arith.constant dense<0.000000e+00> : vector<16x320xf32>
    %243 = tpu.matmul %242, %240, %cst_212 {dimension_numbers = #tpu.dot_dimension_numbers<[1], [0], [0], [1], [0, 0, 1, 1], [], []>} : vector<16x4xf32>, vector<4x320xf32>, vector<16x320xf32> -> vector<16x320xf32>
    %244 = arith.addf %239, %243 : vector<16x320xf32>
    %c0_213 = arith.constant 0 : index
    %c29 = arith.constant 29 : index
    %245 = vector.load %arg27[%c0_213, %c29] : memref<4x416xf32, #tpu.memory_space<vmem>>, vector<4x320xf32>
    %c0_214 = arith.constant 0 : index
    %c2_215 = arith.constant 2 : index
    %c0_216 = arith.constant 0 : index
    %c0_217 = arith.constant 0 : index
    %246 = vector.load %arg13[%c0_214, %c2_215, %c0_216, %c0_217] : memref<3x3x16x4xf32, #tpu.memory_space<vmem>>, vector<1x1x16x4xf32>
    %247 = vector.shape_cast %246 : vector<1x1x16x4xf32> to vector<16x4xf32>
    %cst_218 = arith.constant dense<0.000000e+00> : vector<16x320xf32>
    %248 = tpu.matmul %247, %245, %cst_218 {dimension_numbers = #tpu.dot_dimension_numbers<[1], [0], [0], [1], [0, 0, 1, 1], [], []>} : vector<16x4xf32>, vector<4x320xf32>, vector<16x320xf32> -> vector<16x320xf32>
    %249 = arith.addf %244, %248 : vector<16x320xf32>
    %c0_219 = arith.constant 0 : index
    %c47 = arith.constant 47 : index
    %250 = vector.load %arg27[%c0_219, %c47] : memref<4x416xf32, #tpu.memory_space<vmem>>, vector<4x320xf32>
    %c1_220 = arith.constant 1 : index
    %c0_221 = arith.constant 0 : index
    %c0_222 = arith.constant 0 : index
    %c0_223 = arith.constant 0 : index
    %251 = vector.load %arg13[%c1_220, %c0_221, %c0_222, %c0_223] : memref<3x3x16x4xf32, #tpu.memory_space<vmem>>, vector<1x1x16x4xf32>
    %252 = vector.shape_cast %251 : vector<1x1x16x4xf32> to vector<16x4xf32>
    %cst_224 = arith.constant dense<0.000000e+00> : vector<16x320xf32>
    %253 = tpu.matmul %252, %250, %cst_224 {dimension_numbers = #tpu.dot_dimension_numbers<[1], [0], [0], [1], [0, 0, 1, 1], [], []>} : vector<16x4xf32>, vector<4x320xf32>, vector<16x320xf32> -> vector<16x320xf32>
    %254 = arith.addf %249, %253 : vector<16x320xf32>
    %c0_225 = arith.constant 0 : index
    %c48_226 = arith.constant 48 : index
    %255 = vector.load %arg27[%c0_225, %c48_226] : memref<4x416xf32, #tpu.memory_space<vmem>>, vector<4x320xf32>
    %c1_227 = arith.constant 1 : index
    %c1_228 = arith.constant 1 : index
    %c0_229 = arith.constant 0 : index
    %c0_230 = arith.constant 0 : index
    %256 = vector.load %arg13[%c1_227, %c1_228, %c0_229, %c0_230] : memref<3x3x16x4xf32, #tpu.memory_space<vmem>>, vector<1x1x16x4xf32>
    %257 = vector.shape_cast %256 : vector<1x1x16x4xf32> to vector<16x4xf32>
    %cst_231 = arith.constant dense<0.000000e+00> : vector<16x320xf32>
    %258 = tpu.matmul %257, %255, %cst_231 {dimension_numbers = #tpu.dot_dimension_numbers<[1], [0], [0], [1], [0, 0, 1, 1], [], []>} : vector<16x4xf32>, vector<4x320xf32>, vector<16x320xf32> -> vector<16x320xf32>
    %259 = arith.addf %254, %258 : vector<16x320xf32>
    %c0_232 = arith.constant 0 : index
    %c49 = arith.constant 49 : index
    %260 = vector.load %arg27[%c0_232, %c49] : memref<4x416xf32, #tpu.memory_space<vmem>>, vector<4x320xf32>
    %c1_233 = arith.constant 1 : index
    %c2_234 = arith.constant 2 : index
    %c0_235 = arith.constant 0 : index
    %c0_236 = arith.constant 0 : index
    %261 = vector.load %arg13[%c1_233, %c2_234, %c0_235, %c0_236] : memref<3x3x16x4xf32, #tpu.memory_space<vmem>>, vector<1x1x16x4xf32>
    %262 = vector.shape_cast %261 : vector<1x1x16x4xf32> to vector<16x4xf32>
    %cst_237 = arith.constant dense<0.000000e+00> : vector<16x320xf32>
    %263 = tpu.matmul %262, %260, %cst_237 {dimension_numbers = #tpu.dot_dimension_numbers<[1], [0], [0], [1], [0, 0, 1, 1], [], []>} : vector<16x4xf32>, vector<4x320xf32>, vector<16x320xf32> -> vector<16x320xf32>
    %264 = arith.addf %259, %263 : vector<16x320xf32>
    %c0_238 = arith.constant 0 : index
    %c67 = arith.constant 67 : index
    %265 = vector.load %arg27[%c0_238, %c67] : memref<4x416xf32, #tpu.memory_space<vmem>>, vector<4x320xf32>
    %c2_239 = arith.constant 2 : index
    %c0_240 = arith.constant 0 : index
    %c0_241 = arith.constant 0 : index
    %c0_242 = arith.constant 0 : index
    %266 = vector.load %arg13[%c2_239, %c0_240, %c0_241, %c0_242] : memref<3x3x16x4xf32, #tpu.memory_space<vmem>>, vector<1x1x16x4xf32>
    %267 = vector.shape_cast %266 : vector<1x1x16x4xf32> to vector<16x4xf32>
    %cst_243 = arith.constant dense<0.000000e+00> : vector<16x320xf32>
    %268 = tpu.matmul %267, %265, %cst_243 {dimension_numbers = #tpu.dot_dimension_numbers<[1], [0], [0], [1], [0, 0, 1, 1], [], []>} : vector<16x4xf32>, vector<4x320xf32>, vector<16x320xf32> -> vector<16x320xf32>
    %269 = arith.addf %264, %268 : vector<16x320xf32>
    %c0_244 = arith.constant 0 : index
    %c68 = arith.constant 68 : index
    %270 = vector.load %arg27[%c0_244, %c68] : memref<4x416xf32, #tpu.memory_space<vmem>>, vector<4x320xf32>
    %c2_245 = arith.constant 2 : index
    %c1_246 = arith.constant 1 : index
    %c0_247 = arith.constant 0 : index
    %c0_248 = arith.constant 0 : index
    %271 = vector.load %arg13[%c2_245, %c1_246, %c0_247, %c0_248] : memref<3x3x16x4xf32, #tpu.memory_space<vmem>>, vector<1x1x16x4xf32>
    %272 = vector.shape_cast %271 : vector<1x1x16x4xf32> to vector<16x4xf32>
    %cst_249 = arith.constant dense<0.000000e+00> : vector<16x320xf32>
    %273 = tpu.matmul %272, %270, %cst_249 {dimension_numbers = #tpu.dot_dimension_numbers<[1], [0], [0], [1], [0, 0, 1, 1], [], []>} : vector<16x4xf32>, vector<4x320xf32>, vector<16x320xf32> -> vector<16x320xf32>
    %274 = arith.addf %269, %273 : vector<16x320xf32>
    %c0_250 = arith.constant 0 : index
    %c69 = arith.constant 69 : index
    %275 = vector.load %arg27[%c0_250, %c69] : memref<4x416xf32, #tpu.memory_space<vmem>>, vector<4x320xf32>
    %c2_251 = arith.constant 2 : index
    %c2_252 = arith.constant 2 : index
    %c0_253 = arith.constant 0 : index
    %c0_254 = arith.constant 0 : index
    %276 = vector.load %arg13[%c2_251, %c2_252, %c0_253, %c0_254] : memref<3x3x16x4xf32, #tpu.memory_space<vmem>>, vector<1x1x16x4xf32>
    %277 = vector.shape_cast %276 : vector<1x1x16x4xf32> to vector<16x4xf32>
    %cst_255 = arith.constant dense<0.000000e+00> : vector<16x320xf32>
    %278 = tpu.matmul %277, %275, %cst_255 {dimension_numbers = #tpu.dot_dimension_numbers<[1], [0], [0], [1], [0, 0, 1, 1], [], []>} : vector<16x4xf32>, vector<4x320xf32>, vector<16x320xf32> -> vector<16x320xf32>
    %279 = arith.addf %274, %278 : vector<16x320xf32>
    %c0_256 = arith.constant 0 : index
    %c0_257 = arith.constant 0 : index
    %280 = vector.load %arg14[%c0_256, %c0_257] : memref<16x1xf32, #tpu.memory_space<vmem>>, vector<16x1xf32>
    %281 = vector.broadcast %280 : vector<16x1xf32> to vector<16x320xf32>
    %282 = arith.addf %279, %281 : vector<16x320xf32>
    %cst_258 = arith.constant 0.000000e+00 : f32
    %283 = vector.broadcast %cst_258 : f32 to vector<16x320xf32>
    %284 = arith.cmpf ogt, %282, %283 : vector<16x320xf32>
    %cst_259 = arith.constant 0.000000e+00 : f32
    %285 = vector.broadcast %cst_259 : f32 to vector<16x320xf32>
    %286 = arith.minimumf %282, %285 : vector<16x320xf32>
    %287 = math.exp %286 : vector<16x320xf32>
    %cst_260 = arith.constant 1.000000e+00 : f32
    %288 = vector.broadcast %cst_260 : f32 to vector<16x320xf32>
    %289 = arith.subf %287, %288 : vector<16x320xf32>
    %cst_261 = arith.constant 1.67326319 : f32
    %290 = vector.broadcast %cst_261 : f32 to vector<16x320xf32>
    %291 = arith.mulf %290, %289 : vector<16x320xf32>
    %292 = arith.select %284, %282, %291 : vector<16x320xi1>, vector<16x320xf32>
    %cst_262 = arith.constant 1.05070102 : f32
    %293 = vector.broadcast %cst_262 : f32 to vector<16x320xf32>
    %294 = arith.mulf %293, %292 : vector<16x320xf32>
    %295 = vector.broadcast %0 : vector<1x320xf32> to vector<16x320xf32>
    %296 = arith.mulf %294, %295 : vector<16x320xf32>
    %c0_263 = arith.constant 0 : index
    %c48_264 = arith.constant 48 : index
    %297 = vector.load %arg28[%c0_263, %c48_264] : memref<16x416xf32, #tpu.memory_space<vmem>>, vector<16x320xf32>
    tpu.vector_store %arg28[%c0_263, %c48_264], %296 {strides = array<i32>} : memref<16x416xf32, #tpu.memory_space<vmem>>, vector<16x320xf32>,
    %cst_265 = arith.constant 0.000000e+00 : f32
    %298 = vector.broadcast %cst_265 : f32 to vector<16x320xf32>
    %c0_266 = arith.constant 0 : index
    %c6 = arith.constant 6 : index
    %299 = vector.load %arg28[%c0_266, %c6] : memref<16x416xf32, #tpu.memory_space<vmem>>, vector<16x320xf32>
    %c0_267 = arith.constant 0 : index
    %c0_268 = arith.constant 0 : index
    %c0_269 = arith.constant 0 : index
    %c0_270 = arith.constant 0 : index
    %300 = vector.load %arg15[%c0_267, %c0_268, %c0_269, %c0_270] : memref<5x5x16x16xf32, #tpu.memory_space<vmem>>, vector<1x1x16x16xf32>
    %301 = vector.shape_cast %300 : vector<1x1x16x16xf32> to vector<16x16xf32>
    %cst_271 = arith.constant dense<0.000000e+00> : vector<16x320xf32>
    %302 = tpu.matmul %301, %299, %cst_271 {dimension_numbers = #tpu.dot_dimension_numbers<[1], [0], [0], [1], [0, 0, 1, 1], [], []>} : vector<16x16xf32>, vector<16x320xf32>, vector<16x320xf32> -> vector<16x320xf32>
    %303 = arith.addf %298, %302 : vector<16x320xf32>
    %c0_272 = arith.constant 0 : index
    %c7 = arith.constant 7 : index
    %304 = vector.load %arg28[%c0_272, %c7] : memref<16x416xf32, #tpu.memory_space<vmem>>, vector<16x320xf32>
    %c0_273 = arith.constant 0 : index
    %c1_274 = arith.constant 1 : index
    %c0_275 = arith.constant 0 : index
    %c0_276 = arith.constant 0 : index
    %305 = vector.load %arg15[%c0_273, %c1_274, %c0_275, %c0_276] : memref<5x5x16x16xf32, #tpu.memory_space<vmem>>, vector<1x1x16x16xf32>
    %306 = vector.shape_cast %305 : vector<1x1x16x16xf32> to vector<16x16xf32>
    %cst_277 = arith.constant dense<0.000000e+00> : vector<16x320xf32>
    %307 = tpu.matmul %306, %304, %cst_277 {dimension_numbers = #tpu.dot_dimension_numbers<[1], [0], [0], [1], [0, 0, 1, 1], [], []>} : vector<16x16xf32>, vector<16x320xf32>, vector<16x320xf32> -> vector<16x320xf32>
    %308 = arith.addf %303, %307 : vector<16x320xf32>
    %c0_278 = arith.constant 0 : index
    %c8 = arith.constant 8 : index
    %309 = vector.load %arg28[%c0_278, %c8] : memref<16x416xf32, #tpu.memory_space<vmem>>, vector<16x320xf32>
    %c0_279 = arith.constant 0 : index
    %c2_280 = arith.constant 2 : index
    %c0_281 = arith.constant 0 : index
    %c0_282 = arith.constant 0 : index
    %310 = vector.load %arg15[%c0_279, %c2_280, %c0_281, %c0_282] : memref<5x5x16x16xf32, #tpu.memory_space<vmem>>, vector<1x1x16x16xf32>
    %311 = vector.shape_cast %310 : vector<1x1x16x16xf32> to vector<16x16xf32>
    %cst_283 = arith.constant dense<0.000000e+00> : vector<16x320xf32>
    %312 = tpu.matmul %311, %309, %cst_283 {dimension_numbers = #tpu.dot_dimension_numbers<[1], [0], [0], [1], [0, 0, 1, 1], [], []>} : vector<16x16xf32>, vector<16x320xf32>, vector<16x320xf32> -> vector<16x320xf32>
    %313 = arith.addf %308, %312 : vector<16x320xf32>
    %c0_284 = arith.constant 0 : index
    %c9 = arith.constant 9 : index
    %314 = vector.load %arg28[%c0_284, %c9] : memref<16x416xf32, #tpu.memory_space<vmem>>, vector<16x320xf32>
    %c0_285 = arith.constant 0 : index
    %c3_286 = arith.constant 3 : index
    %c0_287 = arith.constant 0 : index
    %c0_288 = arith.constant 0 : index
    %315 = vector.load %arg15[%c0_285, %c3_286, %c0_287, %c0_288] : memref<5x5x16x16xf32, #tpu.memory_space<vmem>>, vector<1x1x16x16xf32>
    %316 = vector.shape_cast %315 : vector<1x1x16x16xf32> to vector<16x16xf32>
    %cst_289 = arith.constant dense<0.000000e+00> : vector<16x320xf32>
    %317 = tpu.matmul %316, %314, %cst_289 {dimension_numbers = #tpu.dot_dimension_numbers<[1], [0], [0], [1], [0, 0, 1, 1], [], []>} : vector<16x16xf32>, vector<16x320xf32>, vector<16x320xf32> -> vector<16x320xf32>
    %318 = arith.addf %313, %317 : vector<16x320xf32>
    %c0_290 = arith.constant 0 : index
    %c10 = arith.constant 10 : index
    %319 = vector.load %arg28[%c0_290, %c10] : memref<16x416xf32, #tpu.memory_space<vmem>>, vector<16x320xf32>
    %c0_291 = arith.constant 0 : index
    %c4_292 = arith.constant 4 : index
    %c0_293 = arith.constant 0 : index
    %c0_294 = arith.constant 0 : index
    %320 = vector.load %arg15[%c0_291, %c4_292, %c0_293, %c0_294] : memref<5x5x16x16xf32, #tpu.memory_space<vmem>>, vector<1x1x16x16xf32>
    %321 = vector.shape_cast %320 : vector<1x1x16x16xf32> to vector<16x16xf32>
    %cst_295 = arith.constant dense<0.000000e+00> : vector<16x320xf32>
    %322 = tpu.matmul %321, %319, %cst_295 {dimension_numbers = #tpu.dot_dimension_numbers<[1], [0], [0], [1], [0, 0, 1, 1], [], []>} : vector<16x16xf32>, vector<16x320xf32>, vector<16x320xf32> -> vector<16x320xf32>
    %323 = arith.addf %318, %322 : vector<16x320xf32>
    %c0_296 = arith.constant 0 : index
    %c26 = arith.constant 26 : index
    %324 = vector.load %arg28[%c0_296, %c26] : memref<16x416xf32, #tpu.memory_space<vmem>>, vector<16x320xf32>
    %c1_297 = arith.constant 1 : index
    %c0_298 = arith.constant 0 : index
    %c0_299 = arith.constant 0 : index
    %c0_300 = arith.constant 0 : index
    %325 = vector.load %arg15[%c1_297, %c0_298, %c0_299, %c0_300] : memref<5x5x16x16xf32, #tpu.memory_space<vmem>>, vector<1x1x16x16xf32>
    %326 = vector.shape_cast %325 : vector<1x1x16x16xf32> to vector<16x16xf32>
    %cst_301 = arith.constant dense<0.000000e+00> : vector<16x320xf32>
    %327 = tpu.matmul %326, %324, %cst_301 {dimension_numbers = #tpu.dot_dimension_numbers<[1], [0], [0], [1], [0, 0, 1, 1], [], []>} : vector<16x16xf32>, vector<16x320xf32>, vector<16x320xf32> -> vector<16x320xf32>
    %328 = arith.addf %323, %327 : vector<16x320xf32>
    %c0_302 = arith.constant 0 : index
    %c27_303 = arith.constant 27 : index
    %329 = vector.load %arg28[%c0_302, %c27_303] : memref<16x416xf32, #tpu.memory_space<vmem>>, vector<16x320xf32>
    %c1_304 = arith.constant 1 : index
    %c1_305 = arith.constant 1 : index
    %c0_306 = arith.constant 0 : index
    %c0_307 = arith.constant 0 : index
    %330 = vector.load %arg15[%c1_304, %c1_305, %c0_306, %c0_307] : memref<5x5x16x16xf32, #tpu.memory_space<vmem>>, vector<1x1x16x16xf32>
    %331 = vector.shape_cast %330 : vector<1x1x16x16xf32> to vector<16x16xf32>
    %cst_308 = arith.constant dense<0.000000e+00> : vector<16x320xf32>
    %332 = tpu.matmul %331, %329, %cst_308 {dimension_numbers = #tpu.dot_dimension_numbers<[1], [0], [0], [1], [0, 0, 1, 1], [], []>} : vector<16x16xf32>, vector<16x320xf32>, vector<16x320xf32> -> vector<16x320xf32>
    %333 = arith.addf %328, %332 : vector<16x320xf32>
    %c0_309 = arith.constant 0 : index
    %c28_310 = arith.constant 28 : index
    %334 = vector.load %arg28[%c0_309, %c28_310] : memref<16x416xf32, #tpu.memory_space<vmem>>, vector<16x320xf32>
    %c1_311 = arith.constant 1 : index
    %c2_312 = arith.constant 2 : index
    %c0_313 = arith.constant 0 : index
    %c0_314 = arith.constant 0 : index
    %335 = vector.load %arg15[%c1_311, %c2_312, %c0_313, %c0_314] : memref<5x5x16x16xf32, #tpu.memory_space<vmem>>, vector<1x1x16x16xf32>
    %336 = vector.shape_cast %335 : vector<1x1x16x16xf32> to vector<16x16xf32>
    %cst_315 = arith.constant dense<0.000000e+00> : vector<16x320xf32>
    %337 = tpu.matmul %336, %334, %cst_315 {dimension_numbers = #tpu.dot_dimension_numbers<[1], [0], [0], [1], [0, 0, 1, 1], [], []>} : vector<16x16xf32>, vector<16x320xf32>, vector<16x320xf32> -> vector<16x320xf32>
    %338 = arith.addf %333, %337 : vector<16x320xf32>
    %c0_316 = arith.constant 0 : index
    %c29_317 = arith.constant 29 : index
    %339 = vector.load %arg28[%c0_316, %c29_317] : memref<16x416xf32, #tpu.memory_space<vmem>>, vector<16x320xf32>
    %c1_318 = arith.constant 1 : index
    %c3_319 = arith.constant 3 : index
    %c0_320 = arith.constant 0 : index
    %c0_321 = arith.constant 0 : index
    %340 = vector.load %arg15[%c1_318, %c3_319, %c0_320, %c0_321] : memref<5x5x16x16xf32, #tpu.memory_space<vmem>>, vector<1x1x16x16xf32>
    %341 = vector.shape_cast %340 : vector<1x1x16x16xf32> to vector<16x16xf32>
    %cst_322 = arith.constant dense<0.000000e+00> : vector<16x320xf32>
    %342 = tpu.matmul %341, %339, %cst_322 {dimension_numbers = #tpu.dot_dimension_numbers<[1], [0], [0], [1], [0, 0, 1, 1], [], []>} : vector<16x16xf32>, vector<16x320xf32>, vector<16x320xf32> -> vector<16x320xf32>
    %343 = arith.addf %338, %342 : vector<16x320xf32>
    %c0_323 = arith.constant 0 : index
    %c30 = arith.constant 30 : index
    %344 = vector.load %arg28[%c0_323, %c30] : memref<16x416xf32, #tpu.memory_space<vmem>>, vector<16x320xf32>
    %c1_324 = arith.constant 1 : index
    %c4_325 = arith.constant 4 : index
    %c0_326 = arith.constant 0 : index
    %c0_327 = arith.constant 0 : index
    %345 = vector.load %arg15[%c1_324, %c4_325, %c0_326, %c0_327] : memref<5x5x16x16xf32, #tpu.memory_space<vmem>>, vector<1x1x16x16xf32>
    %346 = vector.shape_cast %345 : vector<1x1x16x16xf32> to vector<16x16xf32>
    %cst_328 = arith.constant dense<0.000000e+00> : vector<16x320xf32>
    %347 = tpu.matmul %346, %344, %cst_328 {dimension_numbers = #tpu.dot_dimension_numbers<[1], [0], [0], [1], [0, 0, 1, 1], [], []>} : vector<16x16xf32>, vector<16x320xf32>, vector<16x320xf32> -> vector<16x320xf32>
    %348 = arith.addf %343, %347 : vector<16x320xf32>
    %c0_329 = arith.constant 0 : index
    %c46 = arith.constant 46 : index
    %349 = vector.load %arg28[%c0_329, %c46] : memref<16x416xf32, #tpu.memory_space<vmem>>, vector<16x320xf32>
    %c2_330 = arith.constant 2 : index
    %c0_331 = arith.constant 0 : index
    %c0_332 = arith.constant 0 : index
    %c0_333 = arith.constant 0 : index
    %350 = vector.load %arg15[%c2_330, %c0_331, %c0_332, %c0_333] : memref<5x5x16x16xf32, #tpu.memory_space<vmem>>, vector<1x1x16x16xf32>
    %351 = vector.shape_cast %350 : vector<1x1x16x16xf32> to vector<16x16xf32>
    %cst_334 = arith.constant dense<0.000000e+00> : vector<16x320xf32>
    %352 = tpu.matmul %351, %349, %cst_334 {dimension_numbers = #tpu.dot_dimension_numbers<[1], [0], [0], [1], [0, 0, 1, 1], [], []>} : vector<16x16xf32>, vector<16x320xf32>, vector<16x320xf32> -> vector<16x320xf32>
    %353 = arith.addf %348, %352 : vector<16x320xf32>
    %c0_335 = arith.constant 0 : index
    %c47_336 = arith.constant 47 : index
    %354 = vector.load %arg28[%c0_335, %c47_336] : memref<16x416xf32, #tpu.memory_space<vmem>>, vector<16x320xf32>
    %c2_337 = arith.constant 2 : index
    %c1_338 = arith.constant 1 : index
    %c0_339 = arith.constant 0 : index
    %c0_340 = arith.constant 0 : index
    %355 = vector.load %arg15[%c2_337, %c1_338, %c0_339, %c0_340] : memref<5x5x16x16xf32, #tpu.memory_space<vmem>>, vector<1x1x16x16xf32>
    %356 = vector.shape_cast %355 : vector<1x1x16x16xf32> to vector<16x16xf32>
    %cst_341 = arith.constant dense<0.000000e+00> : vector<16x320xf32>
    %357 = tpu.matmul %356, %354, %cst_341 {dimension_numbers = #tpu.dot_dimension_numbers<[1], [0], [0], [1], [0, 0, 1, 1], [], []>} : vector<16x16xf32>, vector<16x320xf32>, vector<16x320xf32> -> vector<16x320xf32>
    %358 = arith.addf %353, %357 : vector<16x320xf32>
    %c0_342 = arith.constant 0 : index
    %c48_343 = arith.constant 48 : index
    %359 = vector.load %arg28[%c0_342, %c48_343] : memref<16x416xf32, #tpu.memory_space<vmem>>, vector<16x320xf32>
    %c2_344 = arith.constant 2 : index
    %c2_345 = arith.constant 2 : index
    %c0_346 = arith.constant 0 : index
    %c0_347 = arith.constant 0 : index
    %360 = vector.load %arg15[%c2_344, %c2_345, %c0_346, %c0_347] : memref<5x5x16x16xf32, #tpu.memory_space<vmem>>, vector<1x1x16x16xf32>
    %361 = vector.shape_cast %360 : vector<1x1x16x16xf32> to vector<16x16xf32>
    %cst_348 = arith.constant dense<0.000000e+00> : vector<16x320xf32>
    %362 = tpu.matmul %361, %359, %cst_348 {dimension_numbers = #tpu.dot_dimension_numbers<[1], [0], [0], [1], [0, 0, 1, 1], [], []>} : vector<16x16xf32>, vector<16x320xf32>, vector<16x320xf32> -> vector<16x320xf32>
    %363 = arith.addf %358, %362 : vector<16x320xf32>
    %c0_349 = arith.constant 0 : index
    %c49_350 = arith.constant 49 : index
    %364 = vector.load %arg28[%c0_349, %c49_350] : memref<16x416xf32, #tpu.memory_space<vmem>>, vector<16x320xf32>
    %c2_351 = arith.constant 2 : index
    %c3_352 = arith.constant 3 : index
    %c0_353 = arith.constant 0 : index
    %c0_354 = arith.constant 0 : index
    %365 = vector.load %arg15[%c2_351, %c3_352, %c0_353, %c0_354] : memref<5x5x16x16xf32, #tpu.memory_space<vmem>>, vector<1x1x16x16xf32>
    %366 = vector.shape_cast %365 : vector<1x1x16x16xf32> to vector<16x16xf32>
    %cst_355 = arith.constant dense<0.000000e+00> : vector<16x320xf32>
    %367 = tpu.matmul %366, %364, %cst_355 {dimension_numbers = #tpu.dot_dimension_numbers<[1], [0], [0], [1], [0, 0, 1, 1], [], []>} : vector<16x16xf32>, vector<16x320xf32>, vector<16x320xf32> -> vector<16x320xf32>
    %368 = arith.addf %363, %367 : vector<16x320xf32>
    %c0_356 = arith.constant 0 : index
    %c50 = arith.constant 50 : index
    %369 = vector.load %arg28[%c0_356, %c50] : memref<16x416xf32, #tpu.memory_space<vmem>>, vector<16x320xf32>
    %c2_357 = arith.constant 2 : index
    %c4_358 = arith.constant 4 : index
    %c0_359 = arith.constant 0 : index
    %c0_360 = arith.constant 0 : index
    %370 = vector.load %arg15[%c2_357, %c4_358, %c0_359, %c0_360] : memref<5x5x16x16xf32, #tpu.memory_space<vmem>>, vector<1x1x16x16xf32>
    %371 = vector.shape_cast %370 : vector<1x1x16x16xf32> to vector<16x16xf32>
    %cst_361 = arith.constant dense<0.000000e+00> : vector<16x320xf32>
    %372 = tpu.matmul %371, %369, %cst_361 {dimension_numbers = #tpu.dot_dimension_numbers<[1], [0], [0], [1], [0, 0, 1, 1], [], []>} : vector<16x16xf32>, vector<16x320xf32>, vector<16x320xf32> -> vector<16x320xf32>
    %373 = arith.addf %368, %372 : vector<16x320xf32>
    %c0_362 = arith.constant 0 : index
    %c66 = arith.constant 66 : index
    %374 = vector.load %arg28[%c0_362, %c66] : memref<16x416xf32, #tpu.memory_space<vmem>>, vector<16x320xf32>
    %c3_363 = arith.constant 3 : index
    %c0_364 = arith.constant 0 : index
    %c0_365 = arith.constant 0 : index
    %c0_366 = arith.constant 0 : index
    %375 = vector.load %arg15[%c3_363, %c0_364, %c0_365, %c0_366] : memref<5x5x16x16xf32, #tpu.memory_space<vmem>>, vector<1x1x16x16xf32>
    %376 = vector.shape_cast %375 : vector<1x1x16x16xf32> to vector<16x16xf32>
    %cst_367 = arith.constant dense<0.000000e+00> : vector<16x320xf32>
    %377 = tpu.matmul %376, %374, %cst_367 {dimension_numbers = #tpu.dot_dimension_numbers<[1], [0], [0], [1], [0, 0, 1, 1], [], []>} : vector<16x16xf32>, vector<16x320xf32>, vector<16x320xf32> -> vector<16x320xf32>
    %378 = arith.addf %373, %377 : vector<16x320xf32>
    %c0_368 = arith.constant 0 : index
    %c67_369 = arith.constant 67 : index
    %379 = vector.load %arg28[%c0_368, %c67_369] : memref<16x416xf32, #tpu.memory_space<vmem>>, vector<16x320xf32>
    %c3_370 = arith.constant 3 : index
    %c1_371 = arith.constant 1 : index
    %c0_372 = arith.constant 0 : index
    %c0_373 = arith.constant 0 : index
    %380 = vector.load %arg15[%c3_370, %c1_371, %c0_372, %c0_373] : memref<5x5x16x16xf32, #tpu.memory_space<vmem>>, vector<1x1x16x16xf32>
    %381 = vector.shape_cast %380 : vector<1x1x16x16xf32> to vector<16x16xf32>
    %cst_374 = arith.constant dense<0.000000e+00> : vector<16x320xf32>
    %382 = tpu.matmul %381, %379, %cst_374 {dimension_numbers = #tpu.dot_dimension_numbers<[1], [0], [0], [1], [0, 0, 1, 1], [], []>} : vector<16x16xf32>, vector<16x320xf32>, vector<16x320xf32> -> vector<16x320xf32>
    %383 = arith.addf %378, %382 : vector<16x320xf32>
    %c0_375 = arith.constant 0 : index
    %c68_376 = arith.constant 68 : index
    %384 = vector.load %arg28[%c0_375, %c68_376] : memref<16x416xf32, #tpu.memory_space<vmem>>, vector<16x320xf32>
    %c3_377 = arith.constant 3 : index
    %c2_378 = arith.constant 2 : index
    %c0_379 = arith.constant 0 : index
    %c0_380 = arith.constant 0 : index
    %385 = vector.load %arg15[%c3_377, %c2_378, %c0_379, %c0_380] : memref<5x5x16x16xf32, #tpu.memory_space<vmem>>, vector<1x1x16x16xf32>
    %386 = vector.shape_cast %385 : vector<1x1x16x16xf32> to vector<16x16xf32>
    %cst_381 = arith.constant dense<0.000000e+00> : vector<16x320xf32>
    %387 = tpu.matmul %386, %384, %cst_381 {dimension_numbers = #tpu.dot_dimension_numbers<[1], [0], [0], [1], [0, 0, 1, 1], [], []>} : vector<16x16xf32>, vector<16x320xf32>, vector<16x320xf32> -> vector<16x320xf32>
    %388 = arith.addf %383, %387 : vector<16x320xf32>
    %c0_382 = arith.constant 0 : index
    %c69_383 = arith.constant 69 : index
    %389 = vector.load %arg28[%c0_382, %c69_383] : memref<16x416xf32, #tpu.memory_space<vmem>>, vector<16x320xf32>
    %c3_384 = arith.constant 3 : index
    %c3_385 = arith.constant 3 : index
    %c0_386 = arith.constant 0 : index
    %c0_387 = arith.constant 0 : index
    %390 = vector.load %arg15[%c3_384, %c3_385, %c0_386, %c0_387] : memref<5x5x16x16xf32, #tpu.memory_space<vmem>>, vector<1x1x16x16xf32>
    %391 = vector.shape_cast %390 : vector<1x1x16x16xf32> to vector<16x16xf32>
    %cst_388 = arith.constant dense<0.000000e+00> : vector<16x320xf32>
    %392 = tpu.matmul %391, %389, %cst_388 {dimension_numbers = #tpu.dot_dimension_numbers<[1], [0], [0], [1], [0, 0, 1, 1], [], []>} : vector<16x16xf32>, vector<16x320xf32>, vector<16x320xf32> -> vector<16x320xf32>
    %393 = arith.addf %388, %392 : vector<16x320xf32>
    %c0_389 = arith.constant 0 : index
    %c70 = arith.constant 70 : index
    %394 = vector.load %arg28[%c0_389, %c70] : memref<16x416xf32, #tpu.memory_space<vmem>>, vector<16x320xf32>
    %c3_390 = arith.constant 3 : index
    %c4_391 = arith.constant 4 : index
    %c0_392 = arith.constant 0 : index
    %c0_393 = arith.constant 0 : index
    %395 = vector.load %arg15[%c3_390, %c4_391, %c0_392, %c0_393] : memref<5x5x16x16xf32, #tpu.memory_space<vmem>>, vector<1x1x16x16xf32>
    %396 = vector.shape_cast %395 : vector<1x1x16x16xf32> to vector<16x16xf32>
    %cst_394 = arith.constant dense<0.000000e+00> : vector<16x320xf32>
    %397 = tpu.matmul %396, %394, %cst_394 {dimension_numbers = #tpu.dot_dimension_numbers<[1], [0], [0], [1], [0, 0, 1, 1], [], []>} : vector<16x16xf32>, vector<16x320xf32>, vector<16x320xf32> -> vector<16x320xf32>
    %398 = arith.addf %393, %397 : vector<16x320xf32>
    %c0_395 = arith.constant 0 : index
    %c86 = arith.constant 86 : index
    %399 = vector.load %arg28[%c0_395, %c86] : memref<16x416xf32, #tpu.memory_space<vmem>>, vector<16x320xf32>
    %c4_396 = arith.constant 4 : index
    %c0_397 = arith.constant 0 : index
    %c0_398 = arith.constant 0 : index
    %c0_399 = arith.constant 0 : index
    %400 = vector.load %arg15[%c4_396, %c0_397, %c0_398, %c0_399] : memref<5x5x16x16xf32, #tpu.memory_space<vmem>>, vector<1x1x16x16xf32>
    %401 = vector.shape_cast %400 : vector<1x1x16x16xf32> to vector<16x16xf32>
    %cst_400 = arith.constant dense<0.000000e+00> : vector<16x320xf32>
    %402 = tpu.matmul %401, %399, %cst_400 {dimension_numbers = #tpu.dot_dimension_numbers<[1], [0], [0], [1], [0, 0, 1, 1], [], []>} : vector<16x16xf32>, vector<16x320xf32>, vector<16x320xf32> -> vector<16x320xf32>
    %403 = arith.addf %398, %402 : vector<16x320xf32>
    %c0_401 = arith.constant 0 : index
    %c87 = arith.constant 87 : index
    %404 = vector.load %arg28[%c0_401, %c87] : memref<16x416xf32, #tpu.memory_space<vmem>>, vector<16x320xf32>
    %c4_402 = arith.constant 4 : index
    %c1_403 = arith.constant 1 : index
    %c0_404 = arith.constant 0 : index
    %c0_405 = arith.constant 0 : index
    %405 = vector.load %arg15[%c4_402, %c1_403, %c0_404, %c0_405] : memref<5x5x16x16xf32, #tpu.memory_space<vmem>>, vector<1x1x16x16xf32>
    %406 = vector.shape_cast %405 : vector<1x1x16x16xf32> to vector<16x16xf32>
    %cst_406 = arith.constant dense<0.000000e+00> : vector<16x320xf32>
    %407 = tpu.matmul %406, %404, %cst_406 {dimension_numbers = #tpu.dot_dimension_numbers<[1], [0], [0], [1], [0, 0, 1, 1], [], []>} : vector<16x16xf32>, vector<16x320xf32>, vector<16x320xf32> -> vector<16x320xf32>
    %408 = arith.addf %403, %407 : vector<16x320xf32>
    %c0_407 = arith.constant 0 : index
    %c88 = arith.constant 88 : index
    %409 = vector.load %arg28[%c0_407, %c88] : memref<16x416xf32, #tpu.memory_space<vmem>>, vector<16x320xf32>
    %c4_408 = arith.constant 4 : index
    %c2_409 = arith.constant 2 : index
    %c0_410 = arith.constant 0 : index
    %c0_411 = arith.constant 0 : index
    %410 = vector.load %arg15[%c4_408, %c2_409, %c0_410, %c0_411] : memref<5x5x16x16xf32, #tpu.memory_space<vmem>>, vector<1x1x16x16xf32>
    %411 = vector.shape_cast %410 : vector<1x1x16x16xf32> to vector<16x16xf32>
    %cst_412 = arith.constant dense<0.000000e+00> : vector<16x320xf32>
    %412 = tpu.matmul %411, %409, %cst_412 {dimension_numbers = #tpu.dot_dimension_numbers<[1], [0], [0], [1], [0, 0, 1, 1], [], []>} : vector<16x16xf32>, vector<16x320xf32>, vector<16x320xf32> -> vector<16x320xf32>
    %413 = arith.addf %408, %412 : vector<16x320xf32>
    %c0_413 = arith.constant 0 : index
    %c89 = arith.constant 89 : index
    %414 = vector.load %arg28[%c0_413, %c89] : memref<16x416xf32, #tpu.memory_space<vmem>>, vector<16x320xf32>
    %c4_414 = arith.constant 4 : index
    %c3_415 = arith.constant 3 : index
    %c0_416 = arith.constant 0 : index
    %c0_417 = arith.constant 0 : index
    %415 = vector.load %arg15[%c4_414, %c3_415, %c0_416, %c0_417] : memref<5x5x16x16xf32, #tpu.memory_space<vmem>>, vector<1x1x16x16xf32>
    %416 = vector.shape_cast %415 : vector<1x1x16x16xf32> to vector<16x16xf32>
    %cst_418 = arith.constant dense<0.000000e+00> : vector<16x320xf32>
    %417 = tpu.matmul %416, %414, %cst_418 {dimension_numbers = #tpu.dot_dimension_numbers<[1], [0], [0], [1], [0, 0, 1, 1], [], []>} : vector<16x16xf32>, vector<16x320xf32>, vector<16x320xf32> -> vector<16x320xf32>
    %418 = arith.addf %413, %417 : vector<16x320xf32>
    %c0_419 = arith.constant 0 : index
    %c90 = arith.constant 90 : index
    %419 = vector.load %arg28[%c0_419, %c90] : memref<16x416xf32, #tpu.memory_space<vmem>>, vector<16x320xf32>
    %c4_420 = arith.constant 4 : index
    %c4_421 = arith.constant 4 : index
    %c0_422 = arith.constant 0 : index
    %c0_423 = arith.constant 0 : index
    %420 = vector.load %arg15[%c4_420, %c4_421, %c0_422, %c0_423] : memref<5x5x16x16xf32, #tpu.memory_space<vmem>>, vector<1x1x16x16xf32>
    %421 = vector.shape_cast %420 : vector<1x1x16x16xf32> to vector<16x16xf32>
    %cst_424 = arith.constant dense<0.000000e+00> : vector<16x320xf32>
    %422 = tpu.matmul %421, %419, %cst_424 {dimension_numbers = #tpu.dot_dimension_numbers<[1], [0], [0], [1], [0, 0, 1, 1], [], []>} : vector<16x16xf32>, vector<16x320xf32>, vector<16x320xf32> -> vector<16x320xf32>
    %423 = arith.addf %418, %422 : vector<16x320xf32>
    %c0_425 = arith.constant 0 : index
    %c0_426 = arith.constant 0 : index
    %424 = vector.load %arg16[%c0_425, %c0_426] : memref<16x1xf32, #tpu.memory_space<vmem>>, vector<16x1xf32>
    %425 = vector.broadcast %424 : vector<16x1xf32> to vector<16x320xf32>
    %426 = arith.addf %423, %425 : vector<16x320xf32>
    %cst_427 = arith.constant 0.000000e+00 : f32
    %427 = vector.broadcast %cst_427 : f32 to vector<16x320xf32>
    %428 = arith.cmpf ogt, %426, %427 : vector<16x320xf32>
    %cst_428 = arith.constant 0.000000e+00 : f32
    %429 = vector.broadcast %cst_428 : f32 to vector<16x320xf32>
    %430 = arith.minimumf %426, %429 : vector<16x320xf32>
    %431 = math.exp %430 : vector<16x320xf32>
    %cst_429 = arith.constant 1.000000e+00 : f32
    %432 = vector.broadcast %cst_429 : f32 to vector<16x320xf32>
    %433 = arith.subf %431, %432 : vector<16x320xf32>
    %cst_430 = arith.constant 1.67326319 : f32
    %434 = vector.broadcast %cst_430 : f32 to vector<16x320xf32>
    %435 = arith.mulf %434, %433 : vector<16x320xf32>
    %436 = arith.select %428, %426, %435 : vector<16x320xi1>, vector<16x320xf32>
    %cst_431 = arith.constant 1.05070102 : f32
    %437 = vector.broadcast %cst_431 : f32 to vector<16x320xf32>
    %438 = arith.mulf %437, %436 : vector<16x320xf32>
    %439 = vector.extract_strided_slice %438 {offsets = [0, 0], sizes = [8, 320], strides = [1, 1]} : vector<16x320xf32> to vector<8x320xf32>
    %440 = arith.mulf %439, %231 : vector<8x320xf32>
    %441 = vector.extract_strided_slice %438 {offsets = [8, 0], sizes = [8, 320], strides = [1, 1]} : vector<16x320xf32> to vector<8x320xf32>
    %442 = arith.mulf %441, %233 : vector<8x320xf32>
    %443 = arith.addf %440, %442 : vector<8x320xf32>
    %c0_432 = arith.constant 0 : index
    %c0_433 = arith.constant 0 : index
    %c0_434 = arith.constant 0 : index
    %444 = vector.load %arg26[%c0_432, %c0_433, %c0_434] : memref<1x8x320xf32, #tpu.memory_space<vmem>>, vector<1x8x320xf32>
    %445 = vector.shape_cast %444 : vector<1x8x320xf32> to vector<8x320xf32>
    %446 = vector.shape_cast %443 : vector<8x320xf32> to vector<1x8x320xf32>
    tpu.vector_store %arg26[%c0_432, %c0_433, %c0_434], %446 {strides = array<i32>} : memref<1x8x320xf32, #tpu.memory_space<vmem>>, vector<1x8x320xf32>,
    return
  }
  func.func @transform_0(%arg0: i32) -> (i32, i32, i32) {
    %c0_i32 = arith.constant 0 : i32
    %c0_i32_0 = arith.constant 0 : i32
    %c0_i32_1 = arith.constant 0 : i32
    return %arg0, %c0_i32, %c0_i32_0 : i32, i32, i32
  }
  func.func @transform_1(%arg0: i32) -> (i32, i32) {
    %c0_i32 = arith.constant 0 : i32
    %c0_i32_0 = arith.constant 0 : i32
    %c0_i32_1 = arith.constant 0 : i32
    return %c0_i32, %c0_i32_0 : i32, i32
  }
  func.func @transform_2(%arg0: i32) -> (i32, i32) {
    %c0_i32 = arith.constant 0 : i32
    %c0_i32_0 = arith.constant 0 : i32
    %c0_i32_1 = arith.constant 0 : i32
    return %c0_i32, %c0_i32_0 : i32, i32
  }
  func.func @transform_3(%arg0: i32) -> (i32, i32) {
    %c0_i32 = arith.constant 0 : i32
    %c0_i32_0 = arith.constant 0 : i32
    %c0_i32_1 = arith.constant 0 : i32
    return %c0_i32, %c0_i32_0 : i32, i32
  }
  func.func @transform_4(%arg0: i32) -> (i32, i32) {
    %c0_i32 = arith.constant 0 : i32
    %c0_i32_0 = arith.constant 0 : i32
    %c0_i32_1 = arith.constant 0 : i32
    return %c0_i32, %c0_i32_0 : i32, i32
  }
  func.func @transform_5(%arg0: i32) -> (i32, i32) {
    %c0_i32 = arith.constant 0 : i32
    %c0_i32_0 = arith.constant 0 : i32
    %c0_i32_1 = arith.constant 0 : i32
    return %c0_i32, %c0_i32_0 : i32, i32
  }
  func.func @transform_6(%arg0: i32) -> (i32, i32, i32) {
    %c0_i32 = arith.constant 0 : i32
    %c0_i32_0 = arith.constant 0 : i32
    %c0_i32_1 = arith.constant 0 : i32
    %c0_i32_2 = arith.constant 0 : i32
    return %c0_i32, %c0_i32_0, %c0_i32_1 : i32, i32, i32
  }
  func.func @transform_7(%arg0: i32) -> (i32, i32, i32) {
    %c0_i32 = arith.constant 0 : i32
    %c0_i32_0 = arith.constant 0 : i32
    %c0_i32_1 = arith.constant 0 : i32
    %c0_i32_2 = arith.constant 0 : i32
    return %c0_i32, %c0_i32_0, %c0_i32_1 : i32, i32, i32
  }
  func.func @transform_8(%arg0: i32) -> (i32, i32) {
    %c0_i32 = arith.constant 0 : i32
    %c0_i32_0 = arith.constant 0 : i32
    %c0_i32_1 = arith.constant 0 : i32
    return %c0_i32, %c0_i32_0 : i32, i32
  }
  func.func @transform_9(%arg0: i32) -> (i32, i32) {
    %c0_i32 = arith.constant 0 : i32
    %c0_i32_0 = arith.constant 0 : i32
    %c0_i32_1 = arith.constant 0 : i32
    return %c0_i32, %c0_i32_0 : i32, i32
  }
  func.func @transform_10(%arg0: i32) -> (i32, i32) {
    %c0_i32 = arith.constant 0 : i32
    %c0_i32_0 = arith.constant 0 : i32
    %c0_i32_1 = arith.constant 0 : i32
    return %c0_i32, %c0_i32_0 : i32, i32
  }
  func.func @transform_11(%arg0: i32) -> (i32, i32) {
    %c0_i32 = arith.constant 0 : i32
    %c0_i32_0 = arith.constant 0 : i32
    %c0_i32_1 = arith.constant 0 : i32
    return %c0_i32, %c0_i32_0 : i32, i32
  }
  func.func @transform_12(%arg0: i32) -> (i32, i32, i32, i32) {
    %c0_i32 = arith.constant 0 : i32
    %c0_i32_0 = arith.constant 0 : i32
    %c0_i32_1 = arith.constant 0 : i32
    %c0_i32_2 = arith.constant 0 : i32
    %c0_i32_3 = arith.constant 0 : i32
    return %c0_i32, %c0_i32_0, %c0_i32_1, %c0_i32_2 : i32, i32, i32, i32
  }
  func.func @transform_13(%arg0: i32) -> (i32, i32) {
    %c0_i32 = arith.constant 0 : i32
    %c0_i32_0 = arith.constant 0 : i32
    %c0_i32_1 = arith.constant 0 : i32
    return %c0_i32, %c0_i32_0 : i32, i32
  }
  func.func @transform_14(%arg0: i32) -> (i32, i32, i32, i32) {
    %c0_i32 = arith.constant 0 : i32
    %c0_i32_0 = arith.constant 0 : i32
    %c0_i32_1 = arith.constant 0 : i32
    %c0_i32_2 = arith.constant 0 : i32
    %c0_i32_3 = arith.constant 0 : i32
    return %c0_i32, %c0_i32_0, %c0_i32_1, %c0_i32_2 : i32, i32, i32, i32
  }
  func.func @transform_15(%arg0: i32) -> (i32, i32) {
    %c0_i32 = arith.constant 0 : i32
    %c0_i32_0 = arith.constant 0 : i32
    %c0_i32_1 = arith.constant 0 : i32
    return %c0_i32, %c0_i32_0 : i32, i32
  }
  func.func @transform_16(%arg0: i32) -> (i32, i32, i32) {
    %c0_i32 = arith.constant 0 : i32
    %c0_i32_0 = arith.constant 0 : i32
    %c0_i32_1 = arith.constant 0 : i32
    %c0_i32_2 = arith.constant 0 : i32
    return %c0_i32, %c0_i32_0, %c0_i32_1 : i32, i32, i32
  }
  func.func @transform_17(%arg0: i32) -> (i32, i32) {
    %c0_i32 = arith.constant 0 : i32
    %c0_i32_0 = arith.constant 0 : i32
    %c0_i32_1 = arith.constant 0 : i32
    return %c0_i32, %c0_i32_0 : i32, i32
  }
  func.func @transform_18(%arg0: i32) -> (i32, i32, i32) {
    %c0_i32 = arith.constant 0 : i32
    %c0_i32_0 = arith.constant 0 : i32
    %c0_i32_1 = arith.constant 0 : i32
    %c0_i32_2 = arith.constant 0 : i32
    return %c0_i32, %c0_i32_0, %c0_i32_1 : i32, i32, i32
  }
  func.func @transform_19(%arg0: i32) -> (i32, i32) {
    %c0_i32 = arith.constant 0 : i32
    %c0_i32_0 = arith.constant 0 : i32
    %c0_i32_1 = arith.constant 0 : i32
    return %c0_i32, %c0_i32_0 : i32, i32
  }
  func.func @transform_20(%arg0: i32) -> (i32, i32, i32) {
    %c0_i32 = arith.constant 0 : i32
    %c0_i32_0 = arith.constant 0 : i32
    %c0_i32_1 = arith.constant 0 : i32
    %c0_i32_2 = arith.constant 0 : i32
    return %c0_i32, %c0_i32_0, %c0_i32_1 : i32, i32, i32
  }
  func.func @transform_21(%arg0: i32) -> (i32, i32) {
    %c0_i32 = arith.constant 0 : i32
    %c0_i32_0 = arith.constant 0 : i32
    %c0_i32_1 = arith.constant 0 : i32
    return %c0_i32, %c0_i32_0 : i32, i32
  }
  func.func @transform_22(%arg0: i32) -> (i32, i32, i32) {
    %c0_i32 = arith.constant 0 : i32
    %c0_i32_0 = arith.constant 0 : i32
    %c0_i32_1 = arith.constant 0 : i32
    %c0_i32_2 = arith.constant 0 : i32
    return %c0_i32, %c0_i32_0, %c0_i32_1 : i32, i32, i32
  }
  func.func @transform_23(%arg0: i32) -> (i32, i32) {
    %c0_i32 = arith.constant 0 : i32
    %c0_i32_0 = arith.constant 0 : i32
    %c0_i32_1 = arith.constant 0 : i32
    return %c0_i32, %c0_i32_0 : i32, i32
  }
  func.func @transform_24(%arg0: i32) -> (i32, i32, i32) {
    %c0_i32 = arith.constant 0 : i32
    %c0_i32_0 = arith.constant 0 : i32
    %c0_i32_1 = arith.constant 0 : i32
    return %arg0, %c0_i32, %c0_i32_0 : i32, i32, i32
  }
  func.func @transform_25(%arg0: i32) -> (i32, i32, i32) {
    %c0_i32 = arith.constant 0 : i32
    %c0_i32_0 = arith.constant 0 : i32
    %c0_i32_1 = arith.constant 0 : i32
    return %arg0, %c0_i32, %c0_i32_0 : i32, i32, i32
  }
}

</mosaic_0001>

<bundles_post_ra>
// kernel: fta_module_forward.1
= control target key start
LH: loop header
LB: loop body
LE: loop exit
PB: predicated region body
PF: predicated region fallthrough
CT: control target
= control target key end

     0   :  { %s13265_s29 = smov 0   ;;  %s15244_s0 = inlined_call_operand.vmem [shape: f32[2,4,320], index: 0, kind: input, shape index: {}]   ;;  %s15245_s1 = inlined_call_operand.vmem [shape: f32[1,320], index: 1, kind: input, shape index: {}]   ;;  %s15246_s2 = inlined_call_operand.vmem [shape: f32[16,320], index: 2, kind: input, shape index: {}]   ;;  %s15247_s3 = inlined_call_operand.vmem [shape: f32[16,320], index: 3, kind: input, shape index: {}]   ;;  %s15248_s4 = inlined_call_operand.vmem [shape: f32[320,16], index: 4, kind: input, shape index: {}]   ;;  %s15249_s5 = inlined_call_operand.vmem [shape: f32[320,16], index: 5, kind: input, shape index: {}]   ;;  %s15250_s6 = inlined_call_operand.vmem [shape: f32[3,16,16], index: 6, kind: input, shape index: {}]   ;;  %s15251_s7 = inlined_call_operand.vmem [shape: f32[5,16,16], index: 7, kind: input, shape index: {}]   ;;  %s15252_s8 = inlined_call_operand.vmem [shape: f32[4,1], index: 8, kind: input, shape index: {}]   ;;  %s15253_s9 = inlined_call_operand.vmem [shape: f32[4,1], index: 9, kind: input, shape index: {}]   ;;  %s15254_s10 = inlined_call_operand.vmem [shape: f32[8,4], index: 10, kind: input, shape index: {}]   ;;  %s15255_s11 = inlined_call_operand.vmem [shape: f32[8,1], index: 11, kind: input, shape index: {}]   ;;  %s15256_s12 = inlined_call_operand.vmem [shape: f32[3,3,16,4], index: 12, kind: input, shape index: {}]   ;;  %s15257_s13 = inlined_call_operand.vmem [shape: f32[16,1], index: 13, kind: input, shape index: {}]   ;;  %s15258_s14 = inlined_call_operand.vmem [shape: f32[5,5,16,16], index: 14, kind: input, shape index: {}]   ;;  %s15259_s15 = inlined_call_operand.vmem [shape: f32[16,1], index: 15, kind: input, shape index: {}]   ;;  %s15260_s16 = inlined_call_operand.vmem [shape: f32[3,8,4], index: 16, kind: input, shape index: {}]   ;;  %s15261_s17 = inlined_call_operand.vmem [shape: f32[8,1], index: 17, kind: input, shape index: {}]   ;;  %s15262_s18 = inlined_call_operand.vmem [shape: f32[3,8,8], index: 18, kind: input, shape index: {}]   ;;  %s15263_s19 = inlined_call_operand.vmem [shape: f32[8,1], index: 19, kind: input, shape index: {}]   ;;  %s15264_s20 = inlined_call_operand.vmem [shape: f32[5,8,4], index: 20, kind: input, shape index: {}]   ;;  %s15265_s21 = inlined_call_operand.vmem [shape: f32[8,1], index: 21, kind: input, shape index: {}]   ;;  %s15266_s22 = inlined_call_operand.vmem [shape: f32[5,8,8], index: 22, kind: input, shape index: {}]   ;;  %s15267_s23 = inlined_call_operand.vmem [shape: f32[8,1], index: 23, kind: input, shape index: {}]   ;;  %s15268_s24 = inlined_call_operand.vmem [shape: f32[2,8,320], index: 24, kind: output, shape index: {0}]   ;;  %s15269_s25 = inlined_call_operand.vmem [shape: f32[2,8,320], index: 25, kind: output, shape index: {1}]  }
   0x1   :  { %15337 = sst [smem:[#allocation4_spill]] %s15244_s0 }
   0x2   :  { %15338 = sst [smem:[#allocation5_spill]] %s15245_s1 }
   0x3   :  { %15339 = sst [smem:[#allocation6_spill]] %s15246_s2 }
   0x4   :  { %15340 = sst [smem:[#allocation7_spill]] %s15247_s3 }
   0x5   :  { %15341 = sst [smem:[#allocation8_spill]] %s15248_s4 }
   0x6   :  { %15342 = sst [smem:[#allocation9_spill]] %s15249_s5 }
   0x7   :  { %15343 = sst [smem:[#allocation10_spill]] %s15250_s6 }
   0x8   :  { %15344 = sst [smem:[#allocation11_spill]] %s15251_s7 }
   0x9   :  { %15345 = sst [smem:[#allocation12_spill]] %s15252_s8 }
   0xa   :  { %15346 = sst [smem:[#allocation13_spill]] %s15253_s9 }
   0xb LB: > { %s10928_s2 = sadd.s32 4294967295, %s13102_s29   ;;  %p10932_p0 = scmp.ge.s32.totalorder %s13102_s29, 1  ;;  %s13102_s29 = sphi %s13265_s29, %s36_s29  }
   0xc   : > { %p690_p1 = scmp.lt.s32.totalorder %s13102_s29, 3 }
   0xe   : > { %p691_p2 = pnand %p10932_p0, %p690_p1 }
   0xf   : > { %s15347_s7 = sld [smem:[#allocation12_spill]] (!%p691_p2)  ;;  %v13104_v1 = vmov (!%p691_p2), 0   ;;  %s15348_s1 = sld [smem:[#allocation13_spill]] (!%p691_p2)  ;;  %v2122_v3 = vld [vmem:[%s15263_s19] sm:$0xff] (!%p691_p2)  ;;  %v13105_v4 = vmov (!%p691_p2), 0.0   ;;  %vm13106_vm0 = vmmov (!%p691_p2), 0   ;;  %v789_v7 = vlaneseq (!%p691_p2) }
  0x10   : > { %694 = sbr.rel (%p691_p2) target bundleno = 3951 (0xf6f), region = 116  ;;  %12611 = vset.pattern.permute.xlu0 (!%p691_p2), %v13104_v1  ;;  %12612 = vset.pattern.permute.xlu1 (!%p691_p2), %v13104_v1  ;;  %p763_p3 = scmp.lt.s32.totalorder (!%p691_p2), %s10928_s2, 1  ;;  %v13107_v5 = vmov (!%p691_p2), 839922192   ;;  %vm873_vm1 = vcmask (!%p691_p2), 1043456   ;;  %v861_v38 = vld [vmem:[%s15254_s10] sm:$0xff] (!%p691_p2) }
  0x11   : > { %11559 = vmatprep.subr.mxu1 (!%p691_p2), %v13105_v4  ;;  %944 = vmatprep.mubr.f32.mxu0 (!%p691_p2), %v13105_v4  ;;  %v787_v6 = vunpack.c.l.s4 (!%p691_p2), %v13107_v5  ;;  %v790_v9 = vshrl.u32 (!%p691_p2), %v789_v7, 7  ;;  %s15349_s5 = sld [smem:[#allocation5_spill]] (!%p691_p2)  ;;  %s15350_s30 = sld [smem:[#allocation4_spill]] (!%p691_p2)  ;;  %vm869_vm2 = vcmask (!%p691_p2), 31744   ;;  %v13108_v41 = vmov (!%p691_p2), 0.0|0.0  }
  0x12   : > { %11561 = vmatprep.mubr.msk.f32.mxu1 (!%p691_p2), %vm13106_vm0, %v13105_v4  ;;  %vm1026_vm3 = vcmask (!%p691_p2), 523264   ;;  %s15352_s3 = sld [smem:[#allocation10_spill]] (!%p691_p2)  ;;  %vm1214_vm4 = vcmask (!%p691_p2), 130048   ;;  %s15353_s27 = sld [smem:[#allocation9_spill]] (!%p691_p2)  ;;  %vm1829_vm6 = vcmask (!%p691_p2), 64512   ;;  %vm829_vm8 = vcmask (!%p691_p2), 388096  }
  0x13   : > { %v788_v8 = vunpack.c.0.s8 (!%p691_p2), %v787_v6  ;;  %v814_v11 = vsub.s32 (!%p691_p2), 0, %v790_v9  ;;  %v818_v12 = vsub.s32 (!%p691_p2), 1, %v790_v9  ;;  %v822_v15 = vsub.s32 (!%p691_p2), 2, %v790_v9  ;;  %s15354_s0 = sld [smem:[#allocation11_spill]] (!%p691_p2)  ;;  %830 = vst.msk [vmem:[#allocation2] sm:$0xf] (!%p691_p2), %vm829_vm8, %v13105_v4 }
  0x14   : > { %vm842_vm9 = vcmask (!%p691_p2), 392192   ;;  %vm847_vm10 = vcmask (!%p691_p2), 1043840   ;;  %vm848_vm11 = vcmask (!%p691_p2), 1047556   ;;  %s15355_s8 = sld [smem:[#allocation6_spill]] (!%p691_p2)  ;;  %vm831_vm15 = vcmask (!%p691_p2), 1044352   ;;  %s15356_s28 = sld [smem:[#allocation7_spill]] (!%p691_p2) }
  0x15   : > { %v781_v0 = vld [vmem:[%s15347_s7] sm:$0xf] (!%p691_p2)  ;;  %v791_v10 = vsub.s32 (!%p691_p2), %v788_v8, %v790_v9  ;;  %853 = vst.msk [vmem:[#allocation3] sm:$0xff] (!%p691_p2), %vm842_vm9, %v13105_v4  ;;  %854 = vst.msk [vmem:[#allocation3 + $0x20] sm:$0xff] (!%p691_p2), %vm842_vm9, %v13105_v4  ;;  %s15283_s9 = smov (!%p691_p2), 79   ;;  %s15289_s6 = smov (!%p691_p2), 60  }
  0x16   : > { %784 = vperm.xlu0 (!%p691_p2), %12611, %v781_v0   ;;  %v796_v2 = vld [vmem:[%s15348_s1] sm:$0xf] (!%p691_p2)  ;;  %s15351_s1 = sld [smem:[#allocation8_spill]] (!%p691_p2)  ;;  %vm849_vm12 = vmor (!%p691_p2), %vm848_vm11, %vm847_vm10  ;;  %vm4348_vm8 = vcmask (!%p691_p2), 826368   ;;  %vm4529_vm10 = vcmask (!%p691_p2), 809984   ;;  %vm4716_vm11 = vcmask (!%p691_p2), 662528  }
  0x17   : > { %s15397_s2 = smov (!%p763_p3, %s10928_s2), 1  ;;  %v778_v13 = vld [vmem:[%s15349_s5] sm:$0x7]  ;;  %s15291_s5 = smov 61  }
  0x18   : > { %s12570_s4 = smul.u32 12, %s15397_s2  ;;  %v13295_v17 = vrot.slane %v778_v13, %v814_v11  ;;  %v13297_v18 = vrot.slane %v778_v13, %v818_v12  ;;  %v13299_v22 = vrot.slane %v778_v13, %v822_v15  ;;  %s15293_s26 = smov 122  }
  0x1a   : > { %799 = vperm.xlu0 %12611, %v796_v2   ;;  %s767_s7 = scalar_lea.vmem %s15350_s30, %s12570_s4  ;;  %v825_v26 = vcombine.low %v13295_v17, %v13297_v18  ;;  %s15276_s4 = smov 100  }
  0x1b   : > { %v779_v19 = vld [vmem:[%s767_s7] sm:$0xff]  ;;  %v780_v20 = vld [vmem:[%s767_s7 + $0x8] sm:$0xf]  ;;  %s15280_s7 = smov 48   ;;  %s15287_s30 = smov 59  }
  0x1c   : > { %v1044_v29 = vld [vmem:[%s15351_s1 + $0x80] sm:$0xff]  ;;  %v1045_v30 = vld [vmem:[%s15351_s1 + $0x88] sm:$0xff]  ;;  %v1046_v35 = vld [vmem:[%s15351_s1 + $0x90] sm:$0xff] }
  0x1d   : > { %v1028_v33 = vld [vmem:[%s15351_s1] sm:$0xff]  ;;  %v1029_v34 = vld [vmem:[%s15351_s1 + $0x8] sm:$0xff]  ;;  %v1047_v36 = vld [vmem:[%s15351_s1 + $0x98] sm:$0xff]  ;;  %v12028_v39 = vpack.c.bf16 %v1045_v30, %v1044_v29 }
  0x1e   : > { %2125 = vperm.xlu0 %12611, %v2122_v3   ;;  %v12030_v40 = vpack.c.bf16 %v1029_v34, %v1028_v33  ;;  %v12032_v42 = vpack.c.bf16 %v1047_v36, %v1046_v35  ;;  %v1030_v43 = vld [vmem:[%s15351_s1 + $0x10] sm:$0xff]  ;;  %v1031_v44 = vld [vmem:[%s15351_s1 + $0x18] sm:$0xff]  ;;  %v1048_v45 = vld [vmem:[%s15351_s1 + $0xa0] sm:$0xff] }
  0x1f   : > { %v1049_v46 = vld [vmem:[%s15351_s1 + $0xa8] sm:$0xff]  ;;  %v12034_v47 = vpack.c.bf16 %v1031_v44, %v1030_v43  ;;  %v1032_v49 = vld [vmem:[%s15351_s1 + $0x20] sm:$0xff]  ;;  %v1050_v51 = vld [vmem:[%s15351_s1 + $0xb0] sm:$0xff] }
  0x20   : > { %v12036_v48 = vpack.c.bf16 %v1049_v46, %v1048_v45  ;;  %v1033_v50 = vld [vmem:[%s15351_s1 + $0x28] sm:$0xff]  ;;  %v1051_v52 = vld [vmem:[%s15351_s1 + $0xb8] sm:$0xff]  ;;  %v1034_v55 = vld [vmem:[%s15351_s1 + $0x30] sm:$0xff] }
  0x21   : > { %v12038_v53 = vpack.c.bf16 %v1033_v50, %v1032_v49  ;;  %v12040_v54 = vpack.c.bf16 %v1051_v52, %v1050_v51  ;;  %v1035_v56 = vld [vmem:[%s15351_s1 + $0x38] sm:$0xff]  ;;  %v1052_v57 = vld [vmem:[%s15351_s1 + $0xc0] sm:$0xff]  ;;  %v1053_v58 = vld [vmem:[%s15351_s1 + $0xc8] sm:$0xff] }
  0x22   : > { %v12042_v59 = vpack.c.bf16 %v1035_v56, %v1034_v55  ;;  %v12044_v60 = vpack.c.bf16 %v1053_v58, %v1052_v57  ;;  %v1036_v61 = vld [vmem:[%s15351_s1 + $0x40] sm:$0xff]  ;;  %v1037_v62 = vld [vmem:[%s15351_s1 + $0x48] sm:$0xff]  ;;  %v1054_v63 = vld [vmem:[%s15351_s1 + $0xd0] sm:$0xff] }
  0x23   : > { %v1055_v0 = vld [vmem:[%s15351_s1 + $0xd8] sm:$0xff]  ;;  %v12046_v1 = vpack.c.bf16 %v1037_v62, %v1036_v61  ;;  %v1038_v3 = vld [vmem:[%s15351_s1 + $0x50] sm:$0xff]  ;;  %v1056_v6 = vld [vmem:[%s15351_s1 + $0xe0] sm:$0xff] }
  0x24   : > { %v12048_v2 = vpack.c.bf16 %v1055_v0, %v1054_v63  ;;  %v1039_v5 = vld [vmem:[%s15351_s1 + $0x58] sm:$0xff]  ;;  %v1057_v7 = vld [vmem:[%s15351_s1 + $0xe8] sm:$0xff]  ;;  %v1058_v12 = vld [vmem:[%s15351_s1 + $0xf0] sm:$0xff] }
  0x25   : > { %v12050_v8 = vpack.c.bf16 %v1039_v5, %v1038_v3  ;;  %v12052_v9 = vpack.c.bf16 %v1057_v7, %v1056_v6  ;;  %v1041_v11 = vld [vmem:[%s15351_s1 + $0x68] sm:$0xff]  ;;  %v1059_v13 = vld [vmem:[%s15351_s1 + $0xf8] sm:$0xff]  ;;  %v1066_v33 = vld [vmem:[%s15351_s1 + $0x130] sm:$0xff] }
  0x26   : > { %v12056_v15 = vpack.c.bf16 %v1059_v13, %v1058_v12  ;;  %v1065_v29 = vld [vmem:[%s15351_s1 + $0x128] sm:$0xff]  ;;  %v1067_v34 = vld [vmem:[%s15351_s1 + $0x138] sm:$0xff]  ;;  %v1212_v36 = vld [vmem:[%s15352_s3] sm:$0xff] }
  0x27   : > { %v12070_v35 = vpack.c.bf16 %v1067_v34, %v1066_v33  ;;  %v10951_v51 = vld [vmem:[%s15352_s3 + $0x20] sm:$0xff]  ;;  %v10952_v52 = vld [vmem:[%s15352_s3 + $0x28] sm:$0xff]  ;;  %v10954_v6 = vld [vmem:[%s15260_s16 + $0x10] sm:$0xff] }
  0x28   : > { %v13485_v56 = vpack.c.bf16 %v10952_v52, %v10951_v51  ;;  %v1668_v58 = vld [vmem:[%s15261_s17] sm:$0xff]  ;;  %v10946_v61 = vld [vmem:[%s15260_s16 + $0x8] sm:$0xff] }
  0x29   : > { %1671 = vperm.xlu1 %12612, %v1668_v58   ;;  %v1756_v34 = vld [vmem:[%s15262_s18] sm:$0xff]  ;;  %v2169_v52 = vld [vmem:[%s15353_s27 + $0xa8] sm:$0xff]  ;;  %v2171_v58 = vld [vmem:[%s15353_s27 + $0xb8] sm:$0xff] }
  0x2a   : > { %v2168_v51 = vld [vmem:[%s15353_s27 + $0xa0] sm:$0xff] }
  0x95   : > { %v785_v14 = vpop.permute.xlu0 %784 }
  0x96   : > { %v792_v16 = vrot.slane %v785_v14, %v791_v10 }
  0x98   : > { %v794_v23 = vmul.f32 %v792_v16, %v779_v19  ;;  %v795_v24 = vmul.f32 %v792_v16, %v780_v20  ;;  %v1042_v16 = vld [vmem:[%s15351_s1 + $0x70] sm:$0xff]  ;;  %v1043_v19 = vld [vmem:[%s15351_s1 + $0x78] sm:$0xff] }
  0x99   : > { %v800_v21 = vpop.permute.xlu0 %799  ;;  %v12058_v20 = vpack.c.bf16 %v1043_v19, %v1042_v16 }
  0x9a   : > { %v807_v25 = vrot.slane %v800_v21, %v791_v10  ;;  %v1040_v10 = vld [vmem:[%s15351_s1 + $0x60] sm:$0xff] }
  0x9b   : > { %v12054_v14 = vpack.c.bf16 %v1041_v11, %v1040_v10  ;;  %v1060_v21 = vld [vmem:[%s15351_s1 + $0x100] sm:$0xff] }
  0x9c   : > { %v809_v27 = vadd.f32 %v807_v25, %v794_v23  ;;  %v810_v28 = vadd.f32 %v807_v25, %v795_v24  ;;  %v1061_v23 = vld [vmem:[%s15351_s1 + $0x108] sm:$0xff]  ;;  %v1062_v25 = vld [vmem:[%s15351_s1 + $0x110] sm:$0xff] }
  0x9d   : > { %v12061_v24 = vpack.c.bf16 %v1061_v23, %v1060_v21 }
  0x9e   : > { %v13309_v31 = vmul.f32 %v825_v26, %v809_v27  ;;  %v13312_v32 = vmul.f32 %v13299_v22, %v810_v28  ;;  %v1063_v26 = vld [vmem:[%s15351_s1 + $0x118] sm:$0xff]  ;;  %v1064_v28 = vld [vmem:[%s15351_s1 + $0x120] sm:$0xff]  ;;  %s15309_s1 = smov 101  }
  0x9f   : > { %v12064_v27 = vpack.c.bf16 %v1063_v26, %v1062_v25  ;;  %v12067_v30 = vpack.c.bf16 %v1065_v29, %v1064_v28  ;;  %v2165_v28 = vld [vmem:[%s15353_s27 + $0x88] sm:$0xff] }
  0xa0   : > { %11560 = vmatpush3.msk.msra.mxu1 %vm873_vm1, %v13312_v32  ;;  %v13330_v37 = vcombine.high %v13309_v31, %v13309_v31  ;;  %v10960_v29 = vld [vmem:[%s15262_s18 + $0x8] sm:$0xff] }
  0xa1   : > { %11562 = vmatmul.mubr.msk.f32.vlgmr.msra.gmra.mrb[0].mxu1 %vm869_vm2, %v861_v38  ;;  %12075 = vmatprep.subr.bf16.mxu1 %v13108_v41 }
  0xa2   : > { %10936 = vmatprep.subr.msk.mxu0 %vm873_vm1, %v13330_v37  ;;  %11594 = vmatprep.mubr.msk.f32.mxu1 %vm13106_vm0, %v13105_v4 }
  0xa3   : > { %10937 = vmatpush1.msk.msra.mxu0 %vm873_vm1, %v13309_v31 }
  0xa4   : > { %10938 = vmatmul.mubr.msk.f32.vlgmr.msra.gmra.mrb[0].mxu0 %vm869_vm2, %v861_v38  ;;  %12029 = vmatprep.subr.bf16.mxu0 %v12028_v39  ;;  %v1213_v38 = vld [vmem:[%s15352_s3 + $0x8] sm:$0xff]  ;;  %v10943_v39 = vld [vmem:[%s15352_s3 + $0x10] sm:$0xff] }
  0xa5   : > { %12031 = vmatpush3.bf16.msra.mxu0 %v12030_v40  ;;  %1135 = vmatprep.mubr.f32.mxu0 %v13330_v37  ;;  %v12073_v40 = vpack.c.bf16 %v1213_v38, %v1212_v36  ;;  %v2148_v36 = vld [vmem:[%s15353_s27] sm:$0xff]  ;;  %v2149_v38 = vld [vmem:[%s15353_s27 + $0x8] sm:$0xff] }
  0xa6   : > { %12033 = vmatprep.subr.bf16.mxu0 %v12032_v42  ;;  %v10944_v42 = vld [vmem:[%s15352_s3 + $0x18] sm:$0xff]  ;;  %s15357_s3 = smov 100  }
  0xa7   : > { %v12076_v43 = vpack.c.bf16 %v10944_v42, %v10943_v39  ;;  %v2166_v42 = vld [vmem:[%s15353_s27 + $0x90] sm:$0xff] }
  0xa9   : > { %12035 = vmatpush3.bf16.msra.mxu0 %v12034_v47  ;;  %12077 = vmatpush3.bf16.msra.mxu1 %v12076_v43 }
  0xaa   : > { %12037 = vmatprep.subr.bf16.mxu0 %v12036_v48  ;;  %11597 = vmatprep.subr.mxu1 %v13105_v4 }
  0xad   : > { %12039 = vmatpush3.bf16.msra.mxu0 %v12038_v53 }
  0xae   : > { %12041 = vmatprep.subr.bf16.mxu0 %v12040_v54 }
  0xb1   : > { %12043 = vmatpush3.bf16.msra.mxu0 %v12042_v59  ;;  %v3088_v59 = vld [vmem:[%s15265_s21] sm:$0xff] }
  0xb2   : > { %12045 = vmatprep.subr.bf16.mxu0 %v12044_v60  ;;  %3091 = vperm.xlu1 %12612, %v3088_v59   ;;  %v3833_v60 = vld [vmem:[%s15267_s23] sm:$0xff] }
  0xb5   : > { %12047 = vmatpush3.bf16.msra.mxu0 %v12046_v1 }
  0xb6   : > { %12049 = vmatprep.subr.bf16.mxu0 %v12048_v2  ;;  %3836 = vperm.xlu1 %12612, %v3833_v60   ;;  %v1288_v2 = vld [vmem:[%s15260_s16] sm:$0xff]  ;;  %v2154_v60 = vld [vmem:[%s15353_s27 + $0x30] sm:$0xff] }
  0xb9   : > { %12051 = vmatpush3.bf16.msra.mxu0 %v12050_v8 }
  0xba   : > { %12053 = vmatprep.subr.bf16.mxu0 %v12052_v9 }
  0xbd   : > { %12055 = vmatpush3.bf16.msra.mxu0 %v12054_v14 }
  0xbe   : > { %12057 = vmatprep.subr.bf16.mxu0 %v12056_v15  ;;  %v1672_v15 = vpop.permute.xlu1 %1671 }
  0xc1   : > { %12059 = vmatpush3.bf16.msra.mxu0 %v12058_v20 }
  0xc2   : > { %12060 = vmatprep.subr.bf16.mxu0 %v13108_v41 }
  0xc4   : > { %1136 = vmatmul.mubr.f32.vlgmr.msra.gmra.mrb[2].mxu0 %v13309_v31 }
  0xc5   : > { %12062 = vmatpush3.bf16.msra.mxu0 %v12061_v24  ;;  %11580 = vmatprep.mubr.msk.f32.mxu0 %vm13106_vm0, %v13105_v4 }
  0xc6   : > { %12063 = vmatprep.subr.bf16.mxu0 %v13108_v41 }
  0xc9   : > { %12065 = vmatpush3.bf16.msra.mxu0 %v12064_v27  ;;  %v2164_v27 = vld [vmem:[%s15353_s27 + $0x80] sm:$0xff] }
  0xca   : > { %12066 = vmatprep.subr.bf16.mxu0 %v13108_v41 }
  0xcd   : > { %12068 = vmatpush3.bf16.msra.mxu0 %v12067_v30 }
  0xce   : > { %12069 = vmatprep.subr.bf16.mxu0 %v13108_v41 }
  0xd1   : > { %12071 = vmatpush3.bf16.msra.mxu0 %v12070_v35  ;;  %v12090_v35 = vpack.c.bf16 %v2165_v28, %v2164_v27  ;;  %v2180_v27 = vld [vmem:[%s15353_s27 + $0x100] sm:$0xff]  ;;  %v2181_v28 = vld [vmem:[%s15353_s27 + $0x108] sm:$0xff] }
  0xd2   : > { %12072 = vmatprep.subr.bf16.mxu0 %v13108_v41 }
  0xd4   : > { %11581 = vmatmul.mubr.msk.f32.vlgmr.msra.gmra.mrb[4].mxu0 %vm1026_vm3, %v13312_v32 }
  0xd5   : > { %11587 = vmatprep.mubr.msk.f32.mxu0 %vm13106_vm0, %v13105_v4  ;;  %12074 = vmatpush3.bf16.msra.mxu0 %v12073_v40 }
  0xd6   : > { %12078 = vmatprep.subr.bf16.mxu0 %v13108_v41 }
 0x174   : > { %v13473_v44 = vpop.f32.mrb[0].mxu1 }
 0x175   : > { %v11563_v45 = vpop.f32.mrb[1].mxu1 }
 0x176   : > { %v12092_v45 = vpack.c.bf16 %v2149_v38, %v2148_v36  ;;  %v2185_v36 = vld [vmem:[%s15353_s27 + $0x128] sm:$0xff] }
 0x177   : > { %v13475_v46 = vpop.f32.mrb[0].mxu0 }
 0x178   : > { %v13477_v47 = vpop.f32.mrb[1].mxu0 }
 0x197   : > { %v11290_v48 = vpop.f32.mrb[2].mxu0 }
 0x198   : > { %v11291_v49 = vpop.f32.mrb[3].mxu0 }
 0x199   : > { %v11292_v50 = vadd.f32 %v11291_v49, %v11290_v48  ;;  %v2150_v49 = vld [vmem:[%s15353_s27 + $0x10] sm:$0xff] }
 0x1a7   : > { %v1207_v53 = vpop.f32.mrb[4].mxu0 }
 0x1a8   : > { %v1208_v54 = vadd.f32 %v11292_v50, %v1207_v53  ;;  %v11582_v55 = vpop.f32.mrb[5].mxu0  ;;  %v2151_v50 = vld [vmem:[%s15353_s27 + $0x18] sm:$0xff] }
 0x1a9   : > { %v12096_v53 = vpack.c.bf16 %v2151_v50, %v2150_v49  ;;  %v2152_v55 = vld [vmem:[%s15353_s27 + $0x20] sm:$0xff] }
 0x1aa   : > { %v1211_v57 = vmul.f32 0.0625, %v1208_v54  ;;  %v12098_v54 = vpack.c.bf16 %v2169_v52, %v2168_v51  ;;  %v2329_v50 = vld [vmem:[%s15354_s0] sm:$0xff]  ;;  %v2330_v51 = vld [vmem:[%s15354_s0 + $0x8] sm:$0xff] }
 0x1ac   : > { %11588 = vmatmul.mubr.msk.f32.vlgmr.msra.gmra.mrb[6].mxu0 %vm1214_vm4, %v1211_v57  ;;  %11595 = vmatmul.mubr.msk.f32.vlgmr.msra.gmra.mrb[2].mxu1 %vm1214_vm4, %v1211_v57 }
 0x1ad   : > { %12080 = vmatpush3.bf16.msra.mxu0 %v13485_v56  ;;  %11611 = vmatprep.mubr.msk.f32.mxu0 %vm13106_vm0, %v13105_v4 }
 0x1ae   : > { %11599 = vmatprep.mubr.msk.f32.mxu1 %vm13106_vm0, %v13105_v4  ;;  %12081 = vmatprep.subr.bf16.mxu0 %v13108_v41 }
 0x1b0   : > { %11612 = vmatmul.mubr.msk.f32.vlgmr.msra.gmra.mrb[8].mxu0 %vm1214_vm4, %v1211_v57  ;;  %v2170_v57 = vld [vmem:[%s15353_s27 + $0xb0] sm:$0xff] }
 0x1b1   : > { %12083 = vmatpush3.bf16.msra.mxu0 %v12073_v40  ;;  %11623 = vmatprep.mubr.msk.f32.mxu0 %vm13106_vm0, %v13105_v4  ;;  %v12102_v59 = vpack.c.bf16 %v2171_v58, %v2170_v57  ;;  %v12135_v57 = vpack.c.bf16 %v2330_v51, %v2329_v50 }
 0x1b2   : > { %11633 = vmatprep.subr.mxu0 %v13105_v4 }
 0x27f   : > { %v1284_v62 = vpop.f32.mrb[6].mxu0  ;;  %v1358_v63 = vpop.f32.mrb[2].mxu1 }
 0x280   : > { %v11589_v0 = vpop.f32.mrb[7].mxu0  ;;  %v11596_v1 = vpop.f32.mrb[3].mxu1  ;;  %11598 = vmatpush3.msk.msra.mxu1 %vm873_vm1, %v1358_v63  ;;  %v2173_v63 = vld [vmem:[%s15353_s27 + $0xc8] sm:$0xff] }
 0x281   : > { %11600 = vmatmul.mubr.msk.f32.vlgmr.msra.gmra.mrb[4].mxu1 %vm869_vm2, %v10946_v61  ;;  %11602 = vmatprep.subr.mxu1 %v13105_v4  ;;  %v2155_v61 = vld [vmem:[%s15353_s27 + $0x38] sm:$0xff] }
 0x282   : > { %11603 = vmatpush3.msk.msra.mxu1 %vm873_vm1, %v1284_v62  ;;  %11604 = vmatprep.mubr.msk.f32.mxu1 %vm13106_vm0, %v13105_v4  ;;  %v2172_v62 = vld [vmem:[%s15353_s27 + $0xc0] sm:$0xff]  ;;  %v12104_v0 = vpack.c.bf16 %v2155_v61, %v2154_v60 }
 0x283   : > { %v1585_v3 = vpop.f32.mrb[8].mxu0  ;;  %11614 = vmatprep.subr.mxu1 %v13105_v4  ;;  %v12106_v1 = vpack.c.bf16 %v2173_v63, %v2172_v62  ;;  %v10969_v62 = vld [vmem:[%s15354_s0 + $0x10] sm:$0xff]  ;;  %v10970_v63 = vld [vmem:[%s15354_s0 + $0x18] sm:$0xff] }
 0x284   : > { %v11613_v5 = vpop.f32.mrb[9].mxu0 }
 0x285   : > { %11605 = vmatmul.mubr.msk.f32.vlgmr.msra.gmra.mrb[6].mxu1 %vm869_vm2, %v1288_v2  ;;  %v2156_v2 = vld [vmem:[%s15353_s27 + $0x40] sm:$0xff]  ;;  %v2174_v5 = vld [vmem:[%s15353_s27 + $0xd0] sm:$0xff] }
 0x286   : > { %11615 = vmatpush3.msk.msra.mxu1 %vm873_vm1, %v1585_v3  ;;  %11616 = vmatprep.mubr.msk.f32.mxu1 %vm13106_vm0, %v13105_v4  ;;  %v2157_v3 = vld [vmem:[%s15353_s27 + $0x48] sm:$0xff] }
 0x287   : > { %12084 = vmatprep.subr.bf16.mxu1 %v13108_v41 }
 0x289   : > { %11617 = vmatmul.mubr.msk.f32.vlgmr.msra.gmra.mrb[8].mxu1 %vm869_vm2, %v10954_v6  ;;  %v2175_v6 = vld [vmem:[%s15353_s27 + $0xd8] sm:$0xff] }
 0x28a   : > { %12086 = vmatpush3.bf16.msra.mxu1 %v12076_v43  ;;  %11630 = vmatprep.mubr.msk.f32.mxu1 %vm13106_vm0, %v13105_v4  ;;  %v2167_v43 = vld [vmem:[%s15353_s27 + $0x98] sm:$0xff] }
 0x28b   : > { %11638 = vmatprep.subr.mxu1 %v13105_v4  ;;  %v12094_v48 = vpack.c.bf16 %v2167_v43, %v2166_v42  ;;  %v10977_v43 = vld [vmem:[%s15354_s0 + $0x20] sm:$0xff] }
 0x354   : > { %v1436_v7 = vpop.f32.mrb[4].mxu1 }
 0x355   : > { %v11601_v8 = vpop.f32.mrb[5].mxu1 }
 0x356   : > { %v12110_v8 = vpack.c.bf16 %v2175_v6, %v2174_v5  ;;  %v13724_v6 = vpack.c.bf16 %v10970_v63, %v10969_v62 }
 0x358   : > { %v1512_v9 = vpop.f32.mrb[6].mxu1 }
 0x359   : > { %v1513_v10 = vadd.f32 %v1512_v9, %v1436_v7  ;;  %v11606_v11 = vpop.f32.mrb[7].mxu1  ;;  %v12108_v7 = vpack.c.bf16 %v2157_v3, %v2156_v2  ;;  %v2158_v9 = vld [vmem:[%s15353_s27 + $0x50] sm:$0xff] }
 0x35a   : > { %v2176_v11 = vld [vmem:[%s15353_s27 + $0xe0] sm:$0xff] }
 0x35c   : > { %v1663_v12 = vpop.f32.mrb[8].mxu1 }
 0x35d   : > { %v1667_v13 = vadd.f32 %v1663_v12, %v1513_v10  ;;  %v11618_v14 = vpop.f32.mrb[9].mxu1  ;;  %v2159_v10 = vld [vmem:[%s15353_s27 + $0x58] sm:$0xff]  ;;  %v2177_v12 = vld [vmem:[%s15353_s27 + $0xe8] sm:$0xff] }
 0x35e   : > { %v12114_v14 = vpack.c.bf16 %v2177_v12, %v2176_v11 }
 0x35f   : > { %v1674_v16 = vadd.f32 %v1672_v15, %v1667_v13  ;;  %v12112_v13 = vpack.c.bf16 %v2159_v10, %v2158_v9  ;;  %v2160_v15 = vld [vmem:[%s15353_s27 + $0x60] sm:$0xff]  ;;  %v10990_v10 = vld [vmem:[%s15354_s0 + $0x48] sm:$0xff] }
 0x360   : > { %v10989_v9 = vld [vmem:[%s15354_s0 + $0x40] sm:$0xff] }
 0x361   : > { %v1676_v19 = vmin.f32 %v1674_v16, 0.0  ;;  %vm1675_vm5 = vcmp.gt.f32.partialorder %v1674_v16, 0.0  ;;  %v13738_v11 = vpack.c.bf16 %v10990_v10, %v10989_v9 }
 0x363   : > { %v1677_v20 = vmul.f32 1.442695, %v1676_v19  ;;  %v2178_v19 = vld [vmem:[%s15353_s27 + $0xf0] sm:$0xff] }
 0x365   : > { %13040 = vpow2.f32 %v1677_v20  ;;  %v2179_v20 = vld [vmem:[%s15353_s27 + $0xf8] sm:$0xff] }
 0x36f   : > { %v13041_v21 = vpop.eup %13040 }
 0x370   : > { %v10957_v23 = vadd.f32 -1.0, %v13041_v21 }
 0x372   : > { %v1680_v24 = vmul.f32 1.6732632, %v10957_v23  ;;  %v12118_v23 = vpack.c.bf16 %v2179_v20, %v2178_v19 }
 0x374   : > { %v1681_v25 = vsel %vm1675_vm5, %v1674_v16, %v1680_v24  ;;  %v2161_v16 = vld [vmem:[%s15353_s27 + $0x68] sm:$0xff]  ;;  %v2162_v24 = vld [vmem:[%s15353_s27 + $0x70] sm:$0xff] }
 0x375   : > { %v1682_v26 = vmul.f32 1.050701, %v1681_v25  ;;  %v12116_v21 = vpack.c.bf16 %v2161_v16, %v2160_v15  ;;  %v2163_v25 = vld [vmem:[%s15353_s27 + $0x78] sm:$0xff]  ;;  %v2126_v15 = vpop.permute.xlu0 %2125 }
 0x377   : > { %11624 = vmatmul.mubr.msk.f32.vlgmr.msra.gmra.mrb[10].mxu0 %vm1214_vm4, %v1682_v26  ;;  %11631 = vmatmul.mubr.msk.f32.vlgmr.msra.gmra.mrb[10].mxu1 %vm1214_vm4, %v1682_v26 }
 0x378   : > { %11635 = vmatprep.mubr.msk.f32.mxu0 %vm13106_vm0, %v13105_v4  ;;  %11640 = vmatprep.mubr.msk.f32.mxu1 %vm13106_vm0, %v13105_v4 }
 0x44a   : > { %v1752_v30 = vpop.f32.mrb[10].mxu0  ;;  %v1823_v33 = vpop.f32.mrb[10].mxu1 }
 0x44b   : > { %v11625_v39 = vpop.f32.mrb[11].mxu0  ;;  %v11632_v40 = vpop.f32.mrb[11].mxu1  ;;  %11634 = vmatpush3.msra.mxu0 %v1823_v33  ;;  %11639 = vmatpush3.msra.mxu1 %v1752_v30  ;;  %v2182_v30 = vld [vmem:[%s15353_s27 + $0x110] sm:$0xff]  ;;  %v2183_v33 = vld [vmem:[%s15353_s27 + $0x118] sm:$0xff] }
 0x44c   : > { %11636 = vmatmul.mubr.msk.f32.vlgmr.msra.gmra.mrb[12].mxu0 %vm1829_vm6, %v10960_v29  ;;  %12087 = vmatprep.subr.bf16.mxu0 %v13108_v41  ;;  %v12123_v29 = vpack.c.bf16 %v2181_v28, %v2180_v27  ;;  %v2186_v39 = vld [vmem:[%s15353_s27 + $0x130] sm:$0xff]  ;;  %v2187_v40 = vld [vmem:[%s15353_s27 + $0x138] sm:$0xff] }
 0x44d   : > { %11641 = vmatmul.mubr.msk.f32.vlgmr.msra.gmra.mrb[12].mxu1 %vm1829_vm6, %v1756_v34  ;;  %12089 = vmatpush3.bf16.msra.mxu0 %v13485_v56  ;;  %v2153_v56 = vld [vmem:[%s15353_s27 + $0x28] sm:$0xff]  ;;  %v12126_v34 = vpack.c.bf16 %v2183_v33, %v2182_v30  ;;  %v12132_v42 = vpack.c.bf16 %v2187_v40, %v2186_v39 }
 0x44e   : > { %11647 = vmatprep.mubr.msk.f32.mxu0 %vm13106_vm0, %v13105_v4  ;;  %12091 = vmatprep.subr.bf16.mxu0 %v12090_v35  ;;  %v2184_v35 = vld [vmem:[%s15353_s27 + $0x120] sm:$0xff] }
 0x44f   : > { %11650 = vmatprep.subr.mxu1 %v13105_v4  ;;  %11652 = vmatprep.mubr.msk.f32.mxu1 %vm13106_vm0, %v13105_v4  ;;  %v12129_v38 = vpack.c.bf16 %v2185_v36, %v2184_v35 }
 0x450   : > { %11648 = vmatmul.mubr.msk.f32.vlgmr.msra.gmra.mrb[14].mxu0 %vm1214_vm4, %v1682_v26  ;;  %v12120_v26 = vpack.c.bf16 %v2163_v25, %v2162_v24 }
 0x451   : > { %12093 = vmatpush3.bf16.msra.mxu0 %v12092_v45  ;;  %2252 = vmatprep.mubr.f32.mxu0 %v13330_v37  ;;  %v12100_v37 = vpack.c.bf16 %v2153_v56, %v2152_v55  ;;  %v10978_v45 = vld [vmem:[%s15354_s0 + $0x28] sm:$0xff]  ;;  %v10964_v56 = vld [vmem:[%s15262_s18 + $0x10] sm:$0xff] }
 0x452   : > { %12095 = vmatprep.subr.bf16.mxu0 %v12094_v48  ;;  %v13694_v48 = vpack.c.bf16 %v10978_v45, %v10977_v43  ;;  %v10980_v43 = vld [vmem:[%s15264_s20 + $0x10] sm:$0xff]  ;;  %v10986_v45 = vld [vmem:[%s15264_s20 + $0x18] sm:$0xff] }
 0x455   : > { %12097 = vmatpush3.bf16.msra.mxu0 %v12096_v53 }
 0x456   : > { %12099 = vmatprep.subr.bf16.mxu0 %v12098_v54 }
 0x459   : > { %12101 = vmatpush3.bf16.msra.mxu0 %v12100_v37 }
 0x45a   : > { %12103 = vmatprep.subr.bf16.mxu0 %v12102_v59 }
 0x45d   : > { %12105 = vmatpush3.bf16.msra.mxu0 %v12104_v0  ;;  %v10983_v0 = vld [vmem:[%s15354_s0 + $0x30] sm:$0xff] }
 0x45e   : > { %12107 = vmatprep.subr.bf16.mxu0 %v12106_v1  ;;  %v10984_v1 = vld [vmem:[%s15354_s0 + $0x38] sm:$0xff]  ;;  %s15305_s0 = smov 99  }
 0x461   : > { %12109 = vmatpush3.bf16.msra.mxu0 %v12108_v7  ;;  %v13726_v7 = vpack.c.bf16 %v10984_v1, %v10983_v0 }
 0x462   : > { %12111 = vmatprep.subr.bf16.mxu0 %v12110_v8 }
 0x465   : > { %12113 = vmatpush3.bf16.msra.mxu0 %v12112_v13 }
 0x466   : > { %12115 = vmatprep.subr.bf16.mxu0 %v12114_v14 }
 0x469   : > { %12117 = vmatpush3.bf16.msra.mxu0 %v12116_v21 }
 0x46a   : > { %12119 = vmatprep.subr.bf16.mxu0 %v12118_v23 }
 0x46d   : > { %12121 = vmatpush3.bf16.msra.mxu0 %v12120_v26 }
 0x46e   : > { %12122 = vmatprep.subr.bf16.mxu0 %v13108_v41 }
 0x470   : > { %2253 = vmatmul.mubr.f32.vlgmr.msra.gmra.mrb[16].mxu0 %v13309_v31 }
 0x471   : > { %12124 = vmatpush3.bf16.msra.mxu0 %v12123_v29  ;;  %11671 = vmatprep.mubr.msk.f32.mxu0 %vm13106_vm0, %v13105_v4 }
 0x472   : > { %12125 = vmatprep.subr.bf16.mxu0 %v13108_v41 }
 0x475   : > { %12127 = vmatpush3.bf16.msra.mxu0 %v12126_v34  ;;  %v10972_v34 = vld [vmem:[%s15264_s20 + $0x8] sm:$0xff] }
 0x476   : > { %12128 = vmatprep.subr.bf16.mxu0 %v13108_v41 }
 0x479   : > { %12130 = vmatpush3.bf16.msra.mxu0 %v12129_v38 }
 0x47a   : > { %12131 = vmatprep.subr.bf16.mxu0 %v13108_v41 }
 0x47d   : > { %12133 = vmatpush3.bf16.msra.mxu0 %v12132_v42 }
 0x47e   : > { %12140 = vmatprep.subr.bf16.mxu0 %v13108_v41 }
 0x480   : > { %11672 = vmatmul.mubr.msk.f32.vlgmr.msra.gmra.mrb[18].mxu0 %vm1026_vm3, %v13312_v32 }
 0x481   : > { %11702 = vmatprep.mubr.msk.f32.mxu0 %vm13106_vm0, %v13105_v4  ;;  %12142 = vmatpush3.bf16.msra.mxu0 %v13694_v48 }
 0x482   : > { %12143 = vmatprep.subr.bf16.mxu0 %v13108_v41 }
 0x51f   : > { %v1899_v49 = vpop.f32.mrb[12].mxu0 }
 0x520   : > { %v11637_v52 = vpop.f32.mrb[13].mxu0  ;;  %v1972_v53 = vpop.f32.mrb[12].mxu1 }
 0x521   : > { %v1973_v54 = vadd.f32 %v1972_v53, %v1899_v49  ;;  %v11642_v55 = vpop.f32.mrb[13].mxu1  ;;  %v10992_v49 = vld [vmem:[%s15264_s20 + $0x20] sm:$0xff] }
 0x523   : > { %v2042_v58 = vpop.f32.mrb[14].mxu0 }
 0x524   : > { %v11649_v37 = vpop.f32.mrb[15].mxu0  ;;  %11651 = vmatpush3.msra.mxu1 %v2042_v58 }
 0x525   : > { %11653 = vmatmul.mubr.msk.f32.vlgmr.msra.gmra.mrb[14].mxu1 %vm1829_vm6, %v10964_v56  ;;  %12134 = vmatprep.subr.bf16.mxu1 %v13108_v41 }
 0x526   : > { %12136 = vmatpush3.bf16.msra.mxu1 %v12135_v57  ;;  %11678 = vmatprep.mubr.msk.f32.mxu1 %vm13106_vm0, %v13105_v4 }
 0x527   : > { %12137 = vmatprep.subr.bf16.mxu1 %v13108_v41 }
 0x543   : > { %v11364_v59 = vpop.f32.mrb[16].mxu0 }
 0x544   : > { %v11365_v60 = vpop.f32.mrb[17].mxu0 }
 0x545   : > { %v11366_v61 = vadd.f32 %v11365_v60, %v11364_v59 }
 0x553   : > { %v2324_v2 = vpop.f32.mrb[18].mxu0 }
 0x554   : > { %v2325_v3 = vadd.f32 %v11366_v61, %v2324_v2  ;;  %v11673_v5 = vpop.f32.mrb[19].mxu0 }
 0x556   : > { %v2328_v8 = vmul.f32 0.0625, %v2325_v3 }
 0x558   : > { %11679 = vmatmul.mubr.msk.f32.vlgmr.msra.gmra.mrb[16].mxu1 %vm1214_vm4, %v2328_v8  ;;  %11703 = vmatmul.mubr.msk.f32.vlgmr.msra.gmra.mrb[20].mxu0 %vm1214_vm4, %v2328_v8 }
 0x559   : > { %12139 = vmatpush3.bf16.msra.mxu1 %v13724_v6  ;;  %12145 = vmatpush3.bf16.msra.mxu0 %v13726_v7 }
 0x55a   : > { %11685 = vmatprep.mubr.msk.f32.mxu1 %vm13106_vm0, %v13105_v4  ;;  %11714 = vmatprep.mubr.msk.f32.mxu0 %vm13106_vm0, %v13105_v4 }
 0x55b   : > { %12146 = vmatprep.subr.bf16.mxu0 %v13108_v41  ;;  %11688 = vmatprep.subr.mxu1 %v13105_v4 }
 0x55c   : > { %11686 = vmatmul.mubr.msk.f32.vlgmr.msra.gmra.mrb[18].mxu1 %vm1214_vm4, %v2328_v8  ;;  %11715 = vmatmul.mubr.msk.f32.vlgmr.msra.gmra.mrb[22].mxu0 %vm1214_vm4, %v2328_v8 }
 0x55d   : > { %12148 = vmatpush3.bf16.msra.mxu0 %v13738_v11  ;;  %11726 = vmatprep.mubr.msk.f32.mxu0 %vm13106_vm0, %v13105_v4 }
 0x55e   : > { %11690 = vmatprep.mubr.msk.f32.mxu1 %vm13106_vm0, %v13105_v4  ;;  %12149 = vmatprep.subr.bf16.mxu0 %v13108_v41 }
 0x560   : > { %11727 = vmatmul.mubr.msk.f32.vlgmr.msra.gmra.mrb[24].mxu0 %vm1214_vm4, %v2328_v8 }
 0x561   : > { %12151 = vmatpush3.bf16.msra.mxu0 %v12135_v57  ;;  %11738 = vmatprep.mubr.msk.f32.mxu0 %vm13106_vm0, %v13105_v4 }
 0x562   : > { %11748 = vmatprep.subr.mxu0 %v13105_v4 }
 0x5f8   : > { %v2117_v12 = vpop.f32.mrb[14].mxu1 }
 0x5f9   : > { %v2121_v13 = vadd.f32 %v2117_v12, %v1973_v54  ;;  %v11654_v14 = vpop.f32.mrb[15].mxu1  ;;  %v3092_v12 = vpop.permute.xlu1 %3091 }
 0x5fb   : > { %v2128_v16 = vadd.f32 %v2126_v15, %v2121_v13 }
 0x5fd   : > { %v2130_v19 = vmin.f32 %v2128_v16, 0.0  ;;  %vm2129_vm7 = vcmp.gt.f32.partialorder %v2128_v16, 0.0 }
 0x5ff   : > { %v2131_v20 = vmul.f32 1.442695, %v2130_v19 }
 0x601   : > { %13042 = vpow2.f32 %v2131_v20 }
 0x60b   : > { %v13043_v21 = vpop.eup %13042 }
 0x60c   : > { %v10966_v23 = vadd.f32 -1.0, %v13043_v21 }
 0x60e   : > { %v2134_v24 = vmul.f32 1.6732632, %v10966_v23 }
 0x610   : > { %v2135_v25 = vsel %vm2129_vm7, %v2128_v16, %v2134_v24  ;;  %vm4175_vm7 = vcmask 818176  }
 0x611   : > { %v2136_v26 = vmul.f32 1.050701, %v2135_v25  ;;  %v10998_v25 = vld [vmem:[%s15266_s22 + $0x8] sm:$0xff] }
 0x613   : > { %v2137_v27 = vsel %vm1214_vm4, %v2136_v26, -inf }
 0x614   : > { %2138 = vmax.xlane.f32.xlu0 %v2137_v27 }
 0x62a   : > { %837 = vrot.lane.b32.xlu0 %v13309_v31, %s15280_s7  ;;  %v2404_v31 = vld [vmem:[%s15264_s20] sm:$0xff] }
 0x62b   : > { %v2400_v28 = vpop.f32.mrb[16].mxu1  ;;  %v2701_v29 = vpop.f32.mrb[20].mxu0 }
 0x62c   : > { %v11680_v30 = vpop.f32.mrb[17].mxu1  ;;  %v11704_v33 = vpop.f32.mrb[21].mxu0 }
 0x62d   : > { %v3860_v33 = vld [vmem:[%s15355_s8 + $0x8] sm:$0xff] }
 0x62f   : > { %v2474_v35 = vpop.f32.mrb[18].mxu1  ;;  %v2853_v36 = vpop.f32.mrb[22].mxu0 }
 0x630   : > { %v11687_v38 = vpop.f32.mrb[19].mxu1  ;;  %11689 = vmatpush3.msk.msra.mxu1 %vm873_vm1, %v2474_v35  ;;  %v11716_v39 = vpop.f32.mrb[23].mxu0  ;;  %v3859_v35 = vld [vmem:[%s15355_s8] sm:$0xff] }
 0x631   : > { %11691 = vmatmul.mubr.msk.f32.vlgmr.msra.gmra.mrb[20].mxu1 %vm869_vm2, %v10972_v34  ;;  %11693 = vmatprep.subr.mxu1 %v13105_v4  ;;  %v3863_v34 = vld [vmem:[%s15355_s8 + $0x20] sm:$0xff] }
 0x632   : > { %11694 = vmatpush3.msk.msra.mxu1 %vm873_vm1, %v2400_v28  ;;  %11695 = vmatprep.mubr.msk.f32.mxu1 %vm13106_vm0, %v13105_v4 }
 0x633   : > { %v3005_v40 = vpop.f32.mrb[24].mxu0  ;;  %11705 = vmatprep.subr.mxu1 %v13105_v4 }
 0x634   : > { %v11728_v42 = vpop.f32.mrb[25].mxu0 }
 0x635   : > { %11696 = vmatmul.mubr.msk.f32.vlgmr.msra.gmra.mrb[22].mxu1 %vm869_vm2, %v2404_v31 }
 0x636   : > { %11706 = vmatpush3.msk.msra.mxu1 %vm873_vm1, %v2701_v29  ;;  %11707 = vmatprep.mubr.msk.f32.mxu1 %vm13106_vm0, %v13105_v4 }
 0x637   : > { %11717 = vmatprep.subr.mxu1 %v13105_v4 }
 0x639   : > { %11708 = vmatmul.mubr.msk.f32.vlgmr.msra.gmra.mrb[24].mxu1 %vm869_vm2, %v10980_v43 }
 0x63a   : > { %11718 = vmatpush3.msk.msra.mxu1 %vm873_vm1, %v2853_v36  ;;  %11719 = vmatprep.mubr.msk.f32.mxu1 %vm13106_vm0, %v13105_v4  ;;  %v3862_v36 = vld [vmem:[%s15355_s8 + $0x18] sm:$0xff] }
 0x63b   : > { %11729 = vmatprep.subr.mxu1 %v13105_v4 }
 0x63d   : > { %11720 = vmatmul.mubr.msk.f32.vlgmr.msra.gmra.mrb[26].mxu1 %vm869_vm2, %v10986_v45  ;;  %v11002_v45 = vld [vmem:[%s15266_s22 + $0x10] sm:$0xff] }
 0x63e   : > { %11730 = vmatpush3.msk.msra.mxu1 %vm873_vm1, %v3005_v40  ;;  %11731 = vmatprep.mubr.msk.f32.mxu1 %vm13106_vm0, %v13105_v4 }
 0x63f   : > { %12152 = vmatprep.subr.bf16.mxu1 %v13108_v41 }
 0x641   : > { %11732 = vmatmul.mubr.msk.f32.vlgmr.msra.gmra.mrb[28].mxu1 %vm869_vm2, %v10992_v49 }
 0x642   : > { %12154 = vmatpush3.bf16.msra.mxu1 %v13724_v6  ;;  %11745 = vmatprep.mubr.msk.f32.mxu1 %vm13106_vm0, %v13105_v4 }
 0x643   : > { %11753 = vmatprep.subr.mxu1 %v13105_v4 }
 0x6a1   : > { %v2139_v50 = vpop.xlane.xlu0 %2138 }
 0x6a2   : > { %v2140_v51 = vsub.f32 %v2136_v26, %v2139_v50  ;;  %v3176_v26 = vld [vmem:[%s15266_s22] sm:$0xff] }
 0x6a4   : > { %v2141_v52 = vmul.f32 1.442695, %v2140_v51  ;;  %v11005_v51 = vld [vmem:[%s15266_s22 + $0x18] sm:$0xff] }
 0x6a5   : > { %v13808_v53 = vpop.permute.xlu0 %837 }
 0x6a6   : > { %13044 = vpow2.f32 %v2141_v52  ;;  %v841_v54 = vrot.slane %v13808_v53, 4 }
 0x6a8   : > { %v843_v55 = vsel %vm842_vm9, %v841_v54, %v13808_v53 }
 0x6a9   : > { %850 = vst.msk [vmem:[#allocation2] sm:$0xff] %vm849_vm12, %v843_v55  ;;  %v3861_v55 = vld [vmem:[%s15355_s8 + $0x10] sm:$0xff]  ;;  %vm4903_vm12 = vcmask 654336  }
 0x6b0   : > { %v13815_v56 = vpop.eup %13044  ;;  %v13819_v58 = vld [vmem:[#allocation2] sm:$0xff] }
 0x6b1   : > { %v2143_v57 = vsel %vm1214_vm4, %v13815_v56, 0.0  ;;  %v13823_v37 = vcombine.high %v13819_v58, %v13819_v58 }
 0x6b2   : > { %2144 = vadd.xlane.f32.xlu0 %v2143_v57 }
 0x6c8   : > { %4171 = vrot.lane.b32.xlu0 %v13823_v37, %s15276_s4 }
 0x6cc   : > { %4169 = vrot.lane.b32.xlu0 %v13819_v58, %s15276_s4  ;;  %s15285_s4 = smov 80  }
 0x704   : > { %v2552_v59 = vpop.f32.mrb[20].mxu1 }
 0x705   : > { %v11692_v60 = vpop.f32.mrb[21].mxu1 }
 0x708   : > { %v2628_v61 = vpop.f32.mrb[22].mxu1 }
 0x709   : > { %v2629_v62 = vadd.f32 %v2628_v61, %v2552_v59  ;;  %v11697_v63 = vpop.f32.mrb[23].mxu1  ;;  %v11008_v59 = vld [vmem:[%s15266_s22 + $0x20] sm:$0xff] }
 0x70c   : > { %v2779_v0 = vpop.f32.mrb[24].mxu1 }
 0x70d   : > { %v2783_v1 = vadd.f32 %v2779_v0, %v2629_v62  ;;  %v11709_v2 = vpop.f32.mrb[25].mxu1 }
 0x710   : > { %v2931_v3 = vpop.f32.mrb[26].mxu1 }
 0x711   : > { %v2935_v5 = vadd.f32 %v2931_v3, %v2783_v1  ;;  %v11721_v6 = vpop.f32.mrb[27].mxu1 }
 0x714   : > { %v3083_v8 = vpop.f32.mrb[28].mxu1 }
 0x715   : > { %v3087_v9 = vadd.f32 %v3083_v8, %v2935_v5  ;;  %v11733_v10 = vpop.f32.mrb[29].mxu1 }
 0x717   : > { %v3094_v13 = vadd.f32 %v3092_v12, %v3087_v9 }
 0x719   : > { %v3096_v14 = vmin.f32 %v3094_v13, 0.0  ;;  %vm3095_vm13 = vcmp.gt.f32.partialorder %v3094_v13, 0.0 }
 0x71b   : > { %v3097_v15 = vmul.f32 1.442695, %v3096_v14 }
 0x71d   : > { %13046 = vpow2.f32 %v3097_v15 }
 0x727   : > { %v13047_v16 = vpop.eup %13046 }
 0x728   : > { %v10995_v19 = vadd.f32 -1.0, %v13047_v16 }
 0x72a   : > { %v3100_v20 = vmul.f32 1.6732632, %v10995_v19 }
 0x72c   : > { %v3101_v21 = vsel %vm3095_vm13, %v3094_v13, %v3100_v20  ;;  %v3837_v13 = vpop.permute.xlu1 %3836  ;;  %vm5090_vm13 = vcmask 646144  }
 0x72d   : > { %v3102_v23 = vmul.f32 1.050701, %v3101_v21 }
 0x72f   : > { %11739 = vmatmul.mubr.msk.f32.vlgmr.msra.gmra.mrb[26].mxu0 %vm1214_vm4, %v3102_v23  ;;  %11746 = vmatmul.mubr.msk.f32.vlgmr.msra.gmra.mrb[30].mxu1 %vm1214_vm4, %v3102_v23 }
 0x730   : > { %11750 = vmatprep.mubr.msk.f32.mxu0 %vm13106_vm0, %v13105_v4  ;;  %11755 = vmatprep.mubr.msk.f32.mxu1 %vm13106_vm0, %v13105_v4 }
 0x73f   : > { %v2145_v24 = vpop.xlane.xlu0 %2144 }
 0x740   : > { %13048 = vrcp.f32 %v2145_v24 }
 0x74a   : > { %v13049_v38 = vpop.eup %13048 }
 0x74b   : > { %v2147_v39 = vmul.f32 %v13049_v38, %v13815_v56  ;;  %v3864_v56 = vld [vmem:[%s15355_s8 + $0x28] sm:$0xff]  ;;  %s13129_s8 = smov 58  }
 0x74c   : > { %v12169_v60 = vpack.c.bf16 %v3864_v56, %v3861_v55 }
 0x802   : > { %v3172_v27 = vpop.f32.mrb[26].mxu0  ;;  %v3243_v28 = vpop.f32.mrb[30].mxu1 }
 0x803   : > { %v11740_v29 = vpop.f32.mrb[27].mxu0  ;;  %v11747_v30 = vpop.f32.mrb[31].mxu1  ;;  %11749 = vmatpush3.msra.mxu0 %v3243_v28  ;;  %11754 = vmatpush3.msra.mxu1 %v3172_v27  ;;  %v4010_v27 = vld [vmem:[%s15356_s28 + $0x8] sm:$0xff]  ;;  %v4013_v28 = vld [vmem:[%s15356_s28 + $0x20] sm:$0xff] }
 0x804   : > { %11751 = vmatmul.mubr.msk.f32.vlgmr.msra.gmra.mrb[28].mxu0 %vm1829_vm6, %v10998_v25  ;;  %11756 = vmatmul.mubr.msk.f32.vlgmr.msra.gmra.mrb[32].mxu1 %vm1829_vm6, %v3176_v26  ;;  %v4011_v29 = vld [vmem:[%s15356_s28 + $0x10] sm:$0xff]  ;;  %v12171_v30 = vpack.c.bf16 %v4013_v28, %v4010_v27 }
 0x805   : > { %12155 = vmatprep.subr.bf16.mxu0 %v13108_v41  ;;  %11762 = vmatprep.mubr.msk.f32.mxu0 %vm13106_vm0, %v13105_v4 }
 0x806   : > { %12157 = vmatpush3.bf16.msra.mxu0 %v13694_v48  ;;  %11765 = vmatprep.subr.mxu1 %v13105_v4  ;;  %v12164_v48 = vpack.c.bf16 %v3863_v34, %v3860_v33  ;;  %v4009_v34 = vld [vmem:[%s15356_s28] sm:$0xff] }
 0x807   : > { %12158 = vmatprep.subr.bf16.mxu0 %v13108_v41  ;;  %11767 = vmatprep.mubr.msk.f32.mxu1 %vm13106_vm0, %v13105_v4 }
 0x809   : > { %11763 = vmatmul.mubr.msk.f32.vlgmr.msra.gmra.mrb[30].mxu0 %vm1214_vm4, %v3102_v23 }
 0x80a   : > { %12160 = vmatpush3.bf16.msra.mxu0 %v13726_v7  ;;  %11774 = vmatprep.mubr.msk.f32.mxu0 %vm13106_vm0, %v13105_v4  ;;  %v12166_v7 = vpack.c.bf16 %v3862_v36, %v3859_v35 }
 0x80b   : > { %12161 = vmatprep.subr.bf16.mxu0 %v13108_v41 }
 0x80d   : > { %11775 = vmatmul.mubr.msk.f32.vlgmr.msra.gmra.mrb[32].mxu0 %vm1214_vm4, %v3102_v23 }
 0x80e   : > { %12163 = vmatpush3.bf16.msra.mxu0 %v13738_v11  ;;  %11786 = vmatprep.mubr.msk.f32.mxu0 %vm13106_vm0, %v13105_v4 }
 0x80f   : > { %12165 = vmatprep.subr.bf16.mxu0 %v12164_v48  ;;  %v4012_v48 = vld [vmem:[%s15356_s28 + $0x18] sm:$0xff] }
 0x810   : > { %v12173_v36 = vpack.c.bf16 %v4012_v48, %v4009_v34 }
 0x811   : > { %11787 = vmatmul.mubr.msk.f32.vlgmr.msra.gmra.mrb[34].mxu0 %vm1214_vm4, %v3102_v23 }
 0x812   : > { %12167 = vmatpush1.bf16.msra.mxu0 %v12166_v7  ;;  %3932 = vmatprep.mubr.f32.mxu0 %v13105_v4 }
 0x813   : > { %12172 = vmatprep.subr.bf16.mxu0 %v12171_v30 }
 0x815   : > { %11011 = vmatmul.mubr.msk.f32.vlgmr.msra.gmra.mrb[36].mxu0 %vm1214_vm4, %v2147_v39 }
 0x816   : > { %4082 = vmatprep.mubr.f32.mxu0 %v13105_v4  ;;  %12174 = vmatpush1.bf16.msra.mxu0 %v12173_v36  ;;  %v11041_v36 = vld [vmem:[%s15256_s12 + $0x38] sm:$0xff] }
 0x8d7   : > { %v3318_v31 = vpop.f32.mrb[28].mxu0  ;;  %v3391_v40 = vpop.f32.mrb[32].mxu1 }
 0x8d8   : > { %v3392_v11 = vadd.f32 %v3391_v40, %v3318_v31  ;;  %v11752_v42 = vpop.f32.mrb[29].mxu0  ;;  %v11757_v43 = vpop.f32.mrb[33].mxu1 }
 0x8d9   : > { %v5836_v43 = vld [vmem:[%s15257_s13] sm:$0xff] }
 0x8dc   : > { %v3461_v49 = vpop.f32.mrb[30].mxu0 }
 0x8dd   : > { %v11764_v50 = vpop.f32.mrb[31].mxu0  ;;  %11766 = vmatpush3.msra.mxu1 %v3461_v49 }
 0x8de   : > { %11768 = vmatmul.mubr.msk.f32.vlgmr.msra.gmra.mrb[34].mxu1 %vm1829_vm6, %v11002_v45  ;;  %11777 = vmatprep.subr.mxu1 %v13105_v4 }
 0x8df   : > { %11779 = vmatprep.mubr.msk.f32.mxu1 %vm13106_vm0, %v13105_v4 }
 0x8e0   : > { %v3607_v52 = vpop.f32.mrb[32].mxu0 }
 0x8e1   : > { %v11776_v57 = vpop.f32.mrb[33].mxu0  ;;  %11778 = vmatpush3.msra.mxu1 %v3607_v52 }
 0x8e2   : > { %11780 = vmatmul.mubr.msk.f32.vlgmr.msra.gmra.mrb[36].mxu1 %vm1829_vm6, %v11005_v51  ;;  %11789 = vmatprep.subr.mxu1 %v13105_v4 }
 0x8e3   : > { %11791 = vmatprep.mubr.msk.f32.mxu1 %vm13106_vm0, %v13105_v4 }
 0x8e4   : > { %v3753_v61 = vpop.f32.mrb[34].mxu0 }
 0x8e5   : > { %v11788_v62 = vpop.f32.mrb[35].mxu0  ;;  %11790 = vmatpush3.msra.mxu1 %v3753_v61 }
 0x8e6   : > { %11792 = vmatmul.mubr.msk.f32.vlgmr.msra.gmra.mrb[38].mxu1 %vm1829_vm6, %v11008_v59  ;;  %12168 = vmatprep.subr.bf16.mxu1 %v13108_v41  ;;  %vm851_vm6 = vcmask 912384  }
 0x8e7   : > { %12170 = vmatpush3.bf16.msra.mxu1 %v12169_v60  ;;  %11798 = vmatprep.mubr.msk.f32.mxu1 %vm13106_vm0, %v13105_v4 }
 0x8e8   : > { %v13904_v63 = vpop.f32.mrb[36].mxu0  ;;  %12175 = vmatprep.subr.bf16.mxu1 %v13108_v41 }
 0x8e9   : > { %v13907_v0 = vpop.f32.mrb[37].mxu0 }
 0x8ea   : > { %11799 = vmatmul.mubr.msk.f32.vlgmr.msra.gmra.mrb[40].mxu1 %vm1214_vm4, %v2147_v39 }
 0x8eb   : > { %11805 = vmatprep.mubr.msk.f32.mxu1 %vm13106_vm0, %v13105_v4  ;;  %vm832_vm0 = vcmask 261124  }
 0x8ec   : > { %vm833_vm5 = vmor %vm832_vm0, %vm831_vm15  ;;  %vm5471_vm15 = vcmask 490496   ;;  %vm5662_vm0 = vcmask 482304  }
 0x8ed   : > { %834 = vst.msk [vmem:[#allocation2 + $0x8] sm:$0xff] %vm833_vm5, %v13105_v4 }
 0x9b1   : > { %v3536_v1 = vpop.f32.mrb[34].mxu1 }
 0x9b2   : > { %v3540_v2 = vadd.f32 %v3536_v1, %v3392_v11  ;;  %v11769_v3 = vpop.f32.mrb[35].mxu1 }
 0x9b5   : > { %v3682_v5 = vpop.f32.mrb[36].mxu1 }
 0x9b6   : > { %v3686_v6 = vadd.f32 %v3682_v5, %v3540_v2  ;;  %v11781_v8 = vpop.f32.mrb[37].mxu1 }
 0x9b7   : > { %v11015_v8 = vld [vmem:[%s15256_s12 + $0x10] sm:$0xff] }
 0x9b9   : > { %v3828_v9 = vpop.f32.mrb[38].mxu1 }
 0x9ba   : > { %v3832_v10 = vadd.f32 %v3828_v9, %v3686_v6  ;;  %v11793_v12 = vpop.f32.mrb[39].mxu1 }
 0x9bc   : > { %v3839_v14 = vadd.f32 %v3837_v13, %v3832_v10  ;;  %v11016_v10 = vld [vmem:[%s15256_s12 + $0x18] sm:$0xff] }
 0x9bd   : > { %v13912_v15 = vpop.f32.mrb[40].mxu1 }
 0x9be   : > { %v3841_v41 = vmin.f32 %v3839_v14, 0.0  ;;  %v11800_v16 = vpop.f32.mrb[41].mxu1  ;;  %vm3840_vm14 = vcmp.gt.f32.partialorder %v3839_v14, 0.0 }
 0x9c0   : > { %v3842_v19 = vmul.f32 1.442695, %v3841_v41  ;;  %v4161_v41 = vld [vmem:[%s15256_s12] sm:$0xff] }
 0x9c2   : > { %13050 = vpow2.f32 %v3842_v19 }
 0x9cc   : > { %v13051_v20 = vpop.eup %13050 }
 0x9cd   : > { %v11010_v21 = vadd.f32 -1.0, %v13051_v20 }
 0x9cf   : > { %v3845_v23 = vmul.f32 1.6732632, %v11010_v21  ;;  %v4162_v21 = vld [vmem:[%s15256_s12 + $0x8] sm:$0xff] }
 0x9d1   : > { %v3846_v24 = vsel %vm3840_vm14, %v3839_v14, %v3845_v23  ;;  %vm5280_vm14 = vcmask 498688  }
 0x9d2   : > { %v3847_v25 = vmul.f32 1.050701, %v3846_v24 }
 0x9d4   : > { %v3848_v26 = vsel %vm1214_vm4, %v3847_v25, -inf }
 0x9d5   : > { %3849 = vmax.xlane.f32.xlu1 %v3848_v26 }
 0x9e6   : > { %839 = vrot.lane.b32.xlu1 %v13312_v32, %s15280_s7  ;;  %v4014_v32 = vld [vmem:[%s15356_s28 + $0x28] sm:$0xff]  ;;  %s15299_s7 = smov 81  }
 0x9e7   : > { %v12176_v33 = vpack.c.bf16 %v4014_v32, %v4011_v29  ;;  %v11032_v29 = vld [vmem:[%s15256_s12 + $0x28] sm:$0xff] }
 0x9e9   : > { %12177 = vmatpush3.bf16.msra.mxu1 %v12176_v33  ;;  %v11040_v33 = vld [vmem:[%s15256_s12 + $0x30] sm:$0xff] }
 0xa62   : > { %v3850_v35 = vpop.xlane.xlu1 %3849 }
 0xa63   : > { %v3851_v53 = vsub.f32 %v3847_v25, %v3850_v35  ;;  %v11031_v25 = vld [vmem:[%s15256_s12 + $0x20] sm:$0xff] }
 0xa66   : > { %v840_v7 = vpop.permute.xlu1 %839 }
 0xa67   : > { %v844_v38 = vsel %vm842_vm9, %v841_v54, %v840_v7  ;;  %v3852_v54 = vmul.f32 1.442695, %v3851_v53 }
 0xa68   : > { %852 = vst.msk [vmem:[#allocation2 + $0x8] sm:$0xf] %vm851_vm6, %v844_v38 }
 0xa69   : > { %13052 = vpow2.f32 %v3852_v54 }
 0xa6f   : > { %v4160_v39 = vld [vmem:[#allocation2 + $0x8] sm:$0xf] }
 0xa70   : > { %4346 = vrot.lane.b32.xlu0 %v4160_v39, %s15309_s1  ;;  %4173 = vrot.lane.b32.xlu1 %v4160_v39, %s15357_s3  ;;  %v4703_v31 = vld [vmem:[#allocation2 + $0x8] sm:$0xf] }
 0xa71   : > { %v5077_v40 = vld [vmem:[#allocation2 + $0x8] sm:$0xf] }
 0xa72   : > { %v4516_v45 = vld [vmem:[#allocation2 + $0x8] sm:$0xf] }
 0xa73   : > { %v13053_v11 = vpop.eup %13052  ;;  %v4890_v49 = vld [vmem:[#allocation2 + $0x8] sm:$0xf] }
 0xa74   : > { %4525 = vrot.lane.b32.xlu0 %v13823_v37, %s15305_s0  ;;  %v3854_v42 = vsel %vm1214_vm4, %v13053_v11, 0.0  ;;  %v5264_v50 = vld [vmem:[#allocation2 + $0x8] sm:$0xff] }
 0xa75   : > { %v5271_v51 = vcombine.high %v5264_v50, %v5264_v50 }
 0xa78   : > { %4523 = vrot.lane.b32.xlu0 %v13819_v58, %s15305_s0 }
 0xa7c   : > { %4714 = vrot.lane.b32.xlu0 %v4703_v31, %s15299_s7  ;;  %v11049_v31 = vld [vmem:[%s15256_s12 + $0x40] sm:$0xff] }
 0xa80   : > { %4899 = vrot.lane.b32.xlu0 %v13823_v37, %s15285_s4 }
 0xa84   : > { %4897 = vrot.lane.b32.xlu0 %v13819_v58, %s15285_s4 }
 0xa88   : > { %5088 = vrot.lane.b32.xlu0 %v5077_v40, %s15283_s9  ;;  %s15358_s9 = smov 79  }
 0xa8c   : > { %5274 = vrot.lane.b32.xlu0 %v13823_v37, %s15291_s5 }
 0xa90   : > { %5272 = vrot.lane.b32.xlu0 %v13819_v58, %s15291_s5 }
 0xa94   : > { %5465 = vrot.lane.b32.xlu0 %v13823_v37, %s15289_s6  ;;  %3855 = vadd.xlane.f32.xlu1 %v3854_v42 }
 0xa98   : > { %5463 = vrot.lane.b32.xlu0 %v13819_v58, %s15289_s6 }
 0xa9c   : > { %5656 = vrot.lane.b32.xlu0 %v13823_v37, %s15287_s30 }
 0xaa0   : > { %5654 = vrot.lane.b32.xlu0 %v13819_v58, %s15287_s30 }
 0xaa4   : > { %5840 = vperm.xlu0 %12611, %v5836_v43   ;;  %v11058_v43 = vld [vmem:[%s15256_s12 + $0x50] sm:$0xff] }
 0xaa5   : > { %4344 = vrot.lane.b32.xlu1 %v13823_v37, %s15309_s1 }
 0xaa9   : > { %4342 = vrot.lane.b32.xlu1 %v13819_v58, %s15309_s1 }
 0xaad   : > { %4527 = vrot.lane.b32.xlu1 %v4516_v45, %s15305_s0 }
 0xab1   : > { %4712 = vrot.lane.b32.xlu1 %v13823_v37, %s15299_s7 }
 0xab5   : > { %4710 = vrot.lane.b32.xlu1 %v13819_v58, %s15299_s7 }
 0xab9   : > { %4901 = vrot.lane.b32.xlu1 %v4890_v49, %s15285_s4  ;;  %s15359_s4 = smov 48  }
 0xabd   : > { %5086 = vrot.lane.b32.xlu1 %v13823_v37, %s15358_s9  ;;  %v5837_v37 = vld [vmem:[%s15257_s13 + $0x8] sm:$0xff] }
 0xac1   : > { %5084 = vrot.lane.b32.xlu1 %v13819_v58, %s15358_s9  ;;  %v4172_v58 = vpop.permute.xlu0 %4171 }
 0xac5   : > { %5276 = vrot.lane.b32.xlu1 %v5264_v50, %s15291_s5  ;;  %v4170_v56 = vpop.permute.xlu0 %4169 }
 0xac6   : > { %v4176_v6 = vsel %vm4175_vm7, %v4170_v56, %v4172_v58 }
 0xac9   : > { %5278 = vrot.lane.b32.xlu1 %v5271_v51, %s15291_s5  ;;  %s15313_s5 = smov 119  }
 0xacd   : > { %5467 = vrot.lane.b32.xlu1 %v5264_v50, %s15289_s6 }
 0xad1   : > { %5469 = vrot.lane.b32.xlu1 %v5271_v51, %s15289_s6  ;;  %s15295_s6 = smov 121  }
 0xad5   : > { %5658 = vrot.lane.b32.xlu1 %v5264_v50, %s15287_s30 }
 0xad9   : > { %5660 = vrot.lane.b32.xlu1 %v5271_v51, %s15287_s30  ;;  %s15297_s30 = smov 120  }
 0xadd   : > { %5845 = vperm.xlu1 %12612, %v5837_v37   ;;  %v11059_v37 = vld [vmem:[%s15256_s12 + $0x58] sm:$0xff] }
 0xae2   : > { %v4174_v52 = vpop.permute.xlu1 %4173  ;;  %v4347_v57 = vpop.permute.xlu0 %4346 }
 0xae3   : > { %11808 = vmatprep.subr.msk.mxu1 %vm873_vm1, %v4174_v52  ;;  %v4177_v55 = vsel %vm4175_vm7, %v4172_v58, %v4174_v52 }
 0xae4   : > { %11017 = vmatprep.subr.msk.mxu0 %vm873_vm1, %v4177_v55  ;;  %v11067_v55 = vld [vmem:[%s15256_s12 + $0x60] sm:$0xff] }
 0xae6   : > { %v4526_v61 = vpop.permute.xlu0 %4525 }
 0xaea   : > { %v4524_v2 = vpop.permute.xlu0 %4523 }
 0xaeb   : > { %v4530_v24 = vsel %vm4529_vm10, %v4524_v2, %v4526_v61  ;;  %v11076_v2 = vld [vmem:[%s15256_s12 + $0x70] sm:$0xff] }
 0xaee   : > { %v4715_v13 = vpop.permute.xlu0 %4714 }
 0xaf2   : > { %v4900_v20 = vpop.permute.xlu0 %4899 }
 0xaf6   : > { %v4898_v28 = vpop.permute.xlu0 %4897 }
 0xaf7   : > { %v4904_v39 = vsel %vm4903_vm12, %v4898_v28, %v4900_v20 }
 0xafa   : > { %v5089_v34 = vpop.permute.xlu0 %5088 }
 0xafe   : > { %v5275_v38 = vpop.permute.xlu0 %5274 }
 0xb02   : > { %v5273_v40 = vpop.permute.xlu0 %5272 }
 0xb03   : > { %v5281_v58 = vsel %vm5280_vm14, %v5273_v40, %v5275_v38 }
 0xb06   : > { %v5466_v51 = vpop.permute.xlu0 %5465 }
 0xb0a   : > { %v5464_v56 = vpop.permute.xlu0 %5463 }
 0xb21   : > { %v3856_v59 = vpop.xlane.xlu1 %3855 }
 0xb22   : > { %13054 = vrcp.f32 %v3856_v59 }
 0xb25   : > { %v4345_v60 = vpop.permute.xlu1 %4344 }
 0xb26   : > { %v4350_v9 = vsel %vm4348_vm8, %v4345_v60, %v4347_v57 }
 0xb29   : > { %v4343_v62 = vpop.permute.xlu1 %4342 }
 0xb2a   : > { %v4349_v14 = vsel %vm4348_vm8, %v4343_v62, %v4345_v60  ;;  %v11068_v60 = vld [vmem:[%s15256_s12 + $0x68] sm:$0xff]  ;;  %v5657_v62 = vpop.permute.xlu0 %5656 }
 0xb2c   : > { %v13055_v1 = vpop.eup %13054 }
 0xb2d   : > { %v4528_v3 = vpop.permute.xlu1 %4527  ;;  %v3858_v5 = vmul.f32 %v13055_v1, %v13053_v11  ;;  %v11050_v11 = vld [vmem:[%s15256_s12 + $0x48] sm:$0xff]  ;;  %v5472_v1 = vsel %vm5471_vm15, %v5464_v56, %v5466_v51 }
 0xb2e   : > { %v4531_v16 = vsel %vm4529_vm10, %v4526_v61, %v4528_v3 }
 0xb2f   : > { %11013 = vmatmul.mubr.msk.f32.vlgmr.msra.gmra.mrb[38].mxu0 %vm1214_vm4, %v3858_v5  ;;  %11806 = vmatmul.mubr.msk.f32.vlgmr.msra.gmra.mrb[42].mxu1 %vm1214_vm4, %v3858_v5 }
 0xb30   : > { %11018 = vmatpush1.msk.msra.mxu0 %vm873_vm1, %v4176_v6  ;;  %11809 = vmatpush3.msk.msra.mxu1 %vm873_vm1, %v4174_v52  ;;  %v5655_v6 = vpop.permute.xlu0 %5654 }
 0xb31   : > { %11024 = vmatprep.subr.msk.mxu0 %vm873_vm1, %v4350_v9  ;;  %11813 = vmatprep.subr.msk.mxu1 %vm873_vm1, %v4347_v57  ;;  %v4713_v12 = vpop.permute.xlu1 %4712  ;;  %v11085_v9 = vld [vmem:[%s15256_s12 + $0x80] sm:$0xff] }
 0xb32   : > { %4254 = vmatprep.mubr.f32.mxu0 %v13105_v4  ;;  %11810 = vmatprep.mubr.msk.f32.mxu1 %vm869_vm2, %v11015_v8  ;;  %v4718_v26 = vsel %vm4716_vm11, %v4713_v12, %v4715_v13 }
 0xb33   : > { %11019 = vmatmul.mubr.msk.f32.vlgmr.msra.gmra.mrb[40].mxu0 %vm869_vm2, %v11015_v8  ;;  %11811 = vmatmul.mubr.msk.f32.vlgmr.msra.gmra.mrb[44].mxu1 %vm869_vm2, %v11016_v10  ;;  %v11077_v8 = vld [vmem:[%s15256_s12 + $0x78] sm:$0xff] }
 0xb34   : > { %11025 = vmatpush1.msk.msra.mxu0 %vm873_vm1, %v4349_v14  ;;  %11814 = vmatpush3.msk.msra.mxu1 %vm873_vm1, %v4347_v57 }
 0xb35   : > { %11033 = vmatprep.subr.msk.mxu0 %vm873_vm1, %v4531_v16  ;;  %11818 = vmatprep.subr.msk.mxu1 %vm873_vm1, %v4528_v3  ;;  %v4711_v19 = vpop.permute.xlu1 %4710 }
 0xb36   : > { %4260 = vmatprep.mubr.f32.mxu0 %v13105_v4  ;;  %11815 = vmatprep.mubr.msk.f32.mxu1 %vm869_vm2, %v4161_v41  ;;  %v4717_v32 = vsel %vm4716_vm11, %v4711_v19, %v4713_v12  ;;  %v11086_v12 = vld [vmem:[%s15256_s12 + $0x88] sm:$0xff]  ;;  %v5841_v19 = vpop.permute.xlu0 %5840 }
 0xb37   : > { %11020 = vmatmul.mubr.msk.f32.gmra.mrb[42].mxu0 %vm869_vm2, %v11016_v10  ;;  %v5663_v10 = vsel %vm5662_vm0, %v5655_v6, %v5657_v62 }
 0xb38   : > { %4427 = vmatprep.mubr.f32.mxu0 %v13105_v4 }
 0xb39   : > { %v4902_v23 = vpop.permute.xlu1 %4901 }
 0xb3a   : > { %v4905_v48 = vsel %vm4903_vm12, %v4900_v20, %v4902_v23 }
 0xb3b   : > { %11026 = vmatmul.mubr.msk.f32.vlgmr.msra.gmra.mrb[40].mxu0 %vm869_vm2, %v4161_v41  ;;  %11816 = vmatmul.mubr.msk.f32.vlgmr.msra.gmra.mrb[44].mxu1 %vm869_vm2, %v4162_v21 }
 0xb3c   : > { %11034 = vmatpush1.msk.msra.mxu0 %vm873_vm1, %v4530_v24  ;;  %11819 = vmatpush3.msk.msra.mxu1 %vm873_vm1, %v4528_v3 }
 0xb3d   : > { %11042 = vmatprep.subr.msk.mxu0 %vm873_vm1, %v4718_v26  ;;  %11823 = vmatprep.subr.msk.mxu1 %vm873_vm1, %v4715_v13  ;;  %v5087_v27 = vpop.permute.xlu1 %5086 }
 0xb3e   : > { %4433 = vmatprep.mubr.f32.mxu0 %v13105_v4  ;;  %11820 = vmatprep.mubr.msk.f32.mxu1 %vm869_vm2, %v11031_v25  ;;  %v5092_v53 = vsel %vm5090_vm13, %v5087_v27, %v5089_v34 }
 0xb3f   : > { %11027 = vmatmul.mubr.msk.f32.gmra.mrb[42].mxu0 %vm869_vm2, %v4162_v21 }
 0xb40   : > { %4608 = vmatprep.mubr.f32.mxu0 %v13105_v4 }
 0xb41   : > { %v5085_v30 = vpop.permute.xlu1 %5084 }
 0xb42   : > { %v5091_v42 = vsel %vm5090_vm13, %v5085_v30, %v5087_v27 }
 0xb43   : > { %11035 = vmatmul.mubr.msk.f32.vlgmr.msra.gmra.mrb[40].mxu0 %vm869_vm2, %v11031_v25  ;;  %11821 = vmatmul.mubr.msk.f32.vlgmr.msra.gmra.mrb[44].mxu1 %vm869_vm2, %v11032_v29 }
 0xb44   : > { %11043 = vmatpush1.msk.msra.mxu0 %vm873_vm1, %v4717_v32  ;;  %11824 = vmatpush3.msk.msra.mxu1 %vm873_vm1, %v4715_v13 }
 0xb45   : > { %11051 = vmatprep.subr.msk.mxu0 %vm873_vm1, %v4905_v48  ;;  %11828 = vmatprep.subr.msk.mxu1 %vm873_vm1, %v4902_v23  ;;  %v5277_v35 = vpop.permute.xlu1 %5276 }
 0xb46   : > { %4614 = vmatprep.mubr.f32.mxu0 %v13105_v4  ;;  %11825 = vmatprep.mubr.msk.f32.mxu1 %vm869_vm2, %v11040_v33  ;;  %v5282_v49 = vsel %vm5280_vm14, %v5275_v38, %v5277_v35 }
 0xb47   : > { %11036 = vmatmul.mubr.msk.f32.gmra.mrb[42].mxu0 %vm869_vm2, %v11032_v29 }
 0xb48   : > { %4795 = vmatprep.mubr.f32.mxu0 %v13105_v4 }
 0xb49   : > { %v5279_v7 = vpop.permute.xlu1 %5278 }
 0xb4a   : > { %v5283_v45 = vsel %vm5280_vm14, %v5277_v35, %v5279_v7 }
 0xb4b   : > { %11044 = vmatmul.mubr.msk.f32.vlgmr.msra.gmra.mrb[40].mxu0 %vm869_vm2, %v11040_v33  ;;  %11826 = vmatmul.mubr.msk.f32.vlgmr.msra.gmra.mrb[44].mxu1 %vm869_vm2, %v11041_v36 }
 0xb4c   : > { %11052 = vmatpush1.msk.msra.mxu0 %vm873_vm1, %v4904_v39  ;;  %11829 = vmatpush3.msk.msra.mxu1 %vm873_vm1, %v4902_v23 }
 0xb4d   : > { %11060 = vmatprep.subr.msk.mxu0 %vm873_vm1, %v5092_v53  ;;  %11833 = vmatprep.subr.msk.mxu1 %vm873_vm1, %v5089_v34  ;;  %v5468_v54 = vpop.permute.xlu1 %5467 }
 0xb4e   : > { %4801 = vmatprep.mubr.f32.mxu0 %v13105_v4  ;;  %11830 = vmatprep.mubr.msk.f32.mxu1 %vm869_vm2, %v11049_v31  ;;  %v5473_v59 = vsel %vm5471_vm15, %v5466_v51, %v5468_v54 }
 0xb4f   : > { %11045 = vmatmul.mubr.msk.f32.gmra.mrb[42].mxu0 %vm869_vm2, %v11041_v36 }
 0xb50   : > { %4982 = vmatprep.mubr.f32.mxu0 %v13105_v4 }
 0xb51   : > { %v5470_v50 = vpop.permute.xlu1 %5469 }
 0xb52   : > { %v5474_v57 = vsel %vm5471_vm15, %v5468_v54, %v5470_v50 }
 0xb53   : > { %11053 = vmatmul.mubr.msk.f32.vlgmr.msra.gmra.mrb[40].mxu0 %vm869_vm2, %v11049_v31  ;;  %11831 = vmatmul.mubr.msk.f32.vlgmr.msra.gmra.mrb[44].mxu1 %vm869_vm2, %v11050_v11 }
 0xb54   : > { %11061 = vmatpush1.msk.msra.mxu0 %vm873_vm1, %v5091_v42  ;;  %11834 = vmatpush3.msk.msra.mxu1 %vm873_vm1, %v5089_v34 }
 0xb55   : > { %11069 = vmatprep.subr.msk.mxu0 %vm873_vm1, %v5282_v49  ;;  %11838 = vmatprep.subr.msk.mxu1 %vm873_vm1, %v5283_v45  ;;  %v5659_v52 = vpop.permute.xlu1 %5658 }
 0xb56   : > { %4988 = vmatprep.mubr.f32.mxu0 %v13105_v4  ;;  %11835 = vmatprep.mubr.msk.f32.mxu1 %vm869_vm2, %v11058_v43  ;;  %v5664_v5 = vsel %vm5662_vm0, %v5657_v62, %v5659_v52 }
 0xb57   : > { %11054 = vmatmul.mubr.msk.f32.gmra.mrb[42].mxu0 %vm869_vm2, %v11050_v11 }
 0xb58   : > { %5169 = vmatprep.mubr.f32.mxu0 %v13105_v4 }
 0xb59   : > { %v5661_v61 = vpop.permute.xlu1 %5660 }
 0xb5a   : > { %v5665_v3 = vsel %vm5662_vm0, %v5659_v52, %v5661_v61 }
 0xb5b   : > { %11062 = vmatmul.mubr.msk.f32.vlgmr.msra.gmra.mrb[40].mxu0 %vm869_vm2, %v11058_v43  ;;  %11836 = vmatmul.mubr.msk.f32.vlgmr.msra.gmra.mrb[44].mxu1 %vm869_vm2, %v11059_v37 }
 0xb5c   : > { %11070 = vmatpush1.msk.msra.mxu0 %vm873_vm1, %v5281_v58  ;;  %11839 = vmatpush3.msk.msra.mxu1 %vm873_vm1, %v5283_v45 }
 0xb5d   : > { %11078 = vmatprep.subr.msk.mxu0 %vm873_vm1, %v5473_v59  ;;  %11843 = vmatprep.subr.msk.mxu1 %vm873_vm1, %v5474_v57  ;;  %v5846_v20 = vpop.permute.xlu1 %5845 }
 0xb5e   : > { %5175 = vmatprep.mubr.f32.mxu0 %v13105_v4  ;;  %11840 = vmatprep.mubr.msk.f32.mxu1 %vm869_vm2, %v11067_v55 }
 0xb5f   : > { %11063 = vmatmul.mubr.msk.f32.gmra.mrb[42].mxu0 %vm869_vm2, %v11059_v37 }
 0xb60   : > { %5360 = vmatprep.mubr.f32.mxu0 %v13105_v4 }
 0xb63   : > { %11071 = vmatmul.mubr.msk.f32.vlgmr.msra.gmra.mrb[40].mxu0 %vm869_vm2, %v11067_v55  ;;  %11841 = vmatmul.mubr.msk.f32.vlgmr.msra.gmra.mrb[44].mxu1 %vm869_vm2, %v11068_v60 }
 0xb64   : > { %11079 = vmatpush1.msk.msra.mxu0 %vm873_vm1, %v5472_v1  ;;  %11844 = vmatpush3.msk.msra.mxu1 %vm873_vm1, %v5474_v57 }
 0xb65   : > { %11087 = vmatprep.subr.msk.mxu0 %vm873_vm1, %v5664_v5  ;;  %11848 = vmatprep.subr.msk.mxu1 %vm873_vm1, %v5665_v3 }
 0xb66   : > { %5366 = vmatprep.mubr.f32.mxu0 %v13105_v4  ;;  %11845 = vmatprep.mubr.msk.f32.mxu1 %vm869_vm2, %v11076_v2 }
 0xb67   : > { %11072 = vmatmul.mubr.msk.f32.gmra.mrb[42].mxu0 %vm869_vm2, %v11068_v60 }
 0xb68   : > { %5551 = vmatprep.mubr.f32.mxu0 %v13105_v4 }
 0xb6b   : > { %11080 = vmatmul.mubr.msk.f32.vlgmr.msra.gmra.mrb[40].mxu0 %vm869_vm2, %v11076_v2  ;;  %11846 = vmatmul.mubr.msk.f32.vlgmr.msra.gmra.mrb[44].mxu1 %vm869_vm2, %v11077_v8 }
 0xb6c   : > { %11088 = vmatpush1.msk.msra.mxu0 %vm873_vm1, %v5663_v10  ;;  %11849 = vmatpush3.msk.msra.mxu1 %vm873_vm1, %v5665_v3  ;;  %vm855_vm1 = vcmask 1048448  }
 0xb6d   : > { %5557 = vmatprep.mubr.f32.mxu0 %v13105_v4  ;;  %11850 = vmatprep.mubr.msk.f32.mxu1 %vm869_vm2, %v11085_v9  ;;  %856 = vst.msk [vmem:[#allocation3 + $0x10] sm:$0xff] %vm855_vm1, %v13105_v4  ;;  %859 = vst.msk [vmem:[#allocation3 + $0x30] sm:$0xff] %vm855_vm1, %v13105_v4 }
 0xb6f   : > { %11081 = vmatmul.mubr.msk.f32.gmra.mrb[42].mxu0 %vm869_vm2, %v11077_v8 }
 0xb70   : > { %5742 = vmatprep.mubr.f32.mxu0 %v13105_v4 }
 0xb73   : > { %11089 = vmatmul.mubr.msk.f32.vlgmr.msra.gmra.mrb[40].mxu0 %vm869_vm2, %v11085_v9  ;;  %11851 = vmatmul.mubr.msk.f32.vlgmr.msra.gmra.mrb[44].mxu1 %vm869_vm2, %v11086_v12 }
 0xb74   : > { %5748 = vmatprep.mubr.f32.mxu0 %v13105_v4 }
 0xb77   : > { %11090 = vmatmul.mubr.msk.f32.gmra.mrb[42].mxu0 %vm869_vm2, %v11086_v12 }
 0xb78   : > { %6056 = vmatprep.mubr.f32.mxu0 %v13105_v4 }
 0xc02   : > { %v14158_v13 = vpop.f32.mrb[38].mxu0  ;;  %v14160_v14 = vpop.f32.mrb[42].mxu1 }
 0xc03   : > { %v14162_v41 = vpop.f32.mrb[39].mxu0  ;;  %v11807_v16 = vpop.f32.mrb[43].mxu1 }
 0xc46   : > { %v5744_v21 = vpop.f32.mrb[40].mxu0  ;;  %v11852_v23 = vpop.f32.mrb[44].mxu1 }
 0xc47   : > { %v5853_v24 = vadd.f32 %v11852_v23, %v5846_v20  ;;  %v5746_v25 = vpop.f32.mrb[41].mxu0  ;;  %v5821_v26 = vpop.f32.mrb[45].mxu1  ;;  %v5848_v5 = vadd.f32 %v5841_v19, %v5744_v21 }
 0xc48   : > { %v5849_v27 = vadd.f32 %v5841_v19, %v5746_v25  ;;  %v5850_v28 = vadd.f32 %v5841_v19, %v5821_v26 }
 0xc49   : > { %v5865_v29 = vmin.f32 %v5853_v24, 0.0  ;;  %vm5859_vm5 = vcmp.gt.f32.partialorder %v5853_v24, 0.0  ;;  %v5860_v6 = vmin.f32 %v5848_v5, 0.0 }
 0xc4a   : > { %v5861_v30 = vmin.f32 %v5849_v27, 0.0  ;;  %v5862_v32 = vmin.f32 %v5850_v28, 0.0  ;;  %v5750_v33 = vpop.f32.mrb[42].mxu0  ;;  %vm5855_vm2 = vcmp.gt.f32.partialorder %v5849_v27, 0.0  ;;  %vm5856_vm6 = vcmp.gt.f32.partialorder %v5850_v28, 0.0 }
 0xc4b   : > { %v5876_v34 = vmul.f32 1.442695, %v5865_v29  ;;  %v5752_v48 = vpop.f32.mrb[43].mxu0  ;;  %v5851_v8 = vadd.f32 %v5846_v20, %v5750_v33  ;;  %v5866_v9 = vmul.f32 1.442695, %v5860_v6 }
 0xc4c   : > { %v5868_v35 = vmul.f32 1.442695, %v5861_v30  ;;  %v5870_v36 = vmul.f32 1.442695, %v5862_v32  ;;  %v5852_v7 = vadd.f32 %v5846_v20, %v5752_v48 }
 0xc4d   : > { %13056 = vpow2.f32 %v5876_v34  ;;  %v5863_v10 = vmin.f32 %v5851_v8, 0.0 }
 0xc4e   : > { %v5864_v38 = vmin.f32 %v5852_v7, 0.0  ;;  %13058 = vpow2.f32 %v5868_v35  ;;  %vm5858_vm1 = vcmp.gt.f32.partialorder %v5852_v7, 0.0 }
 0xc4f   : > { %13060 = vpow2.f32 %v5870_v36  ;;  %v5872_v12 = vmul.f32 1.442695, %v5863_v10 }
 0xc50   : > { %v5874_v39 = vmul.f32 1.442695, %v5864_v38 }
 0xc52   : > { %13062 = vpow2.f32 %v5874_v39 }
 0xc53   : > { %13064 = vpow2.f32 %v5866_v9 }
 0xc54   : > { %13066 = vpow2.f32 %v5872_v12 }
 0xc57   : > { %v13057_v31 = vpop.eup %13056 }
 0xc58   : > { %v13059_v53 = vpop.eup %13058  ;;  %v11099_v54 = vadd.f32 -1.0, %v13057_v31 }
 0xc59   : > { %v13061_v40 = vpop.eup %13060  ;;  %v11095_v11 = vadd.f32 -1.0, %v13059_v53 }
 0xc5a   : > { %v5889_v42 = vmul.f32 1.6732632, %v11099_v54  ;;  %v11096_v43 = vadd.f32 -1.0, %v13061_v40 }
 0xc5b   : > { %v5885_v49 = vmul.f32 1.6732632, %v11095_v11 }
 0xc5c   : > { %v13063_v45 = vpop.eup %13062  ;;  %v5886_v50 = vmul.f32 1.6732632, %v11096_v43  ;;  %v5895_v58 = vsel %vm5859_vm5, %v5853_v24, %v5889_v42  ;;  %vm5854_vm5 = vcmp.gt.f32.partialorder %v5848_v5, 0.0 }
 0xc5d   : > { %v11098_v51 = vadd.f32 -1.0, %v13063_v45  ;;  %v5891_v37 = vsel %vm5855_vm2, %v5849_v27, %v5885_v49  ;;  %v5901_v61 = vmul.f32 1.050701, %v5895_v58  ;;  %vm5941_vm2 = vcmask 916480   ;;  %v13065_v23 = vpop.eup %13064 }
 0xc5e   : > { %v5897_v52 = vmul.f32 1.050701, %v5891_v37  ;;  %v5892_v55 = vsel %vm5856_vm6, %v5850_v28, %v5886_v50  ;;  %v13067_v19 = vpop.eup %13066  ;;  %v14185_v28 = vld [vmem:[%s15258_s14 + $0x10] sm:$0xff]  ;;  %vm5857_vm6 = vcmp.gt.f32.partialorder %v5851_v8, 0.0  ;;  %v14238_v37 = vld [vmem:[%s15258_s14 + $0x18] sm:$0xff] }
 0xc5f   : > { %v5888_v56 = vmul.f32 1.6732632, %v11098_v51  ;;  %v5898_v57 = vmul.f32 1.050701, %v5892_v55  ;;  %v5909_v3 = vmul.f32 %v5901_v61, %v13299_v22  ;;  %v11097_v27 = vadd.f32 -1.0, %v13067_v19  ;;  %11857 = vmatprep.mubr.msk.f32.mxu1 %vm1214_vm4, %v14185_v28 }
 0xc60   : > { %v5905_v60 = vmul.f32 %v5897_v52, %v13297_v18  ;;  %v14246_v52 = vld [vmem:[%s15258_s14] sm:$0xff] }
 0xc61   : > { %v5894_v59 = vsel %vm5858_vm1, %v5852_v7, %v5888_v56  ;;  %v5906_v1 = vmul.f32 %v5898_v57, %v13299_v22  ;;  %v11094_v22 = vadd.f32 -1.0, %v13065_v23  ;;  %v5887_v30 = vmul.f32 1.6732632, %v11097_v27  ;;  %v14311_v23 = vld [vmem:[%s15258_s14 + $0x30] sm:$0xff] }
 0xc62   : > { %v5900_v62 = vmul.f32 1.050701, %v5894_v59  ;;  %5918 = vrot.lane.b32.xlu0 %v5905_v60, %s15359_s4  ;;  %vm857_vm1 = vcmask 261120  }
 0xc63   : > { %5920 = vrot.lane.b32.xlu1 %v5906_v1, %s15359_s4  ;;  %v5884_v26 = vmul.f32 1.6732632, %v11094_v22  ;;  %v5893_v35 = vsel %vm5857_vm6, %v5851_v8, %v5887_v30  ;;  %858 = vst.msk [vmem:[#allocation3 + $0x18] sm:$0xff] %vm857_vm1, %v13105_v4  ;;  %860 = vst.msk [vmem:[#allocation3 + $0x38] sm:$0xff] %vm857_vm1, %v13105_v4  ;;  %v14276_v1 = vld [vmem:[%s15258_s14 + $0x8] sm:$0xff]  ;;  %vm9605_vm6 = vcmask 474112  }
 0xc64   : > { %v5908_v2 = vmul.f32 %v5900_v62, %v13297_v18  ;;  %v5899_v36 = vmul.f32 1.050701, %v5893_v35  ;;  %vm9801_vm1 = vcmask 343040  }
 0xc65   : > { %v5890_v29 = vsel %vm5854_vm5, %v5848_v5, %v5884_v26  ;;  %v11122_v26 = vld [vmem:[%s15258_s14 + $0x40] sm:$0xff]  ;;  %vm6340_vm5 = vcmask 982016  }
 0xc66   : > { %5924 = vrot.lane.b32.xlu0 %v5908_v2, %s15359_s4  ;;  %v5896_v34 = vmul.f32 1.050701, %v5890_v29  ;;  %v5907_v38 = vmul.f32 %v5899_v36, %v13295_v17  ;;  %v14281_v2 = vld [vmem:[%s15258_s14 + $0x20] sm:$0xff] }
 0xc67   : > { %5926 = vrot.lane.b32.xlu1 %v5909_v3, %s15359_s4 }
 0xc68   : > { %v5904_v7 = vmul.f32 %v5896_v34, %v13295_v17  ;;  %v11123_v34 = vld [vmem:[%s15258_s14 + $0x48] sm:$0xff] }
 0xc6a   : > { %v8792_v19 = vld [vmem:[#allocation3 + $0x18] sm:$0xff] }
 0xcd4   : > { %v14174_v16 = vpop.permute.xlu0 %5918 }
 0xcd5   : > { %v5921_v24 = vpop.permute.xlu1 %5920 }
 0xcd6   : > { %v5929_v18 = vsel %vm842_vm9, %v14174_v16, %v5921_v24 }
 0xcd7   : > { %5942 = vst.msk [vmem:[#allocation3 + $0x10] sm:$0xff] %vm5941_vm2, %v5929_v18 }
 0xcd8   : > { %v14178_v25 = vpop.permute.xlu0 %5924 }
 0xcd9   : > { %v5927_v21 = vpop.permute.xlu1 %5926 }
 0xcda   : > { %v5931_v20 = vsel %vm842_vm9, %v14178_v25, %v5927_v21  ;;  %v8796_v21 = vld [vmem:[#allocation3 + $0x38] sm:$0xff] }
 0xcdb   : > { %5945 = vst.msk [vmem:[#allocation3 + $0x30] sm:$0xff] %vm5941_vm2, %v5931_v20  ;;  %vm5938_vm2 = vcmask 1047936   ;;  %v14334_v20 = vld [vmem:[%s15258_s14 + $0x38] sm:$0xff]  ;;  %v14340_v27 = vpack.i.bf16 %v8796_v21, %v8792_v19 }
 0xcde   : > { %v5948_v32 = vld [vmem:[#allocation3 + $0x10] sm:$0xff] }
 0xce2   : > { %v14189_v33 = vld [vmem:[#allocation3 + $0x30] sm:$0xff] }
 0xce3   : > { %v12618_v48 = vpack.i.bf16 %v14189_v33, %v5948_v32 }
 0xce5   : > { %12619 = vrot.lane.b32.xlu1 %v12618_v48, %s15293_s26  ;;  %12614 = vrot.lane.b32.xlu0 %v12618_v48, %s15295_s6  ;;  %s15307_s26 = smov 102   ;;  %s15311_s6 = smov 118  }
 0xce9   : > { %5916 = vrot.lane.b32.xlu1 %v5904_v7, %s15359_s4  ;;  %12624 = vrot.lane.b32.xlu0 %v12618_v48, %s15297_s30  ;;  %s15303_s30 = smov 98  }
 0xced   : > { %12629 = vrot.lane.b32.xlu1 %v12618_v48, %s15313_s5  ;;  %5922 = vrot.lane.b32.xlu0 %v5907_v38, %s15359_s4  ;;  %s15301_s4 = smov 82   ;;  %s15365_s5 = smov 59  }
 0xcf1   : > { %12639 = vrot.lane.b32.xlu1 %v12618_v48, %s15307_s26  ;;  %12634 = vrot.lane.b32.xlu0 %v12618_v48, %s15311_s6  ;;  %s15360_s26 = smov 80   ;;  %s15363_s6 = smov 121  }
 0xcf5   : > { %12649 = vrot.lane.b32.xlu1 %v12618_v48, %s15357_s3  ;;  %12644 = vrot.lane.b32.xlu0 %v12618_v48, %s15309_s1  ;;  %s15364_s1 = smov 122  }
 0xcf9   : > { %12659 = vrot.lane.b32.xlu1 %v12618_v48, %s15303_s30  ;;  %12654 = vrot.lane.b32.xlu0 %v12618_v48, %s15305_s0  ;;  %s15362_s0 = smov 60   ;;  %s15368_s30 = smov 118  }
 0xcfd   : > { %12674 = vrot.lane.b32.xlu1 %v12618_v48, %s15299_s7  ;;  %12664 = vrot.lane.b32.xlu0 %v12618_v48, %s15301_s4  ;;  %v11128_v48 = vld [vmem:[%s15258_s14 + $0x50] sm:$0xff]  ;;  %s15366_s4 = smov 119   ;;  %s15369_s7 = smov 101  }
 0xd57   : > { %v14210_v17 = vpop.permute.xlu1 %12619  ;;  %v14212_v39 = vpop.permute.xlu0 %12614 }
 0xd58   : > { %v15336_v31 = vunpack.i.h.bf16 %v14210_v17  ;;  %v12621_v53 = vunpack.i.l.bf16 %v14210_v17  ;;  %v12617_v54 = vunpack.i.h.bf16 %v14212_v39  ;;  %v12616_v40 = vunpack.i.l.bf16 %v14212_v39  ;;  %v11189_v39 = vld [vmem:[%s15258_s14 + $0xf8] sm:$0xff] }
 0xd5a   : > { %v12182_v11 = vpack.c.bf16 %v12617_v54, %v12616_v40  ;;  %v12190_v45 = vpack.c.bf16 %v15336_v31, %v12621_v53 }
 0xd5b   : > { %v5917_v42 = vpop.permute.xlu1 %5916  ;;  %v14222_v43 = vpop.permute.xlu0 %12624 }
 0xd5c   : > { %v14230_v49 = vsel %vm842_vm9, %v5917_v42, %v14174_v16  ;;  %5939 = vst.msk [vmem:[#allocation3] sm:$0xff] %vm5938_vm2, %v5917_v42  ;;  %v15334_v50 = vunpack.i.h.bf16 %v14222_v43  ;;  %v15335_v51 = vunpack.i.l.bf16 %v14222_v43  ;;  %12183 = vmatprep.subr.bf16.mxu1 %v12182_v11  ;;  %v14306_v16 = vld [vmem:[%s15258_s14 + $0x28] sm:$0xff]  ;;  %v11134_v42 = vld [vmem:[%s15258_s14 + $0x60] sm:$0xff] }
 0xd5d   : > { %12185 = vmatpush3.bf16.msra.mxu1 %v12182_v11  ;;  %v14241_v58 = vpack.i.bf16 %v5948_v32, %v14230_v49  ;;  %v11129_v11 = vld [vmem:[%s15258_s14 + $0x58] sm:$0xff] }
 0xd5e   : > { %12191 = vmatprep.subr.bf16.mxu1 %v12190_v45  ;;  %v12198_v56 = vpack.c.bf16 %v15334_v50, %v15335_v51 }
 0xd5f   : > { %v5923_v55 = vpop.permute.xlu0 %5922  ;;  %12669 = vrot.lane.b32.xlu0 %v14241_v58, %s15360_s26  ;;  %v14261_v59 = vpop.permute.xlu1 %12629 }
 0xd60   : > { %v14256_v57 = vsel %vm842_vm9, %v5923_v55, %v14178_v25  ;;  %5943 = vst.msk [vmem:[#allocation3 + $0x20] sm:$0xff] %vm5938_vm2, %v5923_v55  ;;  %11858 = vmatmul.mubr.msk.f32.vlgmr.msra.gmra.mrb[46].mxu1 %vm1214_vm4, %v14238_v37  ;;  %v15332_v61 = vunpack.i.h.bf16 %v14261_v59  ;;  %v15333_v62 = vunpack.i.l.bf16 %v14261_v59  ;;  %vm8614_vm9 = vcmask 637952  }
 0xd61   : > { %12193 = vmatpush3.bf16.msra.mxu1 %v12190_v45  ;;  %11864 = vmatprep.mubr.msk.f32.mxu1 %vm1214_vm4, %v14246_v52  ;;  %v14267_v60 = vpack.i.bf16 %v14189_v33, %v14256_v57  ;;  %v14427_v21 = vpack.i.bf16 %v14256_v57, %v14230_v49  ;;  %v11146_v49 = vld [vmem:[%s15258_s14 + $0x80] sm:$0xff]  ;;  %vm6910_vm2 = vcmask 834560  }
 0xd62   : > { %12199 = vmatprep.subr.bf16.mxu1 %v12198_v56  ;;  %v12206_v6 = vpack.c.bf16 %v15332_v61, %v15333_v62 }
 0xd63   : > { %12679 = vrot.lane.b32.xlu1 %v14267_v60, %s15360_s26  ;;  %v5946_v5 = vld [vmem:[#allocation3] sm:$0xff]  ;;  %v14291_v8 = vpop.permute.xlu0 %12634  ;;  %v14323_v18 = vpop.permute.xlu1 %12639 }
 0xd64   : > { %v15330_v10 = vunpack.i.h.bf16 %v14291_v8  ;;  %v15331_v12 = vunpack.i.l.bf16 %v14291_v8  ;;  %v15328_v22 = vunpack.i.h.bf16 %v14323_v18  ;;  %v15329_v25 = vunpack.i.l.bf16 %v14323_v18 }
 0xd66   : > { %v12214_v24 = vpack.c.bf16 %v15330_v10, %v15331_v12  ;;  %v12222_v29 = vpack.c.bf16 %v15328_v22, %v15329_v25 }
 0xd67   : > { %v5949_v3 = vld [vmem:[#allocation3 + $0x20] sm:$0xff]  ;;  %12689 = vrot.lane.b32.xlu1 %v14241_v58, %s15358_s9  ;;  %v14350_v30 = vpop.permute.xlu0 %12644  ;;  %v14374_v36 = vpop.permute.xlu1 %12649 }
 0xd68   : > { %11865 = vmatmul.mubr.msk.f32.vlgmr.msra.gmra.mrb[46].mxu1 %vm1214_vm4, %v14276_v1  ;;  %v14293_v9 = vpack.i.bf16 %v5949_v3, %v5946_v5  ;;  %v15326_v32 = vunpack.i.h.bf16 %v14350_v30  ;;  %v15327_v33 = vunpack.i.l.bf16 %v14350_v30  ;;  %v15324_v7 = vunpack.i.h.bf16 %v14374_v36  ;;  %v11135_v5 = vld [vmem:[%s15258_s14 + $0x68] sm:$0xff] }
 0xd69   : > { %12201 = vmatpush3.bf16.msra.mxu1 %v12198_v56  ;;  %11871 = vmatprep.mubr.msk.f32.mxu1 %vm1214_vm4, %v14281_v2  ;;  %v15325_v38 = vunpack.i.l.bf16 %v14374_v36 }
 0xd6a   : > { %12207 = vmatprep.subr.bf16.mxu1 %v12206_v6  ;;  %12684 = vrot.lane.b32.xlu0 %v14293_v9, %s15360_s26  ;;  %s13127_s26 = smov 62   ;;  %v12230_v35 = vpack.c.bf16 %v15326_v32, %v15327_v33 }
 0xd6b   : > { %12699 = vrot.lane.b32.xlu1 %v14293_v9, %s15358_s9  ;;  %v12238_v45 = vpack.c.bf16 %v15324_v7, %v15325_v38  ;;  %v14398_v55 = vpop.permute.xlu0 %12654  ;;  %v14422_v19 = vpop.permute.xlu1 %12659 }
 0xd6c   : > { %v15322_v56 = vunpack.i.h.bf16 %v14398_v55  ;;  %v15323_v3 = vunpack.i.l.bf16 %v14398_v55 }
 0xd6e   : > { %12694 = vrot.lane.b32.xlu0 %v14267_v60, %s15358_s9  ;;  %s13128_s9 = smov 78  }
 0xd6f   : > { %12714 = vrot.lane.b32.xlu1 %v14241_v58, %s13127_s26 }
 0xd70   : > { %11872 = vmatmul.mubr.msk.f32.vlgmr.msra.gmra.mrb[46].mxu1 %vm1214_vm4, %v14306_v16 }
 0xd71   : > { %12209 = vmatpush3.bf16.msra.mxu1 %v12206_v6  ;;  %11878 = vmatprep.mubr.msk.f32.mxu1 %vm1214_vm4, %v14311_v23  ;;  %v11140_v6 = vld [vmem:[%s15258_s14 + $0x70] sm:$0xff] }
 0xd72   : > { %12215 = vmatprep.subr.bf16.mxu1 %v12214_v24  ;;  %12704 = vrot.lane.b32.xlu0 %v14241_v58, %s13128_s9 }
 0xd73   : > { %12719 = vrot.lane.b32.xlu1 %v14267_v60, %s13128_s9 }
 0xd76   : > { %12709 = vrot.lane.b32.xlu0 %v14293_v9, %s13128_s9  ;;  %s15361_s9 = smov 61  }
 0xd77   : > { %12724 = vrot.lane.b32.xlu1 %v14293_v9, %s13127_s26 }
 0xd78   : > { %11879 = vmatmul.mubr.msk.f32.vlgmr.msra.gmra.mrb[46].mxu1 %vm1214_vm4, %v14334_v20 }
 0xd79   : > { %12217 = vmatpush3.bf16.msra.mxu1 %v12214_v24  ;;  %11885 = vmatprep.mubr.msk.f32.mxu1 %vm1214_vm4, %v11122_v26  ;;  %v12246_v24 = vpack.c.bf16 %v15322_v56, %v15323_v3  ;;  %v15320_v26 = vunpack.i.h.bf16 %v14422_v19 }
 0xd7a   : > { %12223 = vmatprep.subr.bf16.mxu1 %v12222_v29  ;;  %12729 = vrot.lane.b32.xlu0 %v14340_v27, %s13127_s26 }
 0xd7b   : > { %12734 = vrot.lane.b32.xlu1 %v14241_v58, %s15361_s9 }
 0xd7e   : > { %12744 = vrot.lane.b32.xlu0 %v14340_v27, %s15361_s9 }
 0xd7f   : > { %12739 = vrot.lane.b32.xlu1 %v14293_v9, %s15361_s9 }
 0xd80   : > { %11886 = vmatmul.mubr.msk.f32.vlgmr.msra.gmra.mrb[46].mxu1 %vm1214_vm4, %v11123_v34  ;;  %v11141_v34 = vld [vmem:[%s15258_s14 + $0x78] sm:$0xff] }
 0xd81   : > { %12225 = vmatpush3.bf16.msra.mxu1 %v12222_v29  ;;  %11892 = vmatprep.mubr.msk.f32.mxu1 %vm1214_vm4, %v11128_v48  ;;  %v15321_v29 = vunpack.i.l.bf16 %v14422_v19  ;;  %v14450_v48 = vpop.permute.xlu0 %12664 }
 0xd82   : > { %12231 = vmatprep.subr.bf16.mxu1 %v12230_v35  ;;  %12749 = vrot.lane.b32.xlu0 %v14267_v60, %s13127_s26  ;;  %s13130_s26 = smov 42  }
 0xd83   : > { %12759 = vrot.lane.b32.xlu1 %v14241_v58, %s15362_s0  ;;  %v12254_v57 = vpack.c.bf16 %v15320_v26, %v15321_v29 }
 0xd86   : > { %12754 = vrot.lane.b32.xlu0 %v14293_v9, %s15363_s6 }
 0xd87   : > { %12764 = vrot.lane.b32.xlu1 %v14293_v9, %s15362_s0 }
 0xd88   : > { %11893 = vmatmul.mubr.msk.f32.vlgmr.msra.gmra.mrb[46].mxu1 %vm1214_vm4, %v11129_v11  ;;  %v15319_v11 = vunpack.i.l.bf16 %v14450_v48 }
 0xd89   : > { %12233 = vmatpush3.bf16.msra.mxu1 %v12230_v35  ;;  %11899 = vmatprep.mubr.msk.f32.mxu1 %vm1214_vm4, %v11134_v42  ;;  %v15318_v35 = vunpack.i.h.bf16 %v14450_v48  ;;  %v11147_v42 = vld [vmem:[%s15258_s14 + $0x88] sm:$0xff] }
 0xd8a   : > { %12239 = vmatprep.subr.bf16.mxu1 %v12238_v45  ;;  %12774 = vrot.lane.b32.xlu0 %v14340_v27, %s15362_s0 }
 0xd8b   : > { %12769 = vrot.lane.b32.xlu1 %v14293_v9, %s15364_s1 }
 0xd8e   : > { %12784 = vrot.lane.b32.xlu0 %v14267_v60, %s15361_s9 }
 0xd8f   : > { %12779 = vrot.lane.b32.xlu1 %v14241_v58, %s15365_s5 }
 0xd90   : > { %11900 = vmatmul.mubr.msk.f32.vlgmr.msra.gmra.mrb[46].mxu1 %vm1214_vm4, %v11135_v5  ;;  %v12262_v5 = vpack.c.bf16 %v15318_v35, %v15319_v11 }
 0xd91   : > { %12241 = vmatpush3.bf16.msra.mxu1 %v12238_v45  ;;  %11906 = vmatprep.mubr.msk.f32.mxu1 %vm1214_vm4, %v11140_v6  ;;  %v11152_v45 = vld [vmem:[%s15258_s14 + $0x90] sm:$0xff]  ;;  %v14474_v6 = vpop.permute.xlu1 %12674 }
 0xd92   : > { %12247 = vmatprep.subr.bf16.mxu1 %v12246_v24  ;;  %12804 = vrot.lane.b32.xlu0 %v14340_v27, %s15365_s5 }
 0xd93   : > { %12789 = vrot.lane.b32.xlu1 %v14427_v21, %s15363_s6  ;;  %s15367_s6 = smov 120  }
 0xd96   : > { %12809 = vrot.lane.b32.xlu0 %v14293_v9, %s15366_s4 }
 0xd97   : > { %12794 = vrot.lane.b32.xlu1 %v14293_v9, %s15365_s5 }
 0xd98   : > { %11907 = vmatmul.mubr.msk.f32.vlgmr.msra.gmra.mrb[46].mxu1 %vm1214_vm4, %v11141_v34  ;;  %v15317_v34 = vunpack.i.l.bf16 %v14474_v6 }
 0xd99   : > { %12249 = vmatpush3.bf16.msra.mxu1 %v12246_v24  ;;  %11913 = vmatprep.mubr.msk.f32.mxu1 %vm1214_vm4, %v11146_v49  ;;  %v15316_v24 = vunpack.i.h.bf16 %v14474_v6  ;;  %v11153_v49 = vld [vmem:[%s15258_s14 + $0x98] sm:$0xff] }
 0xd9a   : > { %12255 = vmatprep.subr.bf16.mxu1 %v12254_v57  ;;  %12829 = vrot.lane.b32.xlu0 %v14267_v60, %s15362_s0  ;;  %s13133_s0 = smov 39  }
 0xd9b   : > { %12799 = vrot.lane.b32.xlu1 %v14293_v9, %s15367_s6 }
 0xd9e   : > { %12834 = vrot.lane.b32.xlu0 %v14340_v27, %s13129_s8 }
 0xd9f   : > { %12814 = vrot.lane.b32.xlu1 %v14241_v58, %s13129_s8 }
 0xda0   : > { %11914 = vmatmul.mubr.msk.f32.vlgmr.msra.gmra.mrb[46].mxu1 %vm1214_vm4, %v11147_v42  ;;  %v12270_v42 = vpack.c.bf16 %v15316_v24, %v15317_v34  ;;  %v11164_v24 = vld [vmem:[%s15258_s14 + $0xb0] sm:$0xff] }
 0xda1   : > { %12257 = vmatpush3.bf16.msra.mxu1 %v12254_v57  ;;  %11920 = vmatprep.mubr.msk.f32.mxu1 %vm1214_vm4, %v11152_v45  ;;  %v11158_v57 = vld [vmem:[%s15258_s14 + $0xa0] sm:$0xff]  ;;  %v11159_v45 = vld [vmem:[%s15258_s14 + $0xa8] sm:$0xff] }
 0xda2   : > { %12263 = vmatprep.subr.bf16.mxu1 %v12262_v5  ;;  %12839 = vrot.lane.b32.xlu0 %v14427_v21, %s15364_s1  ;;  %s15371_s1 = smov 99  }
 0xda3   : > { %12819 = vrot.lane.b32.xlu1 %v14293_v9, %s13129_s8 }
 0xda6   : > { %12844 = vrot.lane.b32.xlu0 %v14267_v60, %s15365_s5  ;;  %s15370_s5 = smov 102  }
 0xda7   : > { %12824 = vrot.lane.b32.xlu1 %v14293_v9, %s15368_s30 }
 0xda8   : > { %11921 = vmatmul.mubr.msk.f32.vlgmr.msra.gmra.mrb[46].mxu1 %vm1214_vm4, %v11153_v49 }
 0xda9   : > { %12265 = vmatpush3.bf16.msra.mxu1 %v12262_v5  ;;  %11927 = vmatprep.mubr.msk.f32.mxu1 %vm1214_vm4, %v11158_v57  ;;  %v11165_v5 = vld [vmem:[%s15258_s14 + $0xb8] sm:$0xff] }
 0xdaa   : > { %12271 = vmatprep.subr.bf16.mxu1 %v12270_v42  ;;  %12849 = vrot.lane.b32.xlu0 %v14427_v21, %s15367_s6  ;;  %s12571_s6 = smul.u32 24, %s15397_s2 }
 0xdab   : > { %12854 = vrot.lane.b32.xlu1 %v14427_v21, %s15366_s4  ;;  %s15373_s4 = smov 82  }
 0xdac   : > { %s777_s9 = scalar_lea.vmem %s15269_s25, %s12571_s6 }
 0xdae   : > { %12874 = vrot.lane.b32.xlu0 %v14340_v27, %s13130_s26 }
 0xdaf   : > { %12859 = vrot.lane.b32.xlu1 %v14241_v58, %s13130_s26 }
 0xdb0   : > { %11928 = vmatmul.mubr.msk.f32.vlgmr.msra.gmra.mrb[46].mxu1 %vm1214_vm4, %v11159_v45 }
 0xdb1   : > { %12273 = vmatpush3.bf16.msra.mxu1 %v12270_v42  ;;  %11934 = vmatprep.mubr.msk.f32.mxu1 %vm1214_vm4, %v11164_v24 }
 0xdb2   : > { %12879 = vrot.lane.b32.xlu0 %v14267_v60, %s13129_s8  ;;  %s13131_s8 = smov 41  }
 0xdb3   : > { %12864 = vrot.lane.b32.xlu1 %v14293_v9, %s13130_s26 }
 0xdb6   : > { %12884 = vrot.lane.b32.xlu0 %v14293_v9, %s15369_s7 }
 0xdb7   : > { %12869 = vrot.lane.b32.xlu1 %v14293_v9, %s15370_s5 }
 0xdb8   : > { %11935 = vmatmul.mubr.msk.f32.vlgmr.msra.gmra.mrb[46].mxu1 %vm1214_vm4, %v11165_v5 }
 0xdb9   : > { %8316 = vmatprep.mubr.f32.mxu1 %v13105_v4 }
 0xdba   : > { %12899 = vrot.lane.b32.xlu0 %v14427_v21, %s15368_s30  ;;  %s13132_s30 = smov 40  }
 0xdbb   : > { %12889 = vrot.lane.b32.xlu1 %v14241_v58, %s13131_s8 }
 0xdbe   : > { %12904 = vrot.lane.b32.xlu0 %v14267_v60, %s13130_s26 }
 0xdbf   : > { %12894 = vrot.lane.b32.xlu1 %v14293_v9, %s13131_s8 }
 0xdc2   : > { %12909 = vrot.lane.b32.xlu0 %v14427_v21, %s15370_s5  ;;  %s13134_s5 = smov 38  }
 0xdc3   : > { %12914 = vrot.lane.b32.xlu1 %v14427_v21, %s15369_s7 }
 0xdc6   : > { %12924 = vrot.lane.b32.xlu0 %v14340_v27, %s13131_s8 }
 0xdc7   : > { %12919 = vrot.lane.b32.xlu1 %v14293_v9, %s15357_s3 }
 0xdca   : > { %12944 = vrot.lane.b32.xlu0 %v14267_v60, %s13131_s8 }
 0xdcb   : > { %12929 = vrot.lane.b32.xlu1 %v14241_v58, %s13132_s30 }
 0xdce   : > { %12949 = vrot.lane.b32.xlu0 %v14340_v27, %s13132_s30 }
 0xdcf   : > { %12934 = vrot.lane.b32.xlu1 %v14293_v9, %s13132_s30 }
 0xdd1   : > { %v12670_v24 = vpop.permute.xlu0 %12669 }
 0xdd2   : > { %12954 = vrot.lane.b32.xlu0 %v14427_v21, %s15357_s3  ;;  %v12672_v49 = vunpack.i.h.bf16 %v12670_v24  ;;  %v12671_v57 = vunpack.i.l.bf16 %v12670_v24  ;;  %s15372_s3 = smov 98  }
 0xdd3   : > { %12939 = vrot.lane.b32.xlu1 %v14293_v9, %s15371_s1 }
 0xdd4   : > { %v8237_v34 = vsel %vm4903_vm12, %v12671_v57, %v12672_v49 }
 0xdd5   : > { %v12680_v42 = vpop.permute.xlu1 %12679 }
 0xdd6   : > { %v12682_v45 = vunpack.i.h.bf16 %v12680_v42  ;;  %v12681_v5 = vunpack.i.l.bf16 %v12680_v42  ;;  %12959 = vrot.lane.b32.xlu0 %v14267_v60, %s13132_s30 }
 0xdd7   : > { %12974 = vrot.lane.b32.xlu1 %v14241_v58, %s13133_s0 }
 0xdd8   : > { %v8239_v35 = vsel %vm4903_vm12, %v12681_v5, %v12682_v45 }
 0xdd9   : > { %v12690_v11 = vpop.permute.xlu1 %12689  ;;  %v12274_v26 = vpack.c.bf16 %v8239_v35, %v8237_v34 }
 0xdda   : > { %12964 = vrot.lane.b32.xlu0 %v14427_v21, %s15371_s1  ;;  %v12692_v34 = vunpack.i.h.bf16 %v12690_v11  ;;  %v12691_v7 = vunpack.i.l.bf16 %v12690_v11  ;;  %s15374_s1 = smov 81  }
 0xddb   : > { %12979 = vrot.lane.b32.xlu1 %v14427_v21, %s15372_s3  ;;  %12275 = vmatprep.subr.bf16.mxu1 %v12274_v26  ;;  %v12278_v26 = vpack.c.bf16 %v12682_v45, %v12672_v49 }
 0xddc   : > { %v12685_v24 = vpop.permute.xlu0 %12684 }
 0xddd   : > { %v12700_v42 = vpop.permute.xlu1 %12699  ;;  %v12687_v29 = vunpack.i.h.bf16 %v12685_v24  ;;  %v12686_v56 = vunpack.i.l.bf16 %v12685_v24  ;;  %v11170_v24 = vld [vmem:[%s15258_s14 + $0xc0] sm:$0xff] }
 0xdde   : > { %12969 = vrot.lane.b32.xlu0 %v14293_v9, %s15372_s3  ;;  %v12702_v49 = vunpack.i.h.bf16 %v12700_v42 }
 0xddf   : > { %12984 = vrot.lane.b32.xlu1 %v14293_v9, %s13133_s0  ;;  %v8238_v3 = vsel %vm4903_vm12, %v12687_v29, %v12681_v5  ;;  %v8236_v35 = vsel %vm4903_vm12, %v12686_v56, %v12671_v57  ;;  %v8426_v56 = vsel %vm5090_vm13, %v12691_v7, %v12692_v34  ;;  %v12701_v57 = vunpack.i.l.bf16 %v12700_v42 }
 0xde0   : > { %v12276_v38 = vpack.c.bf16 %v8238_v3, %v8236_v35  ;;  %v12695_v32 = vpop.permute.xlu0 %12694  ;;  %vm8824_vm12 = vcmask 506880  }
 0xde1   : > { %v14560_v33 = vpop.permute.xlu1 %12714  ;;  %v12697_v22 = vunpack.i.h.bf16 %v12695_v32  ;;  %v12696_v25 = vunpack.i.l.bf16 %v12695_v32 }
 0xde2   : > { %12994 = vrot.lane.b32.xlu0 %v14267_v60, %s13133_s0  ;;  %12277 = vmatpush1.bf16.msra.mxu1 %v12276_v38  ;;  %v11171_v38 = vld [vmem:[%s15258_s14 + $0xc8] sm:$0xff] }
 0xde3   : > { %12279 = vmatprep.subr.bf16.mxu1 %v12278_v26  ;;  %v8428_v29 = vsel %vm5090_vm13, %v12696_v25, %v12697_v22  ;;  %12989 = vrot.lane.b32.xlu1 %v14293_v9, %s15373_s4  ;;  %v8427_v35 = vsel %vm5090_vm13, %v12702_v49, %v12696_v25 }
 0xde4   : > { %v14571_v3 = vpop.permute.xlu0 %12704  ;;  %v12282_v11 = vpack.c.bf16 %v8428_v29, %v8426_v56 }
 0xde5   : > { %v14573_v32 = vpop.permute.xlu1 %12719  ;;  %11172 = vmatmul.mubr.msk.f32.vlgmr.msra.gmra.mrb[48].mxu1 %vm1214_vm4, %v11170_v24  ;;  %v12706_v56 = vunpack.i.l.bf16 %v14571_v3 }
 0xde6   : > { %12999 = vrot.lane.b32.xlu0 %v14340_v27, %s13133_s0  ;;  %12281 = vmatpush3.bf16.msra.mxu1 %v12278_v26  ;;  %v12707_v26 = vunpack.i.h.bf16 %v14571_v3  ;;  %v12722_v42 = vunpack.i.h.bf16 %v14573_v32  ;;  %v12721_v29 = vunpack.i.l.bf16 %v14573_v32  ;;  %v12286_v3 = vpack.c.bf16 %v12697_v22, %v12692_v34 }
 0xde7   : > { %12283 = vmatprep.subr.bf16.mxu1 %v12282_v11  ;;  %8322 = vmatprep.mubr.f32.mxu1 %v13105_v4 }
 0xde8   : > { %v12710_v45 = vpop.permute.xlu0 %12709  ;;  %13004 = vrot.lane.b32.xlu1 %v14241_v58, %s13134_s5  ;;  %v8425_v58 = vsel %vm5090_vm13, %v12701_v57, %v12691_v7  ;;  %v11176_v7 = vld [vmem:[%s15258_s14 + $0xd0] sm:$0xff]  ;;  %v8618_v32 = vsel %vm8614_vm9, %v12721_v29, %v12722_v42  ;;  %v12294_v10 = vpack.c.bf16 %v12722_v42, %v12707_v26  ;;  %vm5975_vm13 = vcmask 990208  }
 0xde9   : > { %v14584_v5 = vpop.permute.xlu1 %12724  ;;  %11173 = vmatmul.mubr.msk.f32.gmra.mrb[50].mxu1 %vm1214_vm4, %v11171_v38  ;;  %v12284_v11 = vpack.c.bf16 %v8427_v35, %v8425_v58  ;;  %v12711_v34 = vunpack.i.l.bf16 %v12710_v45  ;;  %v10762_v35 = vld [vmem:[%s15259_s15] sm:$0xff]  ;;  %v11177_v58 = vld [vmem:[%s15258_s14 + $0xd8] sm:$0xff] }
 0xdea   : > { %13014 = vrot.lane.b32.xlu0 %v14427_v21, %s15373_s4  ;;  %11941 = vmatprep.mubr.msk.f32.mxu1 %vm1214_vm4, %v11170_v24  ;;  %v8616_v24 = vsel %vm8614_vm9, %v12706_v56, %v12707_v26 }
 0xdec   : > { %v14596_v25 = vpop.permute.xlu0 %12729  ;;  %13009 = vrot.lane.b32.xlu1 %v14293_v9, %s13134_s5 }
 0xded   : > { %v14600_v49 = vpop.permute.xlu1 %12734  ;;  %11942 = vmatmul.mubr.msk.f32.vlgmr.msra.gmra.mrb[46].mxu1 %vm1214_vm4, %v11171_v38  ;;  %v12290_v38 = vpack.c.bf16 %v8618_v32, %v8616_v24  ;;  %v12732_v26 = vunpack.i.h.bf16 %v14596_v25 }
 0xdee   : > { %13019 = vrot.lane.b32.xlu0 %v14267_v60, %s13134_s5  ;;  %12285 = vmatpush1.bf16.msra.mxu1 %v12284_v11  ;;  %v12712_v60 = vunpack.i.h.bf16 %v12710_v45  ;;  %v8615_v11 = vsel %vm8614_vm9, %v12711_v34, %v12706_v56  ;;  %v12717_v56 = vunpack.i.h.bf16 %v14560_v33 }
 0xdef   : > { %12287 = vmatprep.subr.bf16.mxu1 %v12286_v3  ;;  %8505 = vmatprep.mubr.f32.mxu1 %v13105_v4 }
 0xdf0   : > { %v14611_v57 = vpop.permute.xlu0 %12744  ;;  %13029 = vrot.lane.b32.xlu1 %v14293_v9, %s15374_s1  ;;  %v8617_v24 = vsel %vm8614_vm9, %v12712_v60, %v12721_v29  ;;  %v12716_v29 = vunpack.i.l.bf16 %v14560_v33  ;;  %vm7667_vm9 = vcmask 801792  }
 0xdf1   : > { %v14615_v22 = vpop.permute.xlu1 %12739  ;;  %11178 = vmatmul.mubr.msk.f32.vlgmr.msra.gmra.mrb[48].mxu1 %vm1214_vm4, %v11176_v7  ;;  %v12292_v60 = vpack.c.bf16 %v8617_v24, %v8615_v11  ;;  %v12731_v24 = vunpack.i.l.bf16 %v14596_v25 }
 0xdf2   : > { %13024 = vrot.lane.b32.xlu0 %v14427_v21, %s15374_s1  ;;  %12289 = vmatpush3.bf16.msra.mxu1 %v12286_v3  ;;  %v862_v21 = vld [vmem:[%s15255_s11] sm:$0xff]  ;;  %s772_s1 = scalar_lea.vmem %s15268_s24, %s12571_s6 }
 0xdf3   : > { %12291 = vmatprep.subr.bf16.mxu1 %v12290_v38  ;;  %8511 = vmatprep.mubr.f32.mxu1 %v13105_v4  ;;  %v10763_v38 = vld [vmem:[%s15259_s15 + $0x8] sm:$0xff]  ;;  %v8827_v62 = vsel %vm8824_vm12, %v12717_v56, %v12731_v24 }
 0xdf4   : > { %v12750_v9 = vpop.permute.xlu0 %12749  ;;  %10766 = vperm.xlu1 %12612, %v10762_v35  }
 0xdf5   : > { %v14627_v45 = vpop.permute.xlu1 %12759  ;;  %11179 = vmatmul.mubr.msk.f32.gmra.mrb[50].mxu1 %vm1214_vm4, %v11177_v58  ;;  %v12752_v3 = vunpack.i.h.bf16 %v12750_v9  ;;  %v12751_v32 = vunpack.i.l.bf16 %v12750_v9  ;;  %v8826_v9 = vsel %vm8824_vm12, %v12716_v29, %v12717_v56  ;;  %v11188_v56 = vld [vmem:[%s15258_s14 + $0xf0] sm:$0xff] }
 0xdf6   : > { %13034 = vrot.lane.b32.xlu0 %v14340_v27, %s13134_s5  ;;  %11948 = vmatprep.mubr.msk.f32.mxu1 %vm1214_vm4, %v11176_v7  ;;  %v11182_v27 = vld [vmem:[%s15258_s14 + $0xe0] sm:$0xff] }
 0xdf7   : > { %v8829_v7 = vsel %vm8824_vm12, %v12751_v32, %v12752_v3 }
 0xdf8   : > { %v12755_v34 = vpop.permute.xlu0 %12754  ;;  %865 = vperm.xlu1 %12612, %v862_v21   ;;  %v12298_v42 = vpack.c.bf16 %v8829_v7, %v8826_v9  ;;  %v12727_v21 = vunpack.i.h.bf16 %v14584_v5 }
 0xdf9   : > { %v14643_v35 = vpop.permute.xlu1 %12764  ;;  %11949 = vmatmul.mubr.msk.f32.vlgmr.msra.gmra.mrb[46].mxu1 %vm1214_vm4, %v11177_v58  ;;  %v11183_v58 = vld [vmem:[%s15258_s14 + $0xe8] sm:$0xff]  ;;  %v12757_v31 = vunpack.i.h.bf16 %v12755_v34 }
 0xdfa   : > { %10771 = vperm.xlu0 %12611, %v10763_v38   ;;  %12293 = vmatpush1.bf16.msra.mxu1 %v12292_v60  ;;  %v12726_v38 = vunpack.i.l.bf16 %v14584_v5  ;;  %v8828_v61 = vsel %vm8824_vm12, %v12727_v21, %v12751_v32  ;;  %v12737_v5 = vunpack.i.h.bf16 %v14600_v49 }
 0xdfb   : > { %12295 = vmatprep.subr.bf16.mxu1 %v12294_v10  ;;  %8695 = vmatprep.mubr.f32.mxu1 %v13105_v4 }
 0xdfc   : > { %v14651_v33 = vpop.permute.xlu0 %12774  ;;  %v8825_v25 = vsel %vm8824_vm12, %v12726_v38, %v12716_v29 }
 0xdfd   : > { %v14654_v11 = vpop.permute.xlu1 %12769  ;;  %11184 = vmatmul.mubr.msk.f32.vlgmr.msra.gmra.mrb[48].mxu1 %vm1214_vm4, %v11182_v27  ;;  %v12300_v50 = vpack.c.bf16 %v8828_v61, %v8825_v25  ;;  %v12746_v25 = vunpack.i.l.bf16 %v14611_v57 }
 0xdfe   : > { %12297 = vmatpush3.bf16.msra.mxu1 %v12294_v10  ;;  %8701 = vmatprep.mubr.f32.mxu1 %v13105_v4  ;;  %v8830_v10 = vsel %vm8824_vm12, %v12752_v3, %v12732_v26  ;;  %v12756_v3 = vunpack.i.l.bf16 %v12755_v34  ;;  %vm7857_vm12 = vcmask 670720  }
 0xdff   : > { %12299 = vmatprep.subr.bf16.mxu1 %v12298_v42  ;;  %v12736_v42 = vunpack.i.l.bf16 %v14600_v49  ;;  %v12302_v32 = vpack.c.bf16 %v8830_v10, %v8827_v62 }
 0xe00   : > { %v12785_v60 = vpop.permute.xlu0 %12784 }
 0xe01   : > { %v14665_v12 = vpop.permute.xlu1 %12779  ;;  %11185 = vmatmul.mubr.msk.f32.gmra.mrb[50].mxu1 %vm1214_vm4, %v11183_v58  ;;  %v12787_v7 = vunpack.i.h.bf16 %v12785_v60  ;;  %v12786_v9 = vunpack.i.l.bf16 %v12785_v60 }
 0xe02   : > { %11955 = vmatprep.mubr.msk.f32.mxu1 %vm1214_vm4, %v11182_v27 }
 0xe03   : > { %v9024_v49 = vsel %vm5280_vm14, %v12786_v9, %v12787_v7 }
 0xe04   : > { %v14675_v51 = vpop.permute.xlu0 %12804 }
 0xe05   : > { %v12790_v21 = vpop.permute.xlu1 %12789  ;;  %11956 = vmatmul.mubr.msk.f32.vlgmr.msra.gmra.mrb[46].mxu1 %vm1214_vm4, %v11183_v58  ;;  %v9021_v58 = vsel %vm5280_vm14, %v12736_v42, %v12737_v5 }
 0xe06   : > { %v12792_v26 = vunpack.i.h.bf16 %v12790_v21  ;;  %v12791_v27 = vunpack.i.l.bf16 %v12790_v21  ;;  %12301 = vmatpush1.bf16.msra.mxu1 %v12300_v50  ;;  %8907 = vmatprep.mubr.f32.mxu1 %v13105_v4  ;;  %v12306_v10 = vpack.c.bf16 %v9024_v49, %v9021_v58 }
 0xe07   : > { %12303 = vmatprep.subr.bf16.mxu1 %v12302_v32 }
 0xe08   : > { %v5976_v61 = vsel %vm5975_vm13, %v12756_v3, %v12791_v27  ;;  %v5978_v62 = vsel %vm5975_vm13, %v12757_v31, %v12792_v26  ;;  %v5977_v29 = vsel %vm5975_vm13, %v12791_v27, %v12616_v40  ;;  %v5979_v50 = vsel %vm5975_vm13, %v12792_v26, %v12617_v54  ;;  %v14691_v34 = vpop.permute.xlu0 %12809 }
 0xe09   : > { %v12180_v24 = vpack.c.bf16 %v5978_v62, %v5976_v61  ;;  %v14694_v38 = vpop.permute.xlu1 %12794  ;;  %v12178_v60 = vpack.c.bf16 %v5979_v50, %v5977_v29  ;;  %11190 = vmatmul.mubr.msk.f32.vlgmr.msra.gmra.mrb[48].mxu1 %vm1214_vm4, %v11188_v56  ;;  %v12742_v31 = vunpack.i.h.bf16 %v14615_v22  ;;  %v12741_v54 = vunpack.i.l.bf16 %v14615_v22 }
 0xe0a   : > { %12305 = vmatpush3.bf16.msra.mxu1 %v12302_v32  ;;  %8913 = vmatprep.mubr.f32.mxu1 %v13105_v4  ;;  %v12747_v40 = vunpack.i.h.bf16 %v14611_v57  ;;  %v12762_v57 = vunpack.i.h.bf16 %v14627_v45  ;;  %v12761_v61 = vunpack.i.l.bf16 %v14627_v45  ;;  %vm10585_vm13 = vcmask 310272  }
 0xe0b   : > { %12307 = vmatprep.subr.bf16.mxu1 %v12306_v10  ;;  %12179 = vmatprep.subr.bf16.mxu0 %v12178_v60  ;;  %v9023_v32 = vsel %vm5280_vm14, %v12742_v31, %v12786_v9  ;;  %v9020_v49 = vsel %vm5280_vm14, %v12741_v54, %v12736_v42  ;;  %v9022_v9 = vsel %vm5280_vm14, %v12737_v5, %v12746_v25  ;;  %v12772_v5 = vunpack.i.h.bf16 %v14654_v11 }
 0xe0c   : > { %v12830_v21 = vpop.permute.xlu0 %12829  ;;  %12181 = vmatpush1.bf16.msra.mxu0 %v12180_v24  ;;  %v9025_v22 = vsel %vm5280_vm14, %v12787_v7, %v12747_v40  ;;  %v12308_v62 = vpack.c.bf16 %v9023_v32, %v9020_v49  ;;  %vm6156_vm14 = vcmask 998400   ;;  %v12771_v24 = vunpack.i.l.bf16 %v14654_v11  ;;  %v11195_v40 = vld [vmem:[%s15258_s14 + $0x108] sm:$0xff] }
 0xe0d   : > { %v14705_v3 = vpop.permute.xlu1 %12799  ;;  %11191 = vmatmul.mubr.msk.f32.gmra.mrb[50].mxu1 %vm1214_vm4, %v11189_v39  ;;  %v12832_v26 = vunpack.i.h.bf16 %v12830_v21  ;;  %v12831_v27 = vunpack.i.l.bf16 %v12830_v21  ;;  %v12310_v7 = vpack.c.bf16 %v9025_v22, %v9022_v9  ;;  %v12776_v31 = vunpack.i.l.bf16 %v14651_v33 }
 0xe0e   : > { %11962 = vmatprep.mubr.msk.f32.mxu1 %vm1214_vm4, %v11188_v56  ;;  %v9216_v56 = vsel %vm5471_vm15, %v12761_v61, %v12762_v57  ;;  %v12766_v54 = vunpack.i.l.bf16 %v14643_v35  ;;  %v15375_v32 = vunpack.i.h.bf16 %v14210_v17  ;;  %v12777_v22 = vunpack.i.h.bf16 %v14651_v33 }
 0xe0f   : > { %11102 = vmatmul.mubr.msk.f32.vlgmr.msra.gmra.mrb[44].mxu0 %vm1214_vm4, %v14185_v28  ;;  %v11194_v28 = vld [vmem:[%s15258_s14 + $0x100] sm:$0xff]  ;;  %v9219_v45 = vsel %vm5471_vm15, %v12831_v27, %v12832_v26 }
 0xe10   : > { %v14716_v29 = vpop.permute.xlu0 %12834  ;;  %6062 = vmatprep.mubr.f32.mxu0 %v13105_v4  ;;  %v9220_v17 = vsel %vm5471_vm15, %v12832_v26, %v12777_v22  ;;  %v9215_v33 = vsel %vm5471_vm15, %v12766_v54, %v12761_v61 }
 0xe11   : > { %v14719_v50 = vpop.permute.xlu1 %12814  ;;  %11963 = vmatmul.mubr.msk.f32.vlgmr.msra.gmra.mrb[46].mxu1 %vm1214_vm4, %v11189_v39  ;;  %v12314_v39 = vpack.c.bf16 %v9219_v45, %v9216_v56  ;;  %v12782_v56 = vunpack.i.h.bf16 %v14665_v12 }
 0xe12   : > { %12309 = vmatpush1.bf16.msra.mxu1 %v12308_v62  ;;  %9102 = vmatprep.mubr.f32.mxu1 %v13105_v4 }
 0xe13   : > { %12311 = vmatprep.subr.bf16.mxu1 %v12310_v7  ;;  %11103 = vmatmul.mubr.msk.f32.gmra.mrb[46].mxu0 %vm1214_vm4, %v14238_v37  ;;  %v12767_v37 = vunpack.i.h.bf16 %v14643_v35 }
 0xe14   : > { %v12840_v42 = vpop.permute.xlu0 %12839  ;;  %6237 = vmatprep.mubr.f32.mxu0 %v13105_v4 }
 0xe15   : > { %v14732_v58 = vpop.permute.xlu1 %12819  ;;  %v12842_v60 = vunpack.i.h.bf16 %v12840_v42  ;;  %v12841_v10 = vunpack.i.l.bf16 %v12840_v42  ;;  %11196 = vmatmul.mubr.msk.f32.vlgmr.msra.gmra.mrb[48].mxu1 %vm1214_vm4, %v11194_v28  ;;  %v9218_v45 = vsel %vm5471_vm15, %v12767_v37, %v12831_v27  ;;  %v9217_v42 = vsel %vm5471_vm15, %v12762_v57, %v12776_v31  ;;  %v11200_v57 = vld [vmem:[%s15258_s14 + $0x110] sm:$0xff] }
 0xe16   : > { %12313 = vmatpush3.bf16.msra.mxu1 %v12310_v7  ;;  %9108 = vmatprep.mubr.f32.mxu1 %v13105_v4  ;;  %v12781_v27 = vunpack.i.l.bf16 %v14665_v12  ;;  %v12801_v37 = vunpack.i.l.bf16 %v14705_v3  ;;  %v12318_v26 = vpack.c.bf16 %v9220_v17, %v9217_v42  ;;  %vm6530_vm15 = vcmask 973824  }
 0xe17   : > { %v6159_v11 = vsel %vm6156_vm14, %v12772_v5, %v12842_v60  ;;  %v6157_v25 = vsel %vm6156_vm14, %v12771_v24, %v12841_v10  ;;  %12315 = vmatprep.subr.bf16.mxu1 %v12314_v39  ;;  %v6158_v21 = vsel %vm6156_vm14, %v12841_v10, %v12621_v53  ;;  %v6160_v35 = vsel %vm6156_vm14, %v12842_v60, %v15375_v32 }
 0xe18   : > { %v12188_v49 = vpack.c.bf16 %v6159_v11, %v6157_v25  ;;  %v14753_v62 = vpop.permute.xlu0 %12844  ;;  %v12186_v9 = vpack.c.bf16 %v6160_v35, %v6158_v21  ;;  %v12316_v24 = vpack.c.bf16 %v9218_v45, %v9215_v33  ;;  %v12802_v60 = vunpack.i.h.bf16 %v14705_v3 }
 0xe19   : > { %v14755_v7 = vpop.permute.xlu1 %12824  ;;  %11197 = vmatmul.mubr.msk.f32.gmra.mrb[50].mxu1 %vm1214_vm4, %v11195_v40  ;;  %v12847_v5 = vunpack.i.h.bf16 %v14753_v62  ;;  %v12846_v53 = vunpack.i.l.bf16 %v14753_v62  ;;  %v15377_v35 = vunpack.i.h.bf16 %v14222_v43  ;;  %v12812_v45 = vunpack.i.h.bf16 %v14691_v34 }
 0xe1a   : > { %12187 = vmatprep.subr.bf16.mxu0 %v12186_v9  ;;  %11969 = vmatprep.mubr.msk.f32.mxu1 %vm1214_vm4, %v11194_v28  ;;  %v12811_v17 = vunpack.i.l.bf16 %v14691_v34  ;;  %v15379_v34 = vunpack.i.h.bf16 %v14261_v59  ;;  %v12827_v12 = vunpack.i.h.bf16 %v14755_v7 }
 0xe1b   : > { %12189 = vmatpush1.bf16.msra.mxu0 %v12188_v49  ;;  %v9414_v61 = vsel %vm5662_vm0, %v12846_v53, %v12847_v5  ;;  %v9411_v49 = vsel %vm5662_vm0, %v12781_v27, %v12782_v56 }
 0xe1c   : > { %v12850_v10 = vpop.permute.xlu0 %12849  ;;  %v12322_v42 = vpack.c.bf16 %v9414_v61, %v9411_v49  ;;  %v12806_v61 = vunpack.i.l.bf16 %v14675_v51  ;;  %v12826_v49 = vunpack.i.l.bf16 %v14755_v7  ;;  %v12821_v7 = vunpack.i.l.bf16 %v14732_v58 }
 0xe1d   : > { %v12855_v39 = vpop.permute.xlu1 %12854  ;;  %v12852_v28 = vunpack.i.h.bf16 %v12850_v10  ;;  %v12851_v11 = vunpack.i.l.bf16 %v12850_v10  ;;  %11970 = vmatmul.mubr.msk.f32.vlgmr.msra.gmra.mrb[46].mxu1 %vm1214_vm4, %v11195_v40  ;;  %v15376_v40 = vunpack.i.l.bf16 %v14222_v43  ;;  %v12797_v43 = vunpack.i.h.bf16 %v14694_v38 }
 0xe1e   : > { %12317 = vmatpush1.bf16.msra.mxu1 %v12316_v24  ;;  %11106 = vmatmul.mubr.msk.f32.vlgmr.msra.gmra.mrb[44].mxu0 %vm1214_vm4, %v14246_v52  ;;  %v12857_v31 = vunpack.i.h.bf16 %v12855_v39  ;;  %v12856_v54 = vunpack.i.l.bf16 %v12855_v39  ;;  %v11201_v24 = vld [vmem:[%s15258_s14 + $0x118] sm:$0xff] }
 0xe1f   : > { %v6343_v3 = vsel %vm6340_vm5, %v12802_v60, %v12852_v28  ;;  %v6341_v25 = vsel %vm6340_vm5, %v12801_v37, %v12851_v11  ;;  %12319 = vmatprep.subr.bf16.mxu1 %v12318_v26  ;;  %9297 = vmatprep.mubr.f32.mxu1 %v13105_v4  ;;  %v6342_v52 = vsel %vm6340_vm5, %v12851_v11, %v15376_v40  ;;  %v15378_v60 = vunpack.i.l.bf16 %v14261_v59 }
 0xe20   : > { %v12196_v21 = vpack.c.bf16 %v6343_v3, %v6341_v25  ;;  %v14784_v32 = vpop.permute.xlu0 %12874  ;;  %v6344_v22 = vsel %vm6340_vm5, %v12852_v28, %v15377_v35  ;;  %6243 = vmatprep.mubr.f32.mxu0 %v13105_v4  ;;  %v6534_v39 = vsel %vm6530_vm15, %v12857_v31, %v15379_v34  ;;  %v12796_v37 = vunpack.i.l.bf16 %v14694_v38 }
 0xe21   : > { %v14793_v9 = vpop.permute.xlu1 %12859  ;;  %v12194_v33 = vpack.c.bf16 %v6344_v22, %v6342_v52  ;;  %11202 = vmatmul.mubr.msk.f32.vlgmr.msra.gmra.mrb[48].mxu1 %vm1214_vm4, %v11200_v57  ;;  %v6532_v10 = vsel %vm6530_vm15, %v12856_v54, %v15378_v60  ;;  %v6531_v28 = vsel %vm6530_vm15, %v12811_v17, %v12856_v54  ;;  %v9413_v38 = vsel %vm5662_vm0, %v12797_v43, %v12846_v53 }
 0xe22   : > { %12321 = vmatpush3.bf16.msra.mxu1 %v12318_v26  ;;  %11107 = vmatmul.mubr.msk.f32.gmra.mrb[46].mxu0 %vm1214_vm4, %v14276_v1  ;;  %v6533_v1 = vsel %vm6530_vm15, %v12812_v45, %v12857_v31  ;;  %v12202_v11 = vpack.c.bf16 %v6534_v39, %v6532_v10  ;;  %v12807_v26 = vunpack.i.h.bf16 %v14675_v51  ;;  %v9410_v40 = vsel %vm5662_vm0, %v12796_v37, %v12781_v27 }
 0xe23   : > { %12195 = vmatprep.subr.bf16.mxu0 %v12194_v33  ;;  %12323 = vmatprep.subr.bf16.mxu1 %v12322_v42  ;;  %v12204_v54 = vpack.c.bf16 %v6533_v1, %v6531_v28  ;;  %v12817_v53 = vunpack.i.h.bf16 %v14719_v50  ;;  %v12816_v52 = vunpack.i.l.bf16 %v14719_v50  ;;  %v11206_v50 = vld [vmem:[%s15258_s14 + $0x120] sm:$0xff]  ;;  %v12837_v42 = vunpack.i.h.bf16 %v14716_v29 }
 0xe24   : > { %12197 = vmatpush1.bf16.msra.mxu0 %v12196_v21  ;;  %v14815_v3 = vpop.permute.xlu0 %12879  ;;  %9303 = vmatprep.mubr.f32.mxu1 %v13105_v4  ;;  %v9415_v51 = vsel %vm5662_vm0, %v12847_v5, %v12807_v26  ;;  %v12324_v21 = vpack.c.bf16 %v9413_v38, %v9410_v40  ;;  %v12822_v43 = vunpack.i.h.bf16 %v14732_v58  ;;  %v15381_v28 = vunpack.i.h.bf16 %v14291_v8 }
 0xe25   : > { %v14818_v59 = vpop.permute.xlu1 %12864  ;;  %11203 = vmatmul.mubr.msk.f32.gmra.mrb[50].mxu1 %vm1214_vm4, %v11201_v24  ;;  %6421 = vmatprep.mubr.f32.mxu0 %v13105_v4  ;;  %v12882_v31 = vunpack.i.h.bf16 %v14815_v3  ;;  %v12881_v25 = vunpack.i.l.bf16 %v14815_v3  ;;  %v9607_v27 = vsel %vm9605_vm6, %v12816_v52, %v12817_v53 }
 0xe26   : > { %11976 = vmatprep.mubr.msk.f32.mxu1 %vm1214_vm4, %v11200_v57  ;;  %12203 = vmatprep.subr.bf16.mxu0 %v12202_v11  ;;  %v9412_v57 = vsel %vm5662_vm0, %v12782_v56, %v12806_v61  ;;  %vm6720_vm0 = vcmask 965632  }
 0xe27   : > { %11112 = vmatmul.mubr.msk.f32.vlgmr.msra.gmra.mrb[44].mxu0 %vm1214_vm4, %v14281_v2  ;;  %v12326_v2 = vpack.c.bf16 %v9415_v51, %v9412_v57  ;;  %v9610_v5 = vsel %vm9605_vm6, %v12881_v25, %v12882_v31  ;;  %v9609_v11 = vsel %vm9605_vm6, %v12822_v43, %v12881_v25  ;;  %v12862_v25 = vunpack.i.h.bf16 %v14793_v9 }
 0xe28   : > { %v14834_v35 = vpop.permute.xlu0 %12884  ;;  %12205 = vmatpush1.bf16.msra.mxu0 %v12204_v54  ;;  %6427 = vmatprep.mubr.f32.mxu0 %v13105_v4  ;;  %v12330_v33 = vpack.c.bf16 %v9610_v5, %v9607_v27  ;;  %v13080_v27 = vld [vmem:[%s15258_s14 + $0x40] sm:$0xff] }
 0xe29   : > { %v14840_v62 = vpop.permute.xlu1 %12869  ;;  %11977 = vmatmul.mubr.msk.f32.vlgmr.msra.gmra.mrb[46].mxu1 %vm1214_vm4, %v11201_v24  ;;  %v11207_v24 = vld [vmem:[%s15258_s14 + $0x128] sm:$0xff] }
 0xe2a   : > { %12325 = vmatpush1.bf16.msra.mxu1 %v12324_v21  ;;  %9492 = vmatprep.mubr.f32.mxu1 %v13105_v4  ;;  %v12871_v57 = vunpack.i.l.bf16 %v14840_v62 }
 0xe2b   : > { %12327 = vmatprep.subr.bf16.mxu1 %v12326_v2  ;;  %11113 = vmatmul.mubr.msk.f32.gmra.mrb[46].mxu0 %vm1214_vm4, %v14306_v16  ;;  %v12836_v16 = vunpack.i.l.bf16 %v14716_v29  ;;  %v15380_v29 = vunpack.i.l.bf16 %v14291_v8  ;;  %v9606_v8 = vsel %vm9605_vm6, %v12821_v7, %v12816_v52  ;;  %v12872_v52 = vunpack.i.h.bf16 %v14840_v62 }
 0xe2c   : > { %v12900_v56 = vpop.permute.xlu0 %12899  ;;  %6611 = vmatprep.mubr.f32.mxu0 %v13105_v4  ;;  %v12332_v54 = vpack.c.bf16 %v9609_v11, %v9606_v8  ;;  %v12887_v11 = vunpack.i.h.bf16 %v14834_v35 }
 0xe2d   : > { %v14853_v22 = vpop.permute.xlu1 %12889  ;;  %v12902_v45 = vunpack.i.h.bf16 %v12900_v56  ;;  %v12901_v17 = vunpack.i.l.bf16 %v12900_v56  ;;  %11208 = vmatmul.mubr.msk.f32.vlgmr.msra.gmra.mrb[48].mxu1 %vm1214_vm4, %v11206_v50  ;;  %v9608_v38 = vsel %vm9605_vm6, %v12817_v53, %v12836_v16 }
 0xe2e   : > { %12329 = vmatpush3.bf16.msra.mxu1 %v12326_v2  ;;  %9498 = vmatprep.mubr.f32.mxu1 %v13105_v4 }
 0xe2f   : > { %v6723_v60 = vsel %vm6720_vm0, %v12827_v12, %v12902_v45  ;;  %v6721_v10 = vsel %vm6720_vm0, %v12826_v49, %v12901_v17  ;;  %12331 = vmatprep.subr.bf16.mxu1 %v12330_v33  ;;  %11118 = vmatmul.mubr.msk.f32.vlgmr.msra.gmra.mrb[44].mxu0 %vm1214_vm4, %v14311_v23  ;;  %v6722_v34 = vsel %vm6720_vm0, %v12901_v17, %v15380_v29  ;;  %v15382_v49 = vunpack.i.l.bf16 %v14323_v18 }
 0xe30   : > { %v12212_v39 = vpack.c.bf16 %v6723_v60, %v6721_v10  ;;  %v14872_v37 = vpop.permute.xlu0 %12904  ;;  %v6724_v1 = vsel %vm6720_vm0, %v12902_v45, %v15381_v28  ;;  %6617 = vmatprep.mubr.f32.mxu0 %v13105_v4  ;;  %v9611_v23 = vsel %vm9605_vm6, %v12882_v31, %v12837_v42  ;;  %v12861_v31 = vunpack.i.l.bf16 %v14793_v9 }
 0xe31   : > { %v14878_v58 = vpop.permute.xlu1 %12894  ;;  %v12210_v26 = vpack.c.bf16 %v6724_v1, %v6722_v34  ;;  %11209 = vmatmul.mubr.msk.f32.gmra.mrb[50].mxu1 %vm1214_vm4, %v11207_v24  ;;  %v12907_v61 = vunpack.i.h.bf16 %v14872_v37  ;;  %v12906_v3 = vunpack.i.l.bf16 %v14872_v37  ;;  %v12334_v40 = vpack.c.bf16 %v9611_v23, %v9608_v38  ;;  %v13082_v37 = vld [vmem:[%s15258_s14 + $0x50] sm:$0xff] }
 0xe32   : > { %11983 = vmatprep.mubr.msk.f32.mxu1 %vm1214_vm4, %v11206_v50  ;;  %v15383_v42 = vunpack.i.h.bf16 %v14323_v18  ;;  %v9803_v43 = vsel %vm9801_vm1, %v12861_v31, %v12862_v25  ;;  %v12876_v10 = vunpack.i.l.bf16 %v14784_v32  ;;  %v12867_v29 = vunpack.i.h.bf16 %v14818_v59  ;;  %v11213_v18 = vld [vmem:[%s15258_s14 + $0x138] sm:$0xff] }
 0xe33   : > { %12211 = vmatprep.subr.bf16.mxu0 %v12210_v26  ;;  %11119 = vmatmul.mubr.msk.f32.gmra.mrb[46].mxu0 %vm1214_vm4, %v14334_v20  ;;  %v11212_v20 = vld [vmem:[%s15258_s14 + $0x130] sm:$0xff]  ;;  %v9806_v53 = vsel %vm9801_vm1, %v12906_v3, %v12907_v61  ;;  %v15384_v34 = vunpack.i.l.bf16 %v14350_v30  ;;  %v15385_v28 = vunpack.i.h.bf16 %v14350_v30  ;;  %v12886_v26 = vunpack.i.l.bf16 %v14834_v35 }
 0xe34   : > { %12213 = vmatpush1.bf16.msra.mxu0 %v12212_v39  ;;  %v12910_v51 = vpop.permute.xlu0 %12909  ;;  %6801 = vmatprep.mubr.f32.mxu0 %v13105_v4  ;;  %v12338_v60 = vpack.c.bf16 %v9806_v53, %v9803_v43  ;;  %v12866_v23 = vunpack.i.l.bf16 %v14818_v59  ;;  %v12877_v38 = vunpack.i.h.bf16 %v14784_v32  ;;  %v9805_v30 = vsel %vm9801_vm1, %v12867_v29, %v12906_v3  ;;  %v13081_v59 = vld [vmem:[%s15258_s14 + $0x48] sm:$0xff] }
 0xe35   : > { %v12915_v21 = vpop.permute.xlu1 %12914  ;;  %v12912_v2 = vunpack.i.h.bf16 %v12910_v51  ;;  %v12911_v50 = vunpack.i.l.bf16 %v12910_v51  ;;  %11984 = vmatmul.mubr.msk.f32.vlgmr.msra.gmra.mrb[46].mxu1 %vm1214_vm4, %v11207_v24  ;;  %v12891_v53 = vunpack.i.l.bf16 %v14853_v22  ;;  %v12897_v43 = vunpack.i.h.bf16 %v14878_v58 }
 0xe36   : > { %12333 = vmatpush1.bf16.msra.mxu1 %v12332_v54  ;;  %9688 = vmatprep.mubr.f32.mxu1 %v13105_v4  ;;  %v12917_v5 = vunpack.i.h.bf16 %v12915_v21  ;;  %v12916_v12 = vunpack.i.l.bf16 %v12915_v21  ;;  %v9807_v3 = vsel %vm9801_vm1, %v12907_v61, %v12877_v38 }
 0xe37   : > { %v6913_v56 = vsel %vm6910_vm2, %v12872_v52, %v12912_v2  ;;  %v6911_v62 = vsel %vm6910_vm2, %v12871_v57, %v12911_v50  ;;  %12335 = vmatprep.subr.bf16.mxu1 %v12334_v40  ;;  %11124 = vmatmul.mubr.msk.f32.vlgmr.msra.gmra.mrb[44].mxu0 %vm1214_vm4, %v13080_v27  ;;  %v6912_v45 = vsel %vm6910_vm2, %v12911_v50, %v15382_v49  ;;  %v12892_v50 = vunpack.i.h.bf16 %v14853_v22  ;;  %v11218_v22 = vld [vmem:[%s15258_s14 + $0x140] sm:$0xff] }
 0xe38   : > { %v12220_v17 = vpack.c.bf16 %v6913_v56, %v6911_v62  ;;  %v14912_v33 = vpop.permute.xlu0 %12924  ;;  %v6914_v16 = vsel %vm6910_vm2, %v12912_v2, %v15383_v42  ;;  %6807 = vmatprep.mubr.f32.mxu0 %v13105_v4  ;;  %v7101_v39 = vsel %vm4348_vm8, %v12916_v12, %v15384_v34  ;;  %v7103_v1 = vsel %vm4348_vm8, %v12917_v5, %v15385_v28  ;;  %v13083_v42 = vld [vmem:[%s15258_s14 + $0x58] sm:$0xff] }
 0xe39   : > { %v14921_v24 = vpop.permute.xlu1 %12919  ;;  %v12218_v7 = vpack.c.bf16 %v6914_v16, %v6912_v45  ;;  %11214 = vmatmul.mubr.msk.f32.vlgmr.msra.gmra.mrb[48].mxu1 %vm1214_vm4, %v11212_v20  ;;  %v12226_v8 = vpack.c.bf16 %v7103_v1, %v7101_v39  ;;  %v7102_v21 = vsel %vm4348_vm8, %v12887_v11, %v12917_v5  ;;  %v9802_v52 = vsel %vm9801_vm1, %v12866_v23, %v12861_v31 }
 0xe3a   : > { %12337 = vmatpush3.bf16.msra.mxu1 %v12334_v40  ;;  %9694 = vmatprep.mubr.f32.mxu1 %v13105_v4  ;;  %v7100_v40 = vsel %vm4348_vm8, %v12886_v26, %v12916_v12  ;;  %v9804_v57 = vsel %vm9801_vm1, %v12862_v25, %v12876_v10  ;;  %v12340_v2 = vpack.c.bf16 %v9805_v30, %v9802_v52  ;;  %vm9997_vm8 = vcmask 334848   ;;  %v13084_v26 = vld [vmem:[%s15258_s14 + $0x60] sm:$0xff] }
 0xe3b   : > { %12219 = vmatprep.subr.bf16.mxu0 %v12218_v7  ;;  %12339 = vmatprep.subr.bf16.mxu1 %v12338_v60  ;;  %v12228_v5 = vpack.c.bf16 %v7102_v21, %v7100_v40  ;;  %v12342_v9 = vpack.c.bf16 %v9807_v3, %v9804_v57  ;;  %v12927_v25 = vunpack.i.h.bf16 %v14912_v33  ;;  %v12922_v31 = vunpack.i.h.bf16 %v14921_v24 }
 0xe3c   : > { %12221 = vmatpush1.bf16.msra.mxu0 %v12220_v17  ;;  %v14940_v54 = vpop.permute.xlu0 %12944  ;;  %v9999_v62 = vsel %vm9997_vm8, %v12891_v53, %v12892_v50  ;;  %v12921_v49 = vunpack.i.l.bf16 %v14921_v24  ;;  %v12896_v7 = vunpack.i.l.bf16 %v14878_v58  ;;  %v11219_v24 = vld [vmem:[%s15258_s14 + $0x148] sm:$0xff]  ;;  %v12926_v60 = vunpack.i.l.bf16 %v14912_v33 }
 0xe3d   : > { %v14942_v51 = vpop.permute.xlu1 %12929  ;;  %11125 = vmatmul.mubr.msk.f32.gmra.mrb[46].mxu0 %vm1214_vm4, %v13081_v59  ;;  %11215 = vmatmul.mubr.msk.f32.gmra.mrb[50].mxu1 %vm1214_vm4, %v11213_v18  ;;  %v12947_v32 = vunpack.i.h.bf16 %v14940_v54  ;;  %v12946_v35 = vunpack.i.l.bf16 %v14940_v54  ;;  %v15387_v28 = vunpack.i.h.bf16 %v14374_v36 }
 0xe3e   : > { %6991 = vmatprep.mubr.f32.mxu0 %v13105_v4  ;;  %11990 = vmatprep.mubr.msk.f32.mxu1 %vm1214_vm4, %v11212_v20  ;;  %v12932_v38 = vunpack.i.h.bf16 %v14942_v51  ;;  %v9998_v40 = vsel %vm9997_vm8, %v12896_v7, %v12891_v53  ;;  %v10000_v21 = vsel %vm9997_vm8, %v12892_v50, %v12926_v60  ;;  %v15391_v7 = vunpack.i.h.bf16 %v14422_v19 }
 0xe3f   : > { %12227 = vmatprep.subr.bf16.mxu0 %v12226_v8  ;;  %v10002_v61 = vsel %vm9997_vm8, %v12946_v35, %v12947_v32  ;;  %v10001_v33 = vsel %vm9997_vm8, %v12897_v43, %v12946_v35  ;;  %v10003_v8 = vsel %vm9997_vm8, %v12947_v32, %v12927_v25 }
 0xe40   : > { %v14965_v12 = vpop.permute.xlu0 %12949  ;;  %v12346_v16 = vpack.c.bf16 %v10002_v61, %v9999_v62  ;;  %v12348_v59 = vpack.c.bf16 %v10001_v33, %v9998_v40  ;;  %v12350_v52 = vpack.c.bf16 %v10003_v8, %v10000_v21 }
 0xe41   : > { %v14967_v20 = vpop.permute.xlu1 %12934  ;;  %11130 = vmatmul.mubr.msk.f32.vlgmr.msra.gmra.mrb[44].mxu0 %vm1214_vm4, %v13082_v37  ;;  %11991 = vmatmul.mubr.msk.f32.vlgmr.msra.gmra.mrb[46].mxu1 %vm1214_vm4, %v11213_v18  ;;  %v15386_v18 = vunpack.i.l.bf16 %v14374_v36  ;;  %v12931_v36 = vunpack.i.l.bf16 %v14942_v51  ;;  %v13085_v37 = vld [vmem:[%s15258_s14 + $0x68] sm:$0xff]  ;;  %v11230_v51 = vld [vmem:[%s15258_s14 + $0x160] sm:$0xff] }
 0xe42   : > { %12341 = vmatpush1.bf16.msra.mxu1 %v12340_v2  ;;  %12229 = vmatpush1.bf16.msra.mxu0 %v12228_v5 }
 0xe43   : > { %12343 = vmatprep.subr.bf16.mxu1 %v12342_v9  ;;  %6997 = vmatprep.mubr.f32.mxu0 %v13105_v4 }
 0xe44   : > { %v12955_v56 = vpop.permute.xlu0 %12954  ;;  %9884 = vmatprep.mubr.f32.mxu1 %v13105_v4 }
 0xe45   : > { %v12940_v27 = vpop.permute.xlu1 %12939  ;;  %v12957_v45 = vunpack.i.h.bf16 %v12955_v56  ;;  %v12956_v17 = vunpack.i.l.bf16 %v12955_v56  ;;  %11131 = vmatmul.mubr.msk.f32.gmra.mrb[46].mxu0 %vm1214_vm4, %v13083_v42  ;;  %11220 = vmatmul.mubr.msk.f32.vlgmr.msra.gmra.mrb[48].mxu1 %vm1214_vm4, %v11218_v22  ;;  %v15388_v56 = vunpack.i.l.bf16 %v14398_v55 }
 0xe46   : > { %12345 = vmatpush3.bf16.msra.mxu1 %v12342_v9  ;;  %7180 = vmatprep.mubr.f32.mxu0 %v13105_v4  ;;  %v12942_v32 = vunpack.i.h.bf16 %v12940_v27  ;;  %v12941_v35 = vunpack.i.l.bf16 %v12940_v27  ;;  %v11224_v9 = vld [vmem:[%s15258_s14 + $0x150] sm:$0xff] }
 0xe47   : > { %v7291_v10 = vsel %vm4175_vm7, %v12922_v31, %v12957_v45  ;;  %v7289_v29 = vsel %vm4175_vm7, %v12921_v49, %v12956_v17  ;;  %12347 = vmatprep.subr.bf16.mxu1 %v12346_v16  ;;  %9890 = vmatprep.mubr.f32.mxu1 %v13105_v4  ;;  %v7290_v58 = vsel %vm4175_vm7, %v12956_v17, %v15386_v18  ;;  %v15390_v16 = vunpack.i.l.bf16 %v14422_v19  ;;  %v11225_v19 = vld [vmem:[%s15258_s14 + $0x158] sm:$0xff] }
 0xe48   : > { %v12236_v34 = vpack.c.bf16 %v7291_v10, %v7289_v29  ;;  %v15002_v39 = vpop.permute.xlu0 %12959  ;;  %v7292_v1 = vsel %vm4175_vm7, %v12957_v45, %v15387_v28  ;;  %vm10193_vm7 = vcmask 326656   ;;  %v15389_v45 = vunpack.i.h.bf16 %v14398_v55  ;;  %v13086_v29 = vld [vmem:[%s15258_s14 + $0x70] sm:$0xff] }
 0xe49   : > { %v15007_v11 = vpop.permute.xlu1 %12974  ;;  %11136 = vmatmul.mubr.msk.f32.vlgmr.msra.gmra.mrb[44].mxu0 %vm1214_vm4, %v13084_v26  ;;  %v12234_v23 = vpack.c.bf16 %v7292_v1, %v7290_v58  ;;  %11221 = vmatmul.mubr.msk.f32.gmra.mrb[50].mxu1 %vm1214_vm4, %v11219_v24  ;;  %v12962_v54 = vunpack.i.h.bf16 %v15002_v39  ;;  %v12961_v30 = vunpack.i.l.bf16 %v15002_v39  ;;  %v12952_v58 = vunpack.i.h.bf16 %v14965_v12  ;;  %v13088_v39 = vld [vmem:[%s15258_s14 + $0x80] sm:$0xff] }
 0xe4a   : > { %7186 = vmatprep.mubr.f32.mxu0 %v13105_v4  ;;  %11997 = vmatprep.mubr.msk.f32.mxu1 %vm1214_vm4, %v11218_v22  ;;  %v10195_v22 = vsel %vm10193_vm7, %v12931_v36, %v12932_v38  ;;  %v12936_v28 = vunpack.i.l.bf16 %v14967_v20 }
 0xe4b   : > { %12235 = vmatprep.subr.bf16.mxu0 %v12234_v23  ;;  %v10198_v61 = vsel %vm10193_vm7, %v12961_v30, %v12962_v54  ;;  %v12951_v23 = vunpack.i.l.bf16 %v14965_v12 }
 0xe4c   : > { %12237 = vmatpush1.bf16.msra.mxu0 %v12236_v34  ;;  %v12965_v3 = vpop.permute.xlu0 %12964  ;;  %v12354_v18 = vpack.c.bf16 %v10198_v61, %v10195_v22  ;;  %v12937_v34 = vunpack.i.h.bf16 %v14967_v20 }
 0xe4d   : > { %v12980_v57 = vpop.permute.xlu1 %12979  ;;  %v12967_v2 = vunpack.i.h.bf16 %v12965_v3  ;;  %v12966_v5 = vunpack.i.l.bf16 %v12965_v3  ;;  %11137 = vmatmul.mubr.msk.f32.gmra.mrb[46].mxu0 %vm1214_vm4, %v13085_v37  ;;  %11998 = vmatmul.mubr.msk.f32.vlgmr.msra.gmra.mrb[46].mxu1 %vm1214_vm4, %v11219_v24  ;;  %v12977_v3 = vunpack.i.h.bf16 %v15007_v11 }
 0xe4e   : > { %v12982_v53 = vunpack.i.h.bf16 %v12980_v57  ;;  %v12981_v50 = vunpack.i.l.bf16 %v12980_v57  ;;  %12349 = vmatpush1.bf16.msra.mxu1 %v12348_v59  ;;  %7369 = vmatprep.mubr.f32.mxu0 %v13105_v4  ;;  %v10197_v40 = vsel %vm10193_vm7, %v12937_v34, %v12961_v30  ;;  %v13087_v59 = vld [vmem:[%s15258_s14 + $0x78] sm:$0xff]  ;;  %v10199_v30 = vsel %vm10193_vm7, %v12962_v54, %v12952_v58 }
 0xe4f   : > { %v7480_v25 = vsel %vm4529_vm10, %v12942_v32, %v12967_v2  ;;  %v7478_v31 = vsel %vm4529_vm10, %v12941_v35, %v12966_v5  ;;  %12351 = vmatprep.subr.bf16.mxu1 %v12350_v52  ;;  %10080 = vmatprep.mubr.f32.mxu1 %v13105_v4  ;;  %v7479_v62 = vsel %vm4529_vm10, %v12966_v5, %v15388_v56  ;;  %v13089_v56 = vld [vmem:[%s15258_s14 + $0x88] sm:$0xff] }
 0xe50   : > { %v12244_v27 = vpack.c.bf16 %v7480_v25, %v7478_v31  ;;  %v12970_v49 = vpop.permute.xlu0 %12969  ;;  %v7481_v17 = vsel %vm4529_vm10, %v12967_v2, %v15389_v45  ;;  %v7669_v43 = vsel %vm7667_vm9, %v12981_v50, %v15390_v16  ;;  %v7671_v24 = vsel %vm7667_vm9, %v12982_v53, %v15391_v7 }
 0xe51   : > { %v15050_v42 = vpop.permute.xlu1 %12984  ;;  %v12972_v60 = vunpack.i.h.bf16 %v12970_v49  ;;  %v12971_v10 = vunpack.i.l.bf16 %v12970_v49  ;;  %11142 = vmatmul.mubr.msk.f32.vlgmr.msra.gmra.mrb[44].mxu0 %vm1214_vm4, %v13086_v29  ;;  %v12242_v55 = vpack.c.bf16 %v7481_v17, %v7479_v62  ;;  %11226 = vmatmul.mubr.msk.f32.vlgmr.msra.gmra.mrb[48].mxu1 %vm1214_vm4, %v11224_v9  ;;  %v12250_v26 = vpack.c.bf16 %v7671_v24, %v7669_v43 }
 0xe52   : > { %12353 = vmatpush3.bf16.msra.mxu1 %v12350_v52  ;;  %7375 = vmatprep.mubr.f32.mxu0 %v13105_v4  ;;  %v10194_v35 = vsel %vm10193_vm7, %v12936_v28, %v12931_v36  ;;  %v12976_v52 = vunpack.i.l.bf16 %v15007_v11  ;;  %vm10389_vm10 = vcmask 318464   ;;  %v10196_v5 = vsel %vm10193_vm7, %v12932_v38, %v12951_v23 }
 0xe53   : > { %12243 = vmatprep.subr.bf16.mxu0 %v12242_v55  ;;  %12355 = vmatprep.subr.bf16.mxu1 %v12354_v18  ;;  %v7668_v1 = vsel %vm7667_vm9, %v12971_v10, %v12981_v50  ;;  %v7670_v33 = vsel %vm7667_vm9, %v12972_v60, %v12982_v53  ;;  %v12356_v57 = vpack.c.bf16 %v10197_v40, %v10194_v35  ;;  %v12987_v62 = vunpack.i.h.bf16 %v15050_v42  ;;  %v13090_v55 = vld [vmem:[%s15258_s14 + $0x90] sm:$0xff] }
 0xe54   : > { %12245 = vmatpush1.bf16.msra.mxu0 %v12244_v27  ;;  %v15073_v8 = vpop.permute.xlu0 %12994  ;;  %10086 = vmatprep.mubr.f32.mxu1 %v13105_v4  ;;  %v12252_v32 = vpack.c.bf16 %v7670_v33, %v7668_v1  ;;  %v12358_v36 = vpack.c.bf16 %v10199_v30, %v10196_v5  ;;  %v10391_v54 = vsel %vm10389_vm10, %v12976_v52, %v12977_v3  ;;  %v11231_v27 = vld [vmem:[%s15258_s14 + $0x168] sm:$0xff]  ;;  %v12986_v45 = vunpack.i.l.bf16 %v15050_v42  ;;  %v11236_v30 = vld [vmem:[%s15258_s14 + $0x170] sm:$0xff] }
 0xe55   : > { %v12997_v21 = vunpack.i.h.bf16 %v15073_v8  ;;  %v12996_v20 = vunpack.i.l.bf16 %v15073_v8  ;;  %11143 = vmatmul.mubr.msk.f32.gmra.mrb[46].mxu0 %vm1214_vm4, %v13087_v59  ;;  %11227 = vmatmul.mubr.msk.f32.gmra.mrb[50].mxu1 %vm1214_vm4, %v11225_v19  ;;  %v12990_v12 = vpop.permute.xlu1 %12989  ;;  %v15392_v43 = vunpack.i.l.bf16 %v14450_v48  ;;  %v15393_v29 = vunpack.i.h.bf16 %v14450_v48  ;;  %v13091_v59 = vld [vmem:[%s15258_s14 + $0x98] sm:$0xff] }
 0xe56   : > { %7558 = vmatprep.mubr.f32.mxu0 %v13105_v4  ;;  %12004 = vmatprep.mubr.msk.f32.mxu1 %vm1214_vm4, %v11224_v9  ;;  %v12992_v37 = vunpack.i.h.bf16 %v12990_v12  ;;  %v12991_v53 = vunpack.i.l.bf16 %v12990_v12  ;;  %v10390_v1 = vsel %vm10389_vm10, %v12986_v45, %v12976_v52 }
 0xe57   : > { %12251 = vmatprep.subr.bf16.mxu0 %v12250_v26  ;;  %v10394_v11 = vsel %vm10389_vm10, %v12996_v20, %v12997_v21  ;;  %v10393_v24 = vsel %vm10389_vm10, %v12987_v62, %v12996_v20 }
 0xe58   : > { %v13000_v2 = vpop.permute.xlu0 %12999  ;;  %v12362_v9 = vpack.c.bf16 %v10394_v11, %v10391_v54  ;;  %v12364_v33 = vpack.c.bf16 %v10393_v24, %v10390_v1 }
 0xe59   : > { %11148 = vmatmul.mubr.msk.f32.vlgmr.msra.gmra.mrb[44].mxu0 %vm1214_vm4, %v13088_v39  ;;  %12005 = vmatmul.mubr.msk.f32.vlgmr.msra.gmra.mrb[46].mxu1 %vm1214_vm4, %v11225_v19  ;;  %v13002_v22 = vunpack.i.h.bf16 %v13000_v2  ;;  %v13001_v61 = vunpack.i.l.bf16 %v13000_v2 }
 0xe5a   : > { %12357 = vmatpush1.bf16.msra.mxu1 %v12356_v57  ;;  %12253 = vmatpush1.bf16.msra.mxu0 %v12252_v32  ;;  %v15108_v38 = vpop.permute.xlu1 %13004  ;;  %v15394_v57 = vunpack.i.l.bf16 %v14474_v6 }
 0xe5b   : > { %12359 = vmatprep.subr.bf16.mxu1 %v12358_v36  ;;  %7564 = vmatprep.mubr.f32.mxu0 %v13105_v4  ;;  %v10392_v58 = vsel %vm10389_vm10, %v12977_v3, %v13001_v61  ;;  %v10395_v34 = vsel %vm10389_vm10, %v12997_v21, %v13002_v22  ;;  %v13007_v26 = vunpack.i.h.bf16 %v15108_v38  ;;  %v13006_v23 = vunpack.i.l.bf16 %v15108_v38  ;;  %v13092_v38 = vld [vmem:[%s15258_s14 + $0xa0] sm:$0xff] }
 0xe5c   : > { %v13015_v50 = vpop.permute.xlu0 %13014  ;;  %10276 = vmatprep.mubr.f32.mxu1 %v13105_v4  ;;  %v12366_v40 = vpack.c.bf16 %v10395_v34, %v10392_v58 }
 0xe5d   : > { %v13017_v25 = vunpack.i.h.bf16 %v13015_v50  ;;  %v13016_v31 = vunpack.i.l.bf16 %v13015_v50  ;;  %11149 = vmatmul.mubr.msk.f32.gmra.mrb[46].mxu0 %vm1214_vm4, %v13089_v56  ;;  %11232 = vmatmul.mubr.msk.f32.vlgmr.msra.gmra.mrb[48].mxu1 %vm1214_vm4, %v11230_v51 }
 0xe5e   : > { %12361 = vmatpush3.bf16.msra.mxu1 %v12358_v36  ;;  %7748 = vmatprep.mubr.f32.mxu0 %v13105_v4  ;;  %v15123_v49 = vpop.permute.xlu1 %13009  ;;  %v15395_v36 = vunpack.i.h.bf16 %v14474_v6  ;;  %v11237_v6 = vld [vmem:[%s15258_s14 + $0x178] sm:$0xff] }
 0xe5f   : > { %v7860_v17 = vsel %vm7857_vm12, %v12992_v37, %v13017_v25  ;;  %v7858_v16 = vsel %vm7857_vm12, %v12991_v53, %v13016_v31  ;;  %12363 = vmatprep.subr.bf16.mxu1 %v12362_v9  ;;  %10282 = vmatprep.mubr.f32.mxu1 %v13105_v4  ;;  %v7859_v7 = vsel %vm7857_vm12, %v13016_v31, %v15392_v43  ;;  %v13012_v9 = vunpack.i.h.bf16 %v15123_v49  ;;  %v13095_v43 = vld [vmem:[%s15258_s14 + $0xb8] sm:$0xff] }
 0xe60   : > { %v12260_v60 = vpack.c.bf16 %v7860_v17, %v7858_v16  ;;  %v15133_v10 = vpop.permute.xlu0 %13019  ;;  %v7861_v42 = vsel %vm7857_vm12, %v13017_v25, %v15393_v29  ;;  %v13011_v22 = vunpack.i.l.bf16 %v15123_v49  ;;  %v13093_v25 = vld [vmem:[%s15258_s14 + $0xa8] sm:$0xff]  ;;  %v13094_v49 = vld [vmem:[%s15258_s14 + $0xb0] sm:$0xff]  ;;  %v11242_v17 = vld [vmem:[%s15258_s14 + $0x180] sm:$0xff] }
 0xe61   : > { %11154 = vmatmul.mubr.msk.f32.vlgmr.msra.gmra.mrb[44].mxu0 %vm1214_vm4, %v13090_v55  ;;  %v12258_v18 = vpack.c.bf16 %v7861_v42, %v7859_v7  ;;  %11233 = vmatmul.mubr.msk.f32.gmra.mrb[50].mxu1 %vm1214_vm4, %v11231_v27  ;;  %v13022_v19 = vunpack.i.h.bf16 %v15133_v10  ;;  %v13021_v48 = vunpack.i.l.bf16 %v15133_v10  ;;  %v11243_v7 = vld [vmem:[%s15258_s14 + $0x188] sm:$0xff] }
 0xe62   : > { %7754 = vmatprep.mubr.f32.mxu0 %v13105_v4  ;;  %12011 = vmatprep.mubr.msk.f32.mxu1 %vm1214_vm4, %v11230_v51  ;;  %v13030_v28 = vpop.permute.xlu1 %13029  ;;  %v10587_v51 = vsel %vm10585_vm13, %v13006_v23, %v13007_v26  ;;  %v10586_v62 = vsel %vm10585_vm13, %v13011_v22, %v13006_v23 }
 0xe63   : > { %12259 = vmatprep.subr.bf16.mxu0 %v12258_v18  ;;  %v13032_v12 = vunpack.i.h.bf16 %v13030_v28  ;;  %v13031_v32 = vunpack.i.l.bf16 %v13030_v28  ;;  %v10590_v35 = vsel %vm10585_vm13, %v13021_v48, %v13022_v19  ;;  %v10589_v61 = vsel %vm10585_vm13, %v13012_v9, %v13021_v48 }
 0xe64   : > { %12261 = vmatpush1.bf16.msra.mxu0 %v12260_v60  ;;  %v13025_v8 = vpop.permute.xlu0 %13024  ;;  %v12370_v37 = vpack.c.bf16 %v10590_v35, %v10587_v51 }
 0xe65   : > { %v13027_v21 = vunpack.i.h.bf16 %v13025_v8  ;;  %v13026_v20 = vunpack.i.l.bf16 %v13025_v8  ;;  %11155 = vmatmul.mubr.msk.f32.gmra.mrb[46].mxu0 %vm1214_vm4, %v13091_v59  ;;  %12012 = vmatmul.mubr.msk.f32.vlgmr.msra.gmra.mrb[46].mxu1 %vm1214_vm4, %v11231_v27  ;;  %v12372_v27 = vpack.c.bf16 %v10589_v61, %v10586_v62 }
 0xe66   : > { %12365 = vmatpush1.bf16.msra.mxu1 %v12364_v33  ;;  %7938 = vmatprep.mubr.f32.mxu0 %v13105_v4 }
 0xe67   : > { %12367 = vmatprep.subr.bf16.mxu1 %v12366_v40  ;;  %v8047_v3 = vsel %vm4716_vm11, %v13031_v32, %v13026_v20  ;;  %v8049_v52 = vsel %vm4716_vm11, %v13032_v12, %v13027_v21  ;;  %10472 = vmatprep.mubr.f32.mxu1 %v13105_v4  ;;  %v8048_v2 = vsel %vm4716_vm11, %v13026_v20, %v15394_v57 }
 0xe68   : > { %v12268_v5 = vpack.c.bf16 %v8049_v52, %v8047_v3  ;;  %v13035_v39 = vpop.permute.xlu0 %13034  ;;  %v8050_v11 = vsel %vm4716_vm11, %v13027_v21, %v15395_v36 }
 0xe69   : > { %11160 = vmatmul.mubr.msk.f32.vlgmr.msra.gmra.mrb[44].mxu0 %vm1214_vm4, %v13092_v38  ;;  %v12266_v54 = vpack.c.bf16 %v8050_v11, %v8048_v2  ;;  %11238 = vmatmul.mubr.msk.f32.vlgmr.msra.gmra.mrb[48].mxu1 %vm1214_vm4, %v11236_v30  ;;  %v13037_v53 = vunpack.i.h.bf16 %v13035_v39  ;;  %v13036_v50 = vunpack.i.l.bf16 %v13035_v39 }
 0xe6a   : > { %12369 = vmatpush3.bf16.msra.mxu1 %v12366_v40  ;;  %7944 = vmatprep.mubr.f32.mxu0 %v13105_v4 }
 0xe6b   : > { %12267 = vmatprep.subr.bf16.mxu0 %v12266_v54  ;;  %12371 = vmatprep.subr.bf16.mxu1 %v12370_v37  ;;  %v10588_v31 = vsel %vm10585_vm13, %v13007_v26, %v13036_v50  ;;  %v10591_v56 = vsel %vm10585_vm13, %v13022_v19, %v13037_v53 }
 0xe6c   : > { %10478 = vmatprep.mubr.f32.mxu1 %v13105_v4  ;;  %12269 = vmatpush1.bf16.msra.mxu0 %v12268_v5  ;;  %v12374_v45 = vpack.c.bf16 %v10591_v56, %v10588_v31 }
 0xe6d   : > { %11161 = vmatmul.mubr.msk.f32.gmra.mrb[46].mxu0 %vm1214_vm4, %v13093_v25  ;;  %11239 = vmatmul.mubr.msk.f32.gmra.mrb[50].mxu1 %vm1214_vm4, %v11237_v6 }
 0xe6e   : > { %8127 = vmatprep.mubr.f32.mxu0 %v13105_v4  ;;  %12018 = vmatprep.mubr.msk.f32.mxu1 %vm1214_vm4, %v11236_v30 }
 0xe71   : > { %11166 = vmatmul.mubr.msk.f32.vlgmr.msra.gmra.mrb[44].mxu0 %vm1214_vm4, %v13094_v49  ;;  %12019 = vmatmul.mubr.msk.f32.vlgmr.msra.gmra.mrb[46].mxu1 %vm1214_vm4, %v11237_v6 }
 0xe72   : > { %12373 = vmatpush1.bf16.msra.mxu1 %v12372_v27  ;;  %8133 = vmatprep.mubr.f32.mxu0 %v13105_v4 }
 0xe73   : > { %12375 = vmatprep.subr.bf16.mxu1 %v12374_v45  ;;  %10668 = vmatprep.mubr.f32.mxu1 %v13105_v4  ;;  %v10767_v16 = vpop.permute.xlu1 %10766 }
 0xe75   : > { %11167 = vmatmul.mubr.msk.f32.gmra.mrb[46].mxu0 %vm1214_vm4, %v13095_v43  ;;  %11244 = vmatmul.mubr.msk.f32.vlgmr.msra.gmra.mrb[48].mxu1 %vm1214_vm4, %v11242_v17 }
 0xe76   : > { %12377 = vmatpush3.bf16.msra.mxu1 %v12374_v45  ;;  %10674 = vmatprep.mubr.f32.mxu1 %v13105_v4 }
 0xe77   : > { %v866_v24 = vpop.permute.xlu1 %865 }
 0xe78   : > { %v947_v60 = vadd.f32 %v13475_v46, %v866_v24  ;;  %v949_v10 = vadd.f32 %v13477_v47, %v866_v24  ;;  %v1018_v29 = vadd.f32 %v13473_v44, %v866_v24 }
 0xe79   : > { %11245 = vmatmul.mubr.msk.f32.gmra.mrb[50].mxu1 %vm1214_vm4, %v11243_v7  ;;  %v10772_v40 = vpop.permute.xlu0 %10771 }
 0xe7a   : > { %v1021_v42 = vmax.f32 %v947_v60, 0.0  ;;  %v1022_v4 = vmax.f32 %v949_v10, 0.0  ;;  %v1023_v55 = vmax.f32 %v1018_v29, 0.0  ;;  %12025 = vmatprep.mubr.msk.f32.mxu1 %vm1214_vm4, %v11242_v17 }
 0xe7c   : > { %1024 = vst [vmem:[%s772_s1] sm:$0xff] %v1021_v42  ;;  %1025 = vst [vmem:[%s772_s1 + $0x8] sm:$0xff] %v1022_v4 }
 0xe7d   : > { %1027 = vst.msk [vmem:[%s772_s1 + $0x10] sm:$0xff] %vm1026_vm3, %v1023_v55  ;;  %12026 = vmatmul.mubr.msk.f32.vlgmr.msra.gmra.mrb[46].mxu1 %vm1214_vm4, %v11243_v7 }
 0xf44   : > { %v8129_v46 = vpop.f32.mrb[44].mxu0 }
 0xf45   : > { %v8131_v44 = vpop.f32.mrb[45].mxu0 }
 0xf48   : > { %v8135_v47 = vpop.f32.mrb[46].mxu0  ;;  %v10670_v18 = vpop.f32.mrb[48].mxu1 }
 0xf49   : > { %v8137_v58 = vpop.f32.mrb[47].mxu0  ;;  %v12378_v34 = vadd.f32 %v10670_v18, %v8129_v46  ;;  %v10672_v19 = vpop.f32.mrb[49].mxu1 }
 0xf4a   : > { %v12379_v48 = vadd.f32 %v10672_v19, %v8131_v44 }
 0xf4b   : > { %v10774_v28 = vadd.f32 %v12378_v34, %v10767_v16 }
 0xf4c   : > { %v10775_v1 = vadd.f32 %v12379_v48, %v10767_v16  ;;  %v10676_v33 = vpop.f32.mrb[50].mxu1 }
 0xf4d   : > { %v10786_v26 = vmin.f32 %v10774_v28, 0.0  ;;  %v12380_v23 = vadd.f32 %v10676_v33, %v8135_v47  ;;  %v10678_v8 = vpop.f32.mrb[51].mxu1  ;;  %vm10780_vm4 = vcmp.gt.f32.partialorder %v10774_v28, 0.0 }
 0xf4e   : > { %v10787_v21 = vmin.f32 %v10775_v1, 0.0  ;;  %v12381_v20 = vadd.f32 %v10678_v8, %v8137_v58  ;;  %vm10781_vm11 = vcmp.gt.f32.partialorder %v10775_v1, 0.0 }
 0xf4f   : > { %v10792_v59 = vmul.f32 1.442695, %v10786_v26  ;;  %v10777_v12 = vadd.f32 %v12380_v23, %v10772_v40 }
 0xf50   : > { %v10794_v32 = vmul.f32 1.442695, %v10787_v21  ;;  %v10778_v30 = vadd.f32 %v12381_v20, %v10772_v40  ;;  %v12027_v35 = vpop.f32.mrb[46].mxu1 }
 0xf51   : > { %13068 = vpow2.f32 %v10792_v59  ;;  %v10789_v3 = vmin.f32 %v10777_v12, 0.0  ;;  %v10779_v52 = vadd.f32 %v12027_v35, %v10772_v40  ;;  %v10747_v57 = vpop.f32.mrb[47].mxu1  ;;  %vm10783_vm14 = vcmp.gt.f32.partialorder %v10777_v12, 0.0 }
 0xf52   : > { %13070 = vpow2.f32 %v10794_v32  ;;  %v10790_v2 = vmin.f32 %v10778_v30, 0.0  ;;  %v10776_v5 = vadd.f32 %v10767_v16, %v10747_v57  ;;  %vm10784_vm5 = vcmp.gt.f32.partialorder %v10778_v30, 0.0 }
 0xf53   : > { %v10798_v39 = vmul.f32 1.442695, %v10789_v3  ;;  %v10791_v36 = vmin.f32 %v10779_v52, 0.0  ;;  %vm10785_vm15 = vcmp.gt.f32.partialorder %v10779_v52, 0.0 }
 0xf54   : > { %v10800_v11 = vmul.f32 1.442695, %v10790_v2  ;;  %v10788_v51 = vmin.f32 %v10776_v5, 0.0  ;;  %vm10782_vm6 = vcmp.gt.f32.partialorder %v10776_v5, 0.0 }
 0xf55   : > { %13072 = vpow2.f32 %v10798_v39  ;;  %v10802_v38 = vmul.f32 1.442695, %v10791_v36 }
 0xf56   : > { %13074 = vpow2.f32 %v10800_v11  ;;  %v10796_v54 = vmul.f32 1.442695, %v10788_v51 }
 0xf57   : > { %13076 = vpow2.f32 %v10802_v38 }
 0xf58   : > { %13078 = vpow2.f32 %v10796_v54 }
 0xf5b   : > { %v13069_v37 = vpop.eup %13068 }
 0xf5c   : > { %v13071_v53 = vpop.eup %13070  ;;  %v11248_v50 = vadd.f32 -1.0, %v13069_v37 }
 0xf5d   : > { %v11249_v6 = vadd.f32 -1.0, %v13071_v53 }
 0xf5e   : > { %v10810_v9 = vmul.f32 1.6732632, %v11248_v50 }
 0xf5f   : > { %v13073_v22 = vpop.eup %13072  ;;  %v10811_v61 = vmul.f32 1.6732632, %v11249_v6 }
 0xf60   : > { %v13075_v25 = vpop.eup %13074  ;;  %v10816_v31 = vsel %vm10780_vm4, %v10774_v28, %v10810_v9  ;;  %v11251_v56 = vadd.f32 -1.0, %v13073_v22 }
 0xf61   : > { %v13077_v62 = vpop.eup %13076  ;;  %v10822_v27 = vmul.f32 1.050701, %v10816_v31  ;;  %v10817_v49 = vsel %vm10781_vm11, %v10775_v1, %v10811_v61  ;;  %v11252_v45 = vadd.f32 -1.0, %v13075_v25 }
 0xf62   : > { %v13079_v17 = vpop.eup %13078  ;;  %v10823_v16 = vmul.f32 1.050701, %v10817_v49  ;;  %v10813_v43 = vmul.f32 1.6732632, %v11251_v56  ;;  %v11253_v7 = vadd.f32 -1.0, %v13077_v62 }
 0xf63   : > { %v10828_v24 = vmul.f32 %v10822_v27, %v13904_v63  ;;  %v10814_v60 = vmul.f32 1.6732632, %v11252_v45  ;;  %v11250_v10 = vadd.f32 -1.0, %v13079_v17 }
 0xf64   : > { %v10829_v29 = vmul.f32 %v10823_v16, %v13907_v0  ;;  %v10819_v42 = vsel %vm10783_vm14, %v10777_v12, %v10813_v43  ;;  %v10815_v4 = vmul.f32 1.6732632, %v11253_v7 }
 0xf65   : > { %v10825_v55 = vmul.f32 1.050701, %v10819_v42  ;;  %v10820_v46 = vsel %vm10784_vm5, %v10778_v30, %v10814_v60  ;;  %v10812_v44 = vmul.f32 1.6732632, %v11250_v10 }
 0xf66   : > { %v10826_v47 = vmul.f32 1.050701, %v10820_v46  ;;  %v10821_v18 = vsel %vm10785_vm15, %v10779_v52, %v10815_v4 }
 0xf67   : > { %v10831_v58 = vmul.f32 %v10825_v55, %v14158_v13  ;;  %v10827_v34 = vmul.f32 1.050701, %v10821_v18  ;;  %v10818_v63 = vsel %vm10782_vm6, %v10776_v5, %v10812_v44 }
 0xf68   : > { %v10832_v0 = vmul.f32 %v10826_v47, %v14162_v41  ;;  %v10824_v19 = vmul.f32 1.050701, %v10818_v63 }
 0xf69   : > { %v10834_v48 = vadd.f32 %v10831_v58, %v10828_v24  ;;  %v10833_v28 = vmul.f32 %v10827_v34, %v14160_v14 }
 0xf6a   : > { %v10835_v1 = vadd.f32 %v10832_v0, %v10829_v29  ;;  %v10830_v33 = vmul.f32 %v10824_v19, %v13912_v15 }
 0xf6b   : > { %10837 = vst [vmem:[%s777_s9] sm:$0xff] %v10834_v48 }
 0xf6c   : > { %10838 = vst [vmem:[%s777_s9 + $0x8] sm:$0xff] %v10835_v1  ;;  %v10836_v26 = vadd.f32 %v10833_v28, %v10830_v33 }
 0xf6e   : > { %10839 = vst.msk [vmem:[%s777_s9 + $0x10] sm:$0xff] %vm1026_vm3, %v10836_v26 }
 0xf6f PF: > { %s36_s29 = sadd.s32 1, %s13102_s29  }
 0xf70   : > { %p33_p4 = scmp.ge.s32.totalorder %s36_s29, 4  }
 0xf72   :  { %35 = sbr.rel (!%p33_p4) target bundleno = 11 (0xb), region = 208 }

</bundles_post_ra>
